<compile_context>
chip_gen: v5e
topology: v5e:2x2
jax: 0.10.0
libtpu: 0.0.40
codegen_flags: <defaults>
</compile_context>

<pallas_src>
import jax
import jax.numpy as jnp
from jax import lax
from jax.experimental import pallas as pl
from jax.experimental.pallas import tpu as pltpu


def _round_up(x, m):
    return (x + m - 1) // m * m


# ----------------------------------------------------------------------------
# Pallas kernel: full T-step, B-stream decode in one invocation.
# ----------------------------------------------------------------------------
def decoder_gru_kernel(x_ref,              # (T, Bp, Hp) bf16  relu(emb[tok])
                       h0_ref,             # (Bp, Hp)    f32   initial hidden
                       wih_ref, bih_ref,   # (Hp, 3Hp) bf16, (1, 3Hp) f32
                       whh_ref, bhh_ref,   # (Hp, 3Hp) bf16, (1, 3Hp) f32
                       wout_ref, bout_ref,  # (Hp, Op) bf16,  (1, Op)  f32 (pad lanes = -1e30)
                       logp_ref,           # out (T, Bp, Op) f32
                       hout_ref,           # out (Bp, Hp)    f32
                       gi_scr,             # VMEM (T, Bp, 3Hp) f32
                       h_all_scr):         # VMEM (T, Bp, Hp)  f32
    T, Bp, Hp = x_ref.shape
    Op = logp_ref.shape[-1]

    # (1) Input-to-hidden matmul hoisted out of the recurrence:
    #     one MXU matmul with M = T*Bp instead of T matmuls with M = 1.
    x_all = x_ref[...].reshape(T * Bp, Hp)                            # bf16
    gi_all = jnp.dot(x_all, wih_ref[...],
                     preferred_element_type=jnp.float32) + bih_ref[...]
    gi_scr[...] = gi_all.reshape(T, Bp, 3 * Hp)

    # (2) Sequential recurrence: only the hidden-to-hidden matmul (M = Bp)
    #     and the f32 gate math stay on the critical path.
    #     PyTorch GRU gate order: r | z | n.
    def step(t, h):
        gi = gi_scr[t]                                                # (Bp, 3Hp) f32
        gh = jnp.dot(h.astype(whh_ref.dtype), whh_ref[...],
                     preferred_element_type=jnp.float32) + bhh_ref[...]
        i_r, i_z, i_n = gi[:, 0:Hp], gi[:, Hp:2 * Hp], gi[:, 2 * Hp:3 * Hp]
        h_r, h_z, h_n = gh[:, 0:Hp], gh[:, Hp:2 * Hp], gh[:, 2 * Hp:3 * Hp]
        r = jax.nn.sigmoid(i_r + h_r)
        z = jax.nn.sigmoid(i_z + h_z)
        n = jnp.tanh(i_n + r * h_n)
        h_new = (1.0 - z) * n + z * h
        h_all_scr[t] = h_new
        return h_new

    h_final = lax.fori_loop(0, T, step, h0_ref[...], unroll=True)
    hout_ref[...] = h_final          # written exactly once, after the loop

    # (3) Vocab projection + log-softmax hoisted out of the loop (M = T*Bp).
    #     Pad vocab lanes already carry a -1e30 bias -> no per-step masking.
    h_all = h_all_scr[...].reshape(T * Bp, Hp).astype(wout_ref.dtype)
    logits = jnp.dot(h_all, wout_ref[...],
                     preferred_element_type=jnp.float32) + bout_ref[...]
    m = jnp.max(logits, axis=-1, keepdims=True)
    shifted = logits - m
    lse = jnp.log(jnp.sum(jnp.exp(shifted), axis=-1, keepdims=True))
    logp_ref[...] = (shifted - lse).reshape(T, Bp, Op)


# ----------------------------------------------------------------------------
# One-time parameter repack (do NOT call per step): transpose, pad to
# lane-dense 128-multiples, cast matmul weights to bf16, precompute
# relu(embedding), bake the pad-vocab mask into b_out.
# ----------------------------------------------------------------------------
def prepare_params(params):
    emb = params["embedding"]                       # (O, H) f32
    O, H = emb.shape
    Hp = _round_up(H, 128)
    Op = _round_up(O, 128)

    def pad_gate_w(w):                              # (3H, H) -> (Hp, 3Hp) bf16
        wt = w.T                                    # (H, 3H), gate order r|z|n
        out = jnp.zeros((Hp, 3 * Hp), jnp.float32)
        for g in range(3):
            out = out.at[:H, g * Hp:g * Hp + H].set(wt[:, g * H:(g + 1) * H])
        return out.astype(jnp.bfloat16)

    def pad_gate_b(b):                              # (3H,) -> (1, 3Hp) f32
        out = jnp.zeros((1, 3 * Hp), jnp.float32)
        for g in range(3):
            out = out.at[0, g * Hp:g * Hp + H].set(b[g * H:(g + 1) * H])
        return out

    # relu(embedding), zero-padded, bf16 (token-static -> precompute once).
    relu_emb = jnp.zeros((O, Hp), jnp.float32).at[:, :H].set(
        jnp.maximum(emb, 0.0)).astype(jnp.bfloat16)

    wout_p = jnp.zeros((Hp, Op), jnp.float32).at[:H, :O].set(params["w_out"].T)
    # Large finite negative on pad vocab lanes (safer than -inf in max/exp path).
    bout_p = jnp.full((1, Op), -1e30, jnp.float32).at[0, :O].set(params["b_out"])

    return {
        "H": H, "O": O, "Hp": Hp, "Op": Op,
        "relu_emb": relu_emb,
        "w_ih_t": pad_gate_w(params["w_ih"]),
        "w_hh_t": pad_gate_w(params["w_hh"]),
        "b_ih": pad_gate_b(params["b_ih"]),
        "b_hh": pad_gate_b(params["b_hh"]),
        "w_out_t": wout_p.astype(jnp.bfloat16),
        "b_out": bout_p,
    }


# ----------------------------------------------------------------------------
# Multi-step, multi-stream decode: T module-forward applications for B
# independent streams inside one pallas_call.
# ----------------------------------------------------------------------------
def decoder_rnn_decode(tokens, hidden, prepped):
    """tokens: (T, B) int token ids; hidden: (B, H) f32 per-stream hidden.
    Returns (log_probs (T, B, O) f32, hidden_new (B, H) f32)."""
    H, O, Hp, Op = prepped["H"], prepped["O"], prepped["Hp"], prepped["Op"]
    T, B = int(tokens.shape[0]), int(tokens.shape[1])
    Bp = max(8, _round_up(B, 8))          # sublane-dense batch (>=8 rows)

    # Clamp token ids (no silent OOB gather) and pad the stream axis.
    tok = jnp.clip(tokens.astype(jnp.int32), 0, O - 1)
    tok = jnp.pad(tok, ((0, 0), (0, Bp - B)))
    # One-time gather of precomputed relu(embedding) rows: (T, Bp, Hp) bf16.
    x_all = jnp.take(prepped["relu_emb"], tok, axis=0)

    h0 = jnp.zeros((Bp, Hp), jnp.float32).at[:B, :H].set(
        hidden.reshape(B, H).astype(jnp.float32))

    logp_p, h_p = pl.pallas_call(
        decoder_gru_kernel,
        out_shape=(jax.ShapeDtypeStruct((T, Bp, Op), jnp.float32),
                   jax.ShapeDtypeStruct((Bp, Hp), jnp.float32)),
        scratch_shapes=[pltpu.VMEM((T, Bp, 3 * Hp), jnp.float32),
                        pltpu.VMEM((T, Bp, Hp), jnp.float32)],
    )(x_all, h0,
      prepped["w_ih_t"], prepped["b_ih"],
      prepped["w_hh_t"], prepped["b_hh"],
      prepped["w_out_t"], prepped["b_out"])

    return logp_p[:, :B, :O], h_p[:B, :H]


# Single-step, single-stream wrapper matching the original module forward.
def decoder_rnn_forward(token, hidden, prepped):
    """token: (1,1) int32, hidden: (1,1,H). Returns ((1,O) logp, (1,1,H) hidden)."""
    H = prepped["H"]
    logp, h_new = decoder_rnn_decode(token.reshape(1, 1), hidden.reshape(1, H),
                                     prepped)
    return logp.reshape(1, prepped["O"]), h_new.reshape(1, 1, H)


# ----------------------------------------------------------------------------
# Pure-JAX reference (mirrors PyTorch forward, with the same bf16 weight
# quantization + f32 accumulation the kernel uses).
# ----------------------------------------------------------------------------
def decoder_rnn_reference_step(token_scalar, hidden, params):
    H = params["embedding"].shape[1]
    wih = params["w_ih"].T.astype(jnp.bfloat16)
    whh = params["w_hh"].T.astype(jnp.bfloat16)
    wout = params["w_out"].T.astype(jnp.bfloat16)
    x = jnp.take(params["embedding"], token_scalar, axis=0).reshape(1, H)
    x = jnp.maximum(x, 0.0)
    h = hidden.reshape(1, H)
    gi = jnp.dot(x.astype(jnp.bfloat16), wih,
                 preferred_element_type=jnp.float32) + params["b_ih"]
    gh = jnp.dot(h.astype(jnp.bfloat16), whh,
                 preferred_element_type=jnp.float32) + params["b_hh"]
    i_r, i_z, i_n = jnp.split(gi, 3, axis=1)
    h_r, h_z, h_n = jnp.split(gh, 3, axis=1)
    r = jax.nn.sigmoid(i_r + h_r)
    z = jax.nn.sigmoid(i_z + h_z)
    n = jnp.tanh(i_n + r * h_n)
    h_new = (1.0 - z) * n + z * h
    logits = jnp.dot(h_new.astype(jnp.bfloat16), wout,
                     preferred_element_type=jnp.float32) + params["b_out"]
    logp = jax.nn.log_softmax(logits, axis=1)
    return logp, h_new.reshape(1, 1, H)


# ----------------------------------------------------------------------------
# Deterministic parameter init (PyTorch-default-style uniform scaling)
# ----------------------------------------------------------------------------
def init_params(key, hidden_size, output_size):
    ks = jax.random.split(key, 7)
    bound = 1.0 / jnp.sqrt(hidden_size)
    u = lambda k, shape: jax.random.uniform(k, shape, jnp.float32, -bound, bound)
    return {
        "embedding": jax.random.normal(ks[0], (output_size, hidden_size), jnp.float32),
        "w_ih": u(ks[1], (3 * hidden_size, hidden_size)),
        "w_hh": u(ks[2], (3 * hidden_size, hidden_size)),
        "b_ih": u(ks[3], (3 * hidden_size,)),
        "b_hh": u(ks[4], (3 * hidden_size,)),
        "w_out": u(ks[5], (output_size, hidden_size)),
        "b_out": u(ks[6], (output_size,)),
    }


if __name__ == "__main__":
    hidden_size = 32
    output_size = 64   # vocabulary size
    T = 8              # decode steps (all run inside one kernel launch)
    B = 8              # independent decode streams (batched MXU LHS)

    key = jax.random.PRNGKey(0)
    params = init_params(key, hidden_size, output_size)
    prepped = prepare_params(params)   # one-time repack (no per-step work)

    tokens = jax.random.randint(jax.random.PRNGKey(1), (T, B), 0, output_size,
                                dtype=jnp.int32)
    hidden0 = jnp.zeros((B, hidden_size), dtype=jnp.float32)   # initHidden() per stream

    # Batched multi-step decode: one pallas_call for all T steps x B streams.
    logp_seq, h_final = decoder_rnn_decode(tokens, hidden0, prepped)
    jax.block_until_ready((logp_seq, h_final))

    # Reference: apply the module forward T times per stream, carrying hidden.
    ref_rows = [[None] * B for _ in range(T)]
    h_ref_rows = []
    for b in range(B):
        h_ref = jnp.zeros((1, 1, hidden_size), jnp.float32)
        for t in range(T):
            lp, h_ref = decoder_rnn_reference_step(tokens[t, b], h_ref, params)
            ref_rows[t][b] = lp[0]
        h_ref_rows.append(h_ref.reshape(hidden_size))
    logp_ref = jnp.stack([jnp.stack(r) for r in ref_rows])     # (T, B, O)
    h_ref_final = jnp.stack(h_ref_rows)                        # (B, H)

    assert logp_seq.shape == (T, B, output_size)
    assert h_final.shape == (B, hidden_size)
    assert jnp.allclose(logp_seq, logp_ref, atol=2e-3, rtol=2e-3), \
        float(jnp.max(jnp.abs(logp_seq - logp_ref)))
    assert jnp.allclose(h_final, h_ref_final, atol=2e-3, rtol=2e-3), \
        float(jnp.max(jnp.abs(h_final - h_ref_final)))

    # Single-step call with the original module signature.
    token = jnp.array([[3]], dtype=jnp.int32)
    hidden_single = jnp.zeros((1, 1, hidden_size), dtype=jnp.float32)
    lp1, h1 = decoder_rnn_forward(token, hidden_single, prepped)
    lp1_ref, h1_ref = decoder_rnn_reference_step(jnp.int32(3), hidden_single, params)
    assert lp1.shape == (1, output_size) and h1.shape == (1, 1, hidden_size)
    assert jnp.allclose(lp1, lp1_ref, atol=2e-3, rtol=2e-3)
    assert jnp.allclose(h1, h1_ref, atol=2e-3, rtol=2e-3)

    print("KERNEL_OK")
</pallas_src>

<mosaic_0001>
module attributes {stable_mosaic.version = 11 : i64} {
  func.func @decoder_gru_kernel(%arg0: memref<8x8x128xbf16, #tpu.memory_space<vmem>>, %arg1: memref<8x128xf32, #tpu.memory_space<vmem>>, %arg2: memref<128x384xbf16, #tpu.memory_space<vmem>>, %arg3: memref<1x384xf32, #tpu.memory_space<vmem>>, %arg4: memref<128x384xbf16, #tpu.memory_space<vmem>>, %arg5: memref<1x384xf32, #tpu.memory_space<vmem>>, %arg6: memref<128x128xbf16, #tpu.memory_space<vmem>>, %arg7: memref<1x128xf32, #tpu.memory_space<vmem>>, %arg8: memref<8x8x128xf32, #tpu.memory_space<vmem>>, %arg9: memref<8x128xf32, #tpu.memory_space<vmem>>, %arg10: memref<8x8x384xf32, #tpu.memory_space<vmem>>, %arg11: memref<8x8x128xf32, #tpu.memory_space<vmem>>) attributes {dimension_semantics = [], scalar_prefetch = 0 : i64, scratch_operands = 2 : i64, tpu.core_type = #tpu.core_type<tc>} {
    %c0 = arith.constant 0 : index
    %c0_0 = arith.constant 0 : index
    %c0_1 = arith.constant 0 : index
    %0 = vector.load %arg0[%c0, %c0_0, %c0_1] : memref<8x8x128xbf16, #tpu.memory_space<vmem>>, vector<8x8x128xbf16>
    %1 = vector.shape_cast %0 : vector<8x8x128xbf16> to vector<64x128xbf16>
    %c0_2 = arith.constant 0 : index
    %c0_3 = arith.constant 0 : index
    %2 = vector.load %arg2[%c0_2, %c0_3] : memref<128x384xbf16, #tpu.memory_space<vmem>>, vector<128x384xbf16>
    %cst = arith.constant dense<0.000000e+00> : vector<64x384xf32>
    %3 = tpu.matmul %1, %2, %cst {dimension_numbers = #tpu.dot_dimension_numbers<[1], [0], [0], [1], [0, 0, 1, 1], [], []>} : vector<64x128xbf16>, vector<128x384xbf16>, vector<64x384xf32> -> vector<64x384xf32>
    %c0_4 = arith.constant 0 : index
    %c0_5 = arith.constant 0 : index
    %4 = vector.load %arg3[%c0_4, %c0_5] : memref<1x384xf32, #tpu.memory_space<vmem>>, vector<1x384xf32>
    %5 = vector.broadcast %4 : vector<1x384xf32> to vector<64x384xf32>
    %6 = arith.addf %3, %5 : vector<64x384xf32>
    %7 = vector.shape_cast %6 : vector<64x384xf32> to vector<8x8x384xf32>
    %c0_6 = arith.constant 0 : index
    %c0_7 = arith.constant 0 : index
    %c0_8 = arith.constant 0 : index
    %8 = vector.load %arg10[%c0_6, %c0_7, %c0_8] : memref<8x8x384xf32, #tpu.memory_space<vmem>>, vector<8x8x384xf32>
    tpu.vector_store %arg10[%c0_6, %c0_7, %c0_8], %7 {strides = array<i32>} : memref<8x8x384xf32, #tpu.memory_space<vmem>>, vector<8x8x384xf32>,
    %c0_9 = arith.constant 0 : index
    %c0_10 = arith.constant 0 : index
    %9 = vector.load %arg1[%c0_9, %c0_10] : memref<8x128xf32, #tpu.memory_space<vmem>>, vector<8x128xf32>
    %c0_i32 = arith.constant 0 : i32
    %10 = arith.index_cast %c0_i32 : i32 to index
    %c0_11 = arith.constant 0 : index
    %c0_12 = arith.constant 0 : index
    %11 = vector.load %arg10[%10, %c0_11, %c0_12] : memref<8x8x384xf32, #tpu.memory_space<vmem>>, vector<1x8x384xf32>
    %12 = vector.shape_cast %11 : vector<1x8x384xf32> to vector<8x384xf32>
    %13 = arith.truncf %9 : vector<8x128xf32> to vector<8x128xbf16>
    %c0_13 = arith.constant 0 : index
    %c0_14 = arith.constant 0 : index
    %14 = vector.load %arg4[%c0_13, %c0_14] : memref<128x384xbf16, #tpu.memory_space<vmem>>, vector<128x384xbf16>
    %cst_15 = arith.constant dense<0.000000e+00> : vector<8x384xf32>
    %15 = tpu.matmul %13, %14, %cst_15 {dimension_numbers = #tpu.dot_dimension_numbers<[1], [0], [0], [1], [0, 0, 1, 1], [], []>} : vector<8x128xbf16>, vector<128x384xbf16>, vector<8x384xf32> -> vector<8x384xf32>
    %c0_16 = arith.constant 0 : index
    %c0_17 = arith.constant 0 : index
    %16 = vector.load %arg5[%c0_16, %c0_17] : memref<1x384xf32, #tpu.memory_space<vmem>>, vector<1x384xf32>
    %17 = vector.broadcast %16 : vector<1x384xf32> to vector<8x384xf32>
    %18 = arith.addf %15, %17 : vector<8x384xf32>
    %19 = vector.extract_strided_slice %12 {offsets = [0, 0], sizes = [8, 128], strides = [1, 1]} : vector<8x384xf32> to vector<8x128xf32>
    %20 = vector.extract_strided_slice %12 {offsets = [0, 128], sizes = [8, 128], strides = [1, 1]} : vector<8x384xf32> to vector<8x128xf32>
    %21 = vector.extract_strided_slice %12 {offsets = [0, 256], sizes = [8, 128], strides = [1, 1]} : vector<8x384xf32> to vector<8x128xf32>
    %22 = vector.extract_strided_slice %18 {offsets = [0, 0], sizes = [8, 128], strides = [1, 1]} : vector<8x384xf32> to vector<8x128xf32>
    %23 = vector.extract_strided_slice %18 {offsets = [0, 128], sizes = [8, 128], strides = [1, 1]} : vector<8x384xf32> to vector<8x128xf32>
    %24 = vector.extract_strided_slice %18 {offsets = [0, 256], sizes = [8, 128], strides = [1, 1]} : vector<8x384xf32> to vector<8x128xf32>
    %25 = arith.addf %19, %22 : vector<8x128xf32>
    %26 = arith.negf %25 : vector<8x128xf32>
    %27 = math.exp %26 : vector<8x128xf32>
    %cst_18 = arith.constant 1.000000e+00 : f32
    %28 = vector.broadcast %cst_18 : f32 to vector<8x128xf32>
    %29 = arith.addf %28, %27 : vector<8x128xf32>
    %30 = arith.divf %28, %29 : vector<8x128xf32>
    %31 = arith.addf %20, %23 : vector<8x128xf32>
    %32 = arith.negf %31 : vector<8x128xf32>
    %33 = math.exp %32 : vector<8x128xf32>
    %cst_19 = arith.constant 1.000000e+00 : f32
    %34 = vector.broadcast %cst_19 : f32 to vector<8x128xf32>
    %35 = arith.addf %34, %33 : vector<8x128xf32>
    %36 = arith.divf %34, %35 : vector<8x128xf32>
    %37 = arith.mulf %30, %24 : vector<8x128xf32>
    %38 = arith.addf %21, %37 : vector<8x128xf32>
    %39 = math.tanh %38 : vector<8x128xf32>
    %cst_20 = arith.constant 1.000000e+00 : f32
    %40 = vector.broadcast %cst_20 : f32 to vector<8x128xf32>
    %41 = arith.subf %40, %36 : vector<8x128xf32>
    %42 = arith.mulf %41, %39 : vector<8x128xf32>
    %43 = arith.mulf %36, %9 : vector<8x128xf32>
    %44 = arith.addf %42, %43 : vector<8x128xf32>
    %45 = arith.index_cast %c0_i32 : i32 to index
    %c0_21 = arith.constant 0 : index
    %c0_22 = arith.constant 0 : index
    %46 = vector.load %arg11[%45, %c0_21, %c0_22] : memref<8x8x128xf32, #tpu.memory_space<vmem>>, vector<1x8x128xf32>
    %47 = vector.shape_cast %46 : vector<1x8x128xf32> to vector<8x128xf32>
    %48 = vector.shape_cast %44 : vector<8x128xf32> to vector<1x8x128xf32>
    tpu.vector_store %arg11[%45, %c0_21, %c0_22], %48 {strides = array<i32>} : memref<8x8x128xf32, #tpu.memory_space<vmem>>, vector<1x8x128xf32>,
    %c1_i32 = arith.constant 1 : i32
    %49 = arith.index_cast %c1_i32 : i32 to index
    %c0_23 = arith.constant 0 : index
    %c0_24 = arith.constant 0 : index
    %50 = vector.load %arg10[%49, %c0_23, %c0_24] : memref<8x8x384xf32, #tpu.memory_space<vmem>>, vector<1x8x384xf32>
    %51 = vector.shape_cast %50 : vector<1x8x384xf32> to vector<8x384xf32>
    %52 = arith.truncf %44 : vector<8x128xf32> to vector<8x128xbf16>
    %c0_25 = arith.constant 0 : index
    %c0_26 = arith.constant 0 : index
    %53 = vector.load %arg4[%c0_25, %c0_26] : memref<128x384xbf16, #tpu.memory_space<vmem>>, vector<128x384xbf16>
    %cst_27 = arith.constant dense<0.000000e+00> : vector<8x384xf32>
    %54 = tpu.matmul %52, %53, %cst_27 {dimension_numbers = #tpu.dot_dimension_numbers<[1], [0], [0], [1], [0, 0, 1, 1], [], []>} : vector<8x128xbf16>, vector<128x384xbf16>, vector<8x384xf32> -> vector<8x384xf32>
    %c0_28 = arith.constant 0 : index
    %c0_29 = arith.constant 0 : index
    %55 = vector.load %arg5[%c0_28, %c0_29] : memref<1x384xf32, #tpu.memory_space<vmem>>, vector<1x384xf32>
    %56 = vector.broadcast %55 : vector<1x384xf32> to vector<8x384xf32>
    %57 = arith.addf %54, %56 : vector<8x384xf32>
    %58 = vector.extract_strided_slice %51 {offsets = [0, 0], sizes = [8, 128], strides = [1, 1]} : vector<8x384xf32> to vector<8x128xf32>
    %59 = vector.extract_strided_slice %51 {offsets = [0, 128], sizes = [8, 128], strides = [1, 1]} : vector<8x384xf32> to vector<8x128xf32>
    %60 = vector.extract_strided_slice %51 {offsets = [0, 256], sizes = [8, 128], strides = [1, 1]} : vector<8x384xf32> to vector<8x128xf32>
    %61 = vector.extract_strided_slice %57 {offsets = [0, 0], sizes = [8, 128], strides = [1, 1]} : vector<8x384xf32> to vector<8x128xf32>
    %62 = vector.extract_strided_slice %57 {offsets = [0, 128], sizes = [8, 128], strides = [1, 1]} : vector<8x384xf32> to vector<8x128xf32>
    %63 = vector.extract_strided_slice %57 {offsets = [0, 256], sizes = [8, 128], strides = [1, 1]} : vector<8x384xf32> to vector<8x128xf32>
    %64 = arith.addf %58, %61 : vector<8x128xf32>
    %65 = arith.negf %64 : vector<8x128xf32>
    %66 = math.exp %65 : vector<8x128xf32>
    %cst_30 = arith.constant 1.000000e+00 : f32
    %67 = vector.broadcast %cst_30 : f32 to vector<8x128xf32>
    %68 = arith.addf %67, %66 : vector<8x128xf32>
    %69 = arith.divf %67, %68 : vector<8x128xf32>
    %70 = arith.addf %59, %62 : vector<8x128xf32>
    %71 = arith.negf %70 : vector<8x128xf32>
    %72 = math.exp %71 : vector<8x128xf32>
    %cst_31 = arith.constant 1.000000e+00 : f32
    %73 = vector.broadcast %cst_31 : f32 to vector<8x128xf32>
    %74 = arith.addf %73, %72 : vector<8x128xf32>
    %75 = arith.divf %73, %74 : vector<8x128xf32>
    %76 = arith.mulf %69, %63 : vector<8x128xf32>
    %77 = arith.addf %60, %76 : vector<8x128xf32>
    %78 = math.tanh %77 : vector<8x128xf32>
    %cst_32 = arith.constant 1.000000e+00 : f32
    %79 = vector.broadcast %cst_32 : f32 to vector<8x128xf32>
    %80 = arith.subf %79, %75 : vector<8x128xf32>
    %81 = arith.mulf %80, %78 : vector<8x128xf32>
    %82 = arith.mulf %75, %44 : vector<8x128xf32>
    %83 = arith.addf %81, %82 : vector<8x128xf32>
    %84 = arith.index_cast %c1_i32 : i32 to index
    %c0_33 = arith.constant 0 : index
    %c0_34 = arith.constant 0 : index
    %85 = vector.load %arg11[%84, %c0_33, %c0_34] : memref<8x8x128xf32, #tpu.memory_space<vmem>>, vector<1x8x128xf32>
    %86 = vector.shape_cast %85 : vector<1x8x128xf32> to vector<8x128xf32>
    %87 = vector.shape_cast %83 : vector<8x128xf32> to vector<1x8x128xf32>
    tpu.vector_store %arg11[%84, %c0_33, %c0_34], %87 {strides = array<i32>} : memref<8x8x128xf32, #tpu.memory_space<vmem>>, vector<1x8x128xf32>,
    %c2_i32 = arith.constant 2 : i32
    %88 = arith.index_cast %c2_i32 : i32 to index
    %c0_35 = arith.constant 0 : index
    %c0_36 = arith.constant 0 : index
    %89 = vector.load %arg10[%88, %c0_35, %c0_36] : memref<8x8x384xf32, #tpu.memory_space<vmem>>, vector<1x8x384xf32>
    %90 = vector.shape_cast %89 : vector<1x8x384xf32> to vector<8x384xf32>
    %91 = arith.truncf %83 : vector<8x128xf32> to vector<8x128xbf16>
    %c0_37 = arith.constant 0 : index
    %c0_38 = arith.constant 0 : index
    %92 = vector.load %arg4[%c0_37, %c0_38] : memref<128x384xbf16, #tpu.memory_space<vmem>>, vector<128x384xbf16>
    %cst_39 = arith.constant dense<0.000000e+00> : vector<8x384xf32>
    %93 = tpu.matmul %91, %92, %cst_39 {dimension_numbers = #tpu.dot_dimension_numbers<[1], [0], [0], [1], [0, 0, 1, 1], [], []>} : vector<8x128xbf16>, vector<128x384xbf16>, vector<8x384xf32> -> vector<8x384xf32>
    %c0_40 = arith.constant 0 : index
    %c0_41 = arith.constant 0 : index
    %94 = vector.load %arg5[%c0_40, %c0_41] : memref<1x384xf32, #tpu.memory_space<vmem>>, vector<1x384xf32>
    %95 = vector.broadcast %94 : vector<1x384xf32> to vector<8x384xf32>
    %96 = arith.addf %93, %95 : vector<8x384xf32>
    %97 = vector.extract_strided_slice %90 {offsets = [0, 0], sizes = [8, 128], strides = [1, 1]} : vector<8x384xf32> to vector<8x128xf32>
    %98 = vector.extract_strided_slice %90 {offsets = [0, 128], sizes = [8, 128], strides = [1, 1]} : vector<8x384xf32> to vector<8x128xf32>
    %99 = vector.extract_strided_slice %90 {offsets = [0, 256], sizes = [8, 128], strides = [1, 1]} : vector<8x384xf32> to vector<8x128xf32>
    %100 = vector.extract_strided_slice %96 {offsets = [0, 0], sizes = [8, 128], strides = [1, 1]} : vector<8x384xf32> to vector<8x128xf32>
    %101 = vector.extract_strided_slice %96 {offsets = [0, 128], sizes = [8, 128], strides = [1, 1]} : vector<8x384xf32> to vector<8x128xf32>
    %102 = vector.extract_strided_slice %96 {offsets = [0, 256], sizes = [8, 128], strides = [1, 1]} : vector<8x384xf32> to vector<8x128xf32>
    %103 = arith.addf %97, %100 : vector<8x128xf32>
    %104 = arith.negf %103 : vector<8x128xf32>
    %105 = math.exp %104 : vector<8x128xf32>
    %cst_42 = arith.constant 1.000000e+00 : f32
    %106 = vector.broadcast %cst_42 : f32 to vector<8x128xf32>
    %107 = arith.addf %106, %105 : vector<8x128xf32>
    %108 = arith.divf %106, %107 : vector<8x128xf32>
    %109 = arith.addf %98, %101 : vector<8x128xf32>
    %110 = arith.negf %109 : vector<8x128xf32>
    %111 = math.exp %110 : vector<8x128xf32>
    %cst_43 = arith.constant 1.000000e+00 : f32
    %112 = vector.broadcast %cst_43 : f32 to vector<8x128xf32>
    %113 = arith.addf %112, %111 : vector<8x128xf32>
    %114 = arith.divf %112, %113 : vector<8x128xf32>
    %115 = arith.mulf %108, %102 : vector<8x128xf32>
    %116 = arith.addf %99, %115 : vector<8x128xf32>
    %117 = math.tanh %116 : vector<8x128xf32>
    %cst_44 = arith.constant 1.000000e+00 : f32
    %118 = vector.broadcast %cst_44 : f32 to vector<8x128xf32>
    %119 = arith.subf %118, %114 : vector<8x128xf32>
    %120 = arith.mulf %119, %117 : vector<8x128xf32>
    %121 = arith.mulf %114, %83 : vector<8x128xf32>
    %122 = arith.addf %120, %121 : vector<8x128xf32>
    %123 = arith.index_cast %c2_i32 : i32 to index
    %c0_45 = arith.constant 0 : index
    %c0_46 = arith.constant 0 : index
    %124 = vector.load %arg11[%123, %c0_45, %c0_46] : memref<8x8x128xf32, #tpu.memory_space<vmem>>, vector<1x8x128xf32>
    %125 = vector.shape_cast %124 : vector<1x8x128xf32> to vector<8x128xf32>
    %126 = vector.shape_cast %122 : vector<8x128xf32> to vector<1x8x128xf32>
    tpu.vector_store %arg11[%123, %c0_45, %c0_46], %126 {strides = array<i32>} : memref<8x8x128xf32, #tpu.memory_space<vmem>>, vector<1x8x128xf32>,
    %c3_i32 = arith.constant 3 : i32
    %127 = arith.index_cast %c3_i32 : i32 to index
    %c0_47 = arith.constant 0 : index
    %c0_48 = arith.constant 0 : index
    %128 = vector.load %arg10[%127, %c0_47, %c0_48] : memref<8x8x384xf32, #tpu.memory_space<vmem>>, vector<1x8x384xf32>
    %129 = vector.shape_cast %128 : vector<1x8x384xf32> to vector<8x384xf32>
    %130 = arith.truncf %122 : vector<8x128xf32> to vector<8x128xbf16>
    %c0_49 = arith.constant 0 : index
    %c0_50 = arith.constant 0 : index
    %131 = vector.load %arg4[%c0_49, %c0_50] : memref<128x384xbf16, #tpu.memory_space<vmem>>, vector<128x384xbf16>
    %cst_51 = arith.constant dense<0.000000e+00> : vector<8x384xf32>
    %132 = tpu.matmul %130, %131, %cst_51 {dimension_numbers = #tpu.dot_dimension_numbers<[1], [0], [0], [1], [0, 0, 1, 1], [], []>} : vector<8x128xbf16>, vector<128x384xbf16>, vector<8x384xf32> -> vector<8x384xf32>
    %c0_52 = arith.constant 0 : index
    %c0_53 = arith.constant 0 : index
    %133 = vector.load %arg5[%c0_52, %c0_53] : memref<1x384xf32, #tpu.memory_space<vmem>>, vector<1x384xf32>
    %134 = vector.broadcast %133 : vector<1x384xf32> to vector<8x384xf32>
    %135 = arith.addf %132, %134 : vector<8x384xf32>
    %136 = vector.extract_strided_slice %129 {offsets = [0, 0], sizes = [8, 128], strides = [1, 1]} : vector<8x384xf32> to vector<8x128xf32>
    %137 = vector.extract_strided_slice %129 {offsets = [0, 128], sizes = [8, 128], strides = [1, 1]} : vector<8x384xf32> to vector<8x128xf32>
    %138 = vector.extract_strided_slice %129 {offsets = [0, 256], sizes = [8, 128], strides = [1, 1]} : vector<8x384xf32> to vector<8x128xf32>
    %139 = vector.extract_strided_slice %135 {offsets = [0, 0], sizes = [8, 128], strides = [1, 1]} : vector<8x384xf32> to vector<8x128xf32>
    %140 = vector.extract_strided_slice %135 {offsets = [0, 128], sizes = [8, 128], strides = [1, 1]} : vector<8x384xf32> to vector<8x128xf32>
    %141 = vector.extract_strided_slice %135 {offsets = [0, 256], sizes = [8, 128], strides = [1, 1]} : vector<8x384xf32> to vector<8x128xf32>
    %142 = arith.addf %136, %139 : vector<8x128xf32>
    %143 = arith.negf %142 : vector<8x128xf32>
    %144 = math.exp %143 : vector<8x128xf32>
    %cst_54 = arith.constant 1.000000e+00 : f32
    %145 = vector.broadcast %cst_54 : f32 to vector<8x128xf32>
    %146 = arith.addf %145, %144 : vector<8x128xf32>
    %147 = arith.divf %145, %146 : vector<8x128xf32>
    %148 = arith.addf %137, %140 : vector<8x128xf32>
    %149 = arith.negf %148 : vector<8x128xf32>
    %150 = math.exp %149 : vector<8x128xf32>
    %cst_55 = arith.constant 1.000000e+00 : f32
    %151 = vector.broadcast %cst_55 : f32 to vector<8x128xf32>
    %152 = arith.addf %151, %150 : vector<8x128xf32>
    %153 = arith.divf %151, %152 : vector<8x128xf32>
    %154 = arith.mulf %147, %141 : vector<8x128xf32>
    %155 = arith.addf %138, %154 : vector<8x128xf32>
    %156 = math.tanh %155 : vector<8x128xf32>
    %cst_56 = arith.constant 1.000000e+00 : f32
    %157 = vector.broadcast %cst_56 : f32 to vector<8x128xf32>
    %158 = arith.subf %157, %153 : vector<8x128xf32>
    %159 = arith.mulf %158, %156 : vector<8x128xf32>
    %160 = arith.mulf %153, %122 : vector<8x128xf32>
    %161 = arith.addf %159, %160 : vector<8x128xf32>
    %162 = arith.index_cast %c3_i32 : i32 to index
    %c0_57 = arith.constant 0 : index
    %c0_58 = arith.constant 0 : index
    %163 = vector.load %arg11[%162, %c0_57, %c0_58] : memref<8x8x128xf32, #tpu.memory_space<vmem>>, vector<1x8x128xf32>
    %164 = vector.shape_cast %163 : vector<1x8x128xf32> to vector<8x128xf32>
    %165 = vector.shape_cast %161 : vector<8x128xf32> to vector<1x8x128xf32>
    tpu.vector_store %arg11[%162, %c0_57, %c0_58], %165 {strides = array<i32>} : memref<8x8x128xf32, #tpu.memory_space<vmem>>, vector<1x8x128xf32>,
    %c4_i32 = arith.constant 4 : i32
    %166 = arith.index_cast %c4_i32 : i32 to index
    %c0_59 = arith.constant 0 : index
    %c0_60 = arith.constant 0 : index
    %167 = vector.load %arg10[%166, %c0_59, %c0_60] : memref<8x8x384xf32, #tpu.memory_space<vmem>>, vector<1x8x384xf32>
    %168 = vector.shape_cast %167 : vector<1x8x384xf32> to vector<8x384xf32>
    %169 = arith.truncf %161 : vector<8x128xf32> to vector<8x128xbf16>
    %c0_61 = arith.constant 0 : index
    %c0_62 = arith.constant 0 : index
    %170 = vector.load %arg4[%c0_61, %c0_62] : memref<128x384xbf16, #tpu.memory_space<vmem>>, vector<128x384xbf16>
    %cst_63 = arith.constant dense<0.000000e+00> : vector<8x384xf32>
    %171 = tpu.matmul %169, %170, %cst_63 {dimension_numbers = #tpu.dot_dimension_numbers<[1], [0], [0], [1], [0, 0, 1, 1], [], []>} : vector<8x128xbf16>, vector<128x384xbf16>, vector<8x384xf32> -> vector<8x384xf32>
    %c0_64 = arith.constant 0 : index
    %c0_65 = arith.constant 0 : index
    %172 = vector.load %arg5[%c0_64, %c0_65] : memref<1x384xf32, #tpu.memory_space<vmem>>, vector<1x384xf32>
    %173 = vector.broadcast %172 : vector<1x384xf32> to vector<8x384xf32>
    %174 = arith.addf %171, %173 : vector<8x384xf32>
    %175 = vector.extract_strided_slice %168 {offsets = [0, 0], sizes = [8, 128], strides = [1, 1]} : vector<8x384xf32> to vector<8x128xf32>
    %176 = vector.extract_strided_slice %168 {offsets = [0, 128], sizes = [8, 128], strides = [1, 1]} : vector<8x384xf32> to vector<8x128xf32>
    %177 = vector.extract_strided_slice %168 {offsets = [0, 256], sizes = [8, 128], strides = [1, 1]} : vector<8x384xf32> to vector<8x128xf32>
    %178 = vector.extract_strided_slice %174 {offsets = [0, 0], sizes = [8, 128], strides = [1, 1]} : vector<8x384xf32> to vector<8x128xf32>
    %179 = vector.extract_strided_slice %174 {offsets = [0, 128], sizes = [8, 128], strides = [1, 1]} : vector<8x384xf32> to vector<8x128xf32>
    %180 = vector.extract_strided_slice %174 {offsets = [0, 256], sizes = [8, 128], strides = [1, 1]} : vector<8x384xf32> to vector<8x128xf32>
    %181 = arith.addf %175, %178 : vector<8x128xf32>
    %182 = arith.negf %181 : vector<8x128xf32>
    %183 = math.exp %182 : vector<8x128xf32>
    %cst_66 = arith.constant 1.000000e+00 : f32
    %184 = vector.broadcast %cst_66 : f32 to vector<8x128xf32>
    %185 = arith.addf %184, %183 : vector<8x128xf32>
    %186 = arith.divf %184, %185 : vector<8x128xf32>
    %187 = arith.addf %176, %179 : vector<8x128xf32>
    %188 = arith.negf %187 : vector<8x128xf32>
    %189 = math.exp %188 : vector<8x128xf32>
    %cst_67 = arith.constant 1.000000e+00 : f32
    %190 = vector.broadcast %cst_67 : f32 to vector<8x128xf32>
    %191 = arith.addf %190, %189 : vector<8x128xf32>
    %192 = arith.divf %190, %191 : vector<8x128xf32>
    %193 = arith.mulf %186, %180 : vector<8x128xf32>
    %194 = arith.addf %177, %193 : vector<8x128xf32>
    %195 = math.tanh %194 : vector<8x128xf32>
    %cst_68 = arith.constant 1.000000e+00 : f32
    %196 = vector.broadcast %cst_68 : f32 to vector<8x128xf32>
    %197 = arith.subf %196, %192 : vector<8x128xf32>
    %198 = arith.mulf %197, %195 : vector<8x128xf32>
    %199 = arith.mulf %192, %161 : vector<8x128xf32>
    %200 = arith.addf %198, %199 : vector<8x128xf32>
    %201 = arith.index_cast %c4_i32 : i32 to index
    %c0_69 = arith.constant 0 : index
    %c0_70 = arith.constant 0 : index
    %202 = vector.load %arg11[%201, %c0_69, %c0_70] : memref<8x8x128xf32, #tpu.memory_space<vmem>>, vector<1x8x128xf32>
    %203 = vector.shape_cast %202 : vector<1x8x128xf32> to vector<8x128xf32>
    %204 = vector.shape_cast %200 : vector<8x128xf32> to vector<1x8x128xf32>
    tpu.vector_store %arg11[%201, %c0_69, %c0_70], %204 {strides = array<i32>} : memref<8x8x128xf32, #tpu.memory_space<vmem>>, vector<1x8x128xf32>,
    %c5_i32 = arith.constant 5 : i32
    %205 = arith.index_cast %c5_i32 : i32 to index
    %c0_71 = arith.constant 0 : index
    %c0_72 = arith.constant 0 : index
    %206 = vector.load %arg10[%205, %c0_71, %c0_72] : memref<8x8x384xf32, #tpu.memory_space<vmem>>, vector<1x8x384xf32>
    %207 = vector.shape_cast %206 : vector<1x8x384xf32> to vector<8x384xf32>
    %208 = arith.truncf %200 : vector<8x128xf32> to vector<8x128xbf16>
    %c0_73 = arith.constant 0 : index
    %c0_74 = arith.constant 0 : index
    %209 = vector.load %arg4[%c0_73, %c0_74] : memref<128x384xbf16, #tpu.memory_space<vmem>>, vector<128x384xbf16>
    %cst_75 = arith.constant dense<0.000000e+00> : vector<8x384xf32>
    %210 = tpu.matmul %208, %209, %cst_75 {dimension_numbers = #tpu.dot_dimension_numbers<[1], [0], [0], [1], [0, 0, 1, 1], [], []>} : vector<8x128xbf16>, vector<128x384xbf16>, vector<8x384xf32> -> vector<8x384xf32>
    %c0_76 = arith.constant 0 : index
    %c0_77 = arith.constant 0 : index
    %211 = vector.load %arg5[%c0_76, %c0_77] : memref<1x384xf32, #tpu.memory_space<vmem>>, vector<1x384xf32>
    %212 = vector.broadcast %211 : vector<1x384xf32> to vector<8x384xf32>
    %213 = arith.addf %210, %212 : vector<8x384xf32>
    %214 = vector.extract_strided_slice %207 {offsets = [0, 0], sizes = [8, 128], strides = [1, 1]} : vector<8x384xf32> to vector<8x128xf32>
    %215 = vector.extract_strided_slice %207 {offsets = [0, 128], sizes = [8, 128], strides = [1, 1]} : vector<8x384xf32> to vector<8x128xf32>
    %216 = vector.extract_strided_slice %207 {offsets = [0, 256], sizes = [8, 128], strides = [1, 1]} : vector<8x384xf32> to vector<8x128xf32>
    %217 = vector.extract_strided_slice %213 {offsets = [0, 0], sizes = [8, 128], strides = [1, 1]} : vector<8x384xf32> to vector<8x128xf32>
    %218 = vector.extract_strided_slice %213 {offsets = [0, 128], sizes = [8, 128], strides = [1, 1]} : vector<8x384xf32> to vector<8x128xf32>
    %219 = vector.extract_strided_slice %213 {offsets = [0, 256], sizes = [8, 128], strides = [1, 1]} : vector<8x384xf32> to vector<8x128xf32>
    %220 = arith.addf %214, %217 : vector<8x128xf32>
    %221 = arith.negf %220 : vector<8x128xf32>
    %222 = math.exp %221 : vector<8x128xf32>
    %cst_78 = arith.constant 1.000000e+00 : f32
    %223 = vector.broadcast %cst_78 : f32 to vector<8x128xf32>
    %224 = arith.addf %223, %222 : vector<8x128xf32>
    %225 = arith.divf %223, %224 : vector<8x128xf32>
    %226 = arith.addf %215, %218 : vector<8x128xf32>
    %227 = arith.negf %226 : vector<8x128xf32>
    %228 = math.exp %227 : vector<8x128xf32>
    %cst_79 = arith.constant 1.000000e+00 : f32
    %229 = vector.broadcast %cst_79 : f32 to vector<8x128xf32>
    %230 = arith.addf %229, %228 : vector<8x128xf32>
    %231 = arith.divf %229, %230 : vector<8x128xf32>
    %232 = arith.mulf %225, %219 : vector<8x128xf32>
    %233 = arith.addf %216, %232 : vector<8x128xf32>
    %234 = math.tanh %233 : vector<8x128xf32>
    %cst_80 = arith.constant 1.000000e+00 : f32
    %235 = vector.broadcast %cst_80 : f32 to vector<8x128xf32>
    %236 = arith.subf %235, %231 : vector<8x128xf32>
    %237 = arith.mulf %236, %234 : vector<8x128xf32>
    %238 = arith.mulf %231, %200 : vector<8x128xf32>
    %239 = arith.addf %237, %238 : vector<8x128xf32>
    %240 = arith.index_cast %c5_i32 : i32 to index
    %c0_81 = arith.constant 0 : index
    %c0_82 = arith.constant 0 : index
    %241 = vector.load %arg11[%240, %c0_81, %c0_82] : memref<8x8x128xf32, #tpu.memory_space<vmem>>, vector<1x8x128xf32>
    %242 = vector.shape_cast %241 : vector<1x8x128xf32> to vector<8x128xf32>
    %243 = vector.shape_cast %239 : vector<8x128xf32> to vector<1x8x128xf32>
    tpu.vector_store %arg11[%240, %c0_81, %c0_82], %243 {strides = array<i32>} : memref<8x8x128xf32, #tpu.memory_space<vmem>>, vector<1x8x128xf32>,
    %c6_i32 = arith.constant 6 : i32
    %244 = arith.index_cast %c6_i32 : i32 to index
    %c0_83 = arith.constant 0 : index
    %c0_84 = arith.constant 0 : index
    %245 = vector.load %arg10[%244, %c0_83, %c0_84] : memref<8x8x384xf32, #tpu.memory_space<vmem>>, vector<1x8x384xf32>
    %246 = vector.shape_cast %245 : vector<1x8x384xf32> to vector<8x384xf32>
    %247 = arith.truncf %239 : vector<8x128xf32> to vector<8x128xbf16>
    %c0_85 = arith.constant 0 : index
    %c0_86 = arith.constant 0 : index
    %248 = vector.load %arg4[%c0_85, %c0_86] : memref<128x384xbf16, #tpu.memory_space<vmem>>, vector<128x384xbf16>
    %cst_87 = arith.constant dense<0.000000e+00> : vector<8x384xf32>
    %249 = tpu.matmul %247, %248, %cst_87 {dimension_numbers = #tpu.dot_dimension_numbers<[1], [0], [0], [1], [0, 0, 1, 1], [], []>} : vector<8x128xbf16>, vector<128x384xbf16>, vector<8x384xf32> -> vector<8x384xf32>
    %c0_88 = arith.constant 0 : index
    %c0_89 = arith.constant 0 : index
    %250 = vector.load %arg5[%c0_88, %c0_89] : memref<1x384xf32, #tpu.memory_space<vmem>>, vector<1x384xf32>
    %251 = vector.broadcast %250 : vector<1x384xf32> to vector<8x384xf32>
    %252 = arith.addf %249, %251 : vector<8x384xf32>
    %253 = vector.extract_strided_slice %246 {offsets = [0, 0], sizes = [8, 128], strides = [1, 1]} : vector<8x384xf32> to vector<8x128xf32>
    %254 = vector.extract_strided_slice %246 {offsets = [0, 128], sizes = [8, 128], strides = [1, 1]} : vector<8x384xf32> to vector<8x128xf32>
    %255 = vector.extract_strided_slice %246 {offsets = [0, 256], sizes = [8, 128], strides = [1, 1]} : vector<8x384xf32> to vector<8x128xf32>
    %256 = vector.extract_strided_slice %252 {offsets = [0, 0], sizes = [8, 128], strides = [1, 1]} : vector<8x384xf32> to vector<8x128xf32>
    %257 = vector.extract_strided_slice %252 {offsets = [0, 128], sizes = [8, 128], strides = [1, 1]} : vector<8x384xf32> to vector<8x128xf32>
    %258 = vector.extract_strided_slice %252 {offsets = [0, 256], sizes = [8, 128], strides = [1, 1]} : vector<8x384xf32> to vector<8x128xf32>
    %259 = arith.addf %253, %256 : vector<8x128xf32>
    %260 = arith.negf %259 : vector<8x128xf32>
    %261 = math.exp %260 : vector<8x128xf32>
    %cst_90 = arith.constant 1.000000e+00 : f32
    %262 = vector.broadcast %cst_90 : f32 to vector<8x128xf32>
    %263 = arith.addf %262, %261 : vector<8x128xf32>
    %264 = arith.divf %262, %263 : vector<8x128xf32>
    %265 = arith.addf %254, %257 : vector<8x128xf32>
    %266 = arith.negf %265 : vector<8x128xf32>
    %267 = math.exp %266 : vector<8x128xf32>
    %cst_91 = arith.constant 1.000000e+00 : f32
    %268 = vector.broadcast %cst_91 : f32 to vector<8x128xf32>
    %269 = arith.addf %268, %267 : vector<8x128xf32>
    %270 = arith.divf %268, %269 : vector<8x128xf32>
    %271 = arith.mulf %264, %258 : vector<8x128xf32>
    %272 = arith.addf %255, %271 : vector<8x128xf32>
    %273 = math.tanh %272 : vector<8x128xf32>
    %cst_92 = arith.constant 1.000000e+00 : f32
    %274 = vector.broadcast %cst_92 : f32 to vector<8x128xf32>
    %275 = arith.subf %274, %270 : vector<8x128xf32>
    %276 = arith.mulf %275, %273 : vector<8x128xf32>
    %277 = arith.mulf %270, %239 : vector<8x128xf32>
    %278 = arith.addf %276, %277 : vector<8x128xf32>
    %279 = arith.index_cast %c6_i32 : i32 to index
    %c0_93 = arith.constant 0 : index
    %c0_94 = arith.constant 0 : index
    %280 = vector.load %arg11[%279, %c0_93, %c0_94] : memref<8x8x128xf32, #tpu.memory_space<vmem>>, vector<1x8x128xf32>
    %281 = vector.shape_cast %280 : vector<1x8x128xf32> to vector<8x128xf32>
    %282 = vector.shape_cast %278 : vector<8x128xf32> to vector<1x8x128xf32>
    tpu.vector_store %arg11[%279, %c0_93, %c0_94], %282 {strides = array<i32>} : memref<8x8x128xf32, #tpu.memory_space<vmem>>, vector<1x8x128xf32>,
    %c7_i32 = arith.constant 7 : i32
    %283 = arith.index_cast %c7_i32 : i32 to index
    %c0_95 = arith.constant 0 : index
    %c0_96 = arith.constant 0 : index
    %284 = vector.load %arg10[%283, %c0_95, %c0_96] : memref<8x8x384xf32, #tpu.memory_space<vmem>>, vector<1x8x384xf32>
    %285 = vector.shape_cast %284 : vector<1x8x384xf32> to vector<8x384xf32>
    %286 = arith.truncf %278 : vector<8x128xf32> to vector<8x128xbf16>
    %c0_97 = arith.constant 0 : index
    %c0_98 = arith.constant 0 : index
    %287 = vector.load %arg4[%c0_97, %c0_98] : memref<128x384xbf16, #tpu.memory_space<vmem>>, vector<128x384xbf16>
    %cst_99 = arith.constant dense<0.000000e+00> : vector<8x384xf32>
    %288 = tpu.matmul %286, %287, %cst_99 {dimension_numbers = #tpu.dot_dimension_numbers<[1], [0], [0], [1], [0, 0, 1, 1], [], []>} : vector<8x128xbf16>, vector<128x384xbf16>, vector<8x384xf32> -> vector<8x384xf32>
    %c0_100 = arith.constant 0 : index
    %c0_101 = arith.constant 0 : index
    %289 = vector.load %arg5[%c0_100, %c0_101] : memref<1x384xf32, #tpu.memory_space<vmem>>, vector<1x384xf32>
    %290 = vector.broadcast %289 : vector<1x384xf32> to vector<8x384xf32>
    %291 = arith.addf %288, %290 : vector<8x384xf32>
    %292 = vector.extract_strided_slice %285 {offsets = [0, 0], sizes = [8, 128], strides = [1, 1]} : vector<8x384xf32> to vector<8x128xf32>
    %293 = vector.extract_strided_slice %285 {offsets = [0, 128], sizes = [8, 128], strides = [1, 1]} : vector<8x384xf32> to vector<8x128xf32>
    %294 = vector.extract_strided_slice %285 {offsets = [0, 256], sizes = [8, 128], strides = [1, 1]} : vector<8x384xf32> to vector<8x128xf32>
    %295 = vector.extract_strided_slice %291 {offsets = [0, 0], sizes = [8, 128], strides = [1, 1]} : vector<8x384xf32> to vector<8x128xf32>
    %296 = vector.extract_strided_slice %291 {offsets = [0, 128], sizes = [8, 128], strides = [1, 1]} : vector<8x384xf32> to vector<8x128xf32>
    %297 = vector.extract_strided_slice %291 {offsets = [0, 256], sizes = [8, 128], strides = [1, 1]} : vector<8x384xf32> to vector<8x128xf32>
    %298 = arith.addf %292, %295 : vector<8x128xf32>
    %299 = arith.negf %298 : vector<8x128xf32>
    %300 = math.exp %299 : vector<8x128xf32>
    %cst_102 = arith.constant 1.000000e+00 : f32
    %301 = vector.broadcast %cst_102 : f32 to vector<8x128xf32>
    %302 = arith.addf %301, %300 : vector<8x128xf32>
    %303 = arith.divf %301, %302 : vector<8x128xf32>
    %304 = arith.addf %293, %296 : vector<8x128xf32>
    %305 = arith.negf %304 : vector<8x128xf32>
    %306 = math.exp %305 : vector<8x128xf32>
    %cst_103 = arith.constant 1.000000e+00 : f32
    %307 = vector.broadcast %cst_103 : f32 to vector<8x128xf32>
    %308 = arith.addf %307, %306 : vector<8x128xf32>
    %309 = arith.divf %307, %308 : vector<8x128xf32>
    %310 = arith.mulf %303, %297 : vector<8x128xf32>
    %311 = arith.addf %294, %310 : vector<8x128xf32>
    %312 = math.tanh %311 : vector<8x128xf32>
    %cst_104 = arith.constant 1.000000e+00 : f32
    %313 = vector.broadcast %cst_104 : f32 to vector<8x128xf32>
    %314 = arith.subf %313, %309 : vector<8x128xf32>
    %315 = arith.mulf %314, %312 : vector<8x128xf32>
    %316 = arith.mulf %309, %278 : vector<8x128xf32>
    %317 = arith.addf %315, %316 : vector<8x128xf32>
    %318 = arith.index_cast %c7_i32 : i32 to index
    %c0_105 = arith.constant 0 : index
    %c0_106 = arith.constant 0 : index
    %319 = vector.load %arg11[%318, %c0_105, %c0_106] : memref<8x8x128xf32, #tpu.memory_space<vmem>>, vector<1x8x128xf32>
    %320 = vector.shape_cast %319 : vector<1x8x128xf32> to vector<8x128xf32>
    %321 = vector.shape_cast %317 : vector<8x128xf32> to vector<1x8x128xf32>
    tpu.vector_store %arg11[%318, %c0_105, %c0_106], %321 {strides = array<i32>} : memref<8x8x128xf32, #tpu.memory_space<vmem>>, vector<1x8x128xf32>,
    %c8_i32 = arith.constant 8 : i32
    %c0_107 = arith.constant 0 : index
    %c0_108 = arith.constant 0 : index
    %322 = vector.load %arg9[%c0_107, %c0_108] : memref<8x128xf32, #tpu.memory_space<vmem>>, vector<8x128xf32>
    tpu.vector_store %arg9[%c0_107, %c0_108], %317 {strides = array<i32>} : memref<8x128xf32, #tpu.memory_space<vmem>>, vector<8x128xf32>,
    %c0_109 = arith.constant 0 : index
    %c0_110 = arith.constant 0 : index
    %c0_111 = arith.constant 0 : index
    %323 = vector.load %arg11[%c0_109, %c0_110, %c0_111] : memref<8x8x128xf32, #tpu.memory_space<vmem>>, vector<8x8x128xf32>
    %324 = vector.shape_cast %323 : vector<8x8x128xf32> to vector<64x128xf32>
    %325 = arith.truncf %324 : vector<64x128xf32> to vector<64x128xbf16>
    %c0_112 = arith.constant 0 : index
    %c0_113 = arith.constant 0 : index
    %326 = vector.load %arg6[%c0_112, %c0_113] : memref<128x128xbf16, #tpu.memory_space<vmem>>, vector<128x128xbf16>
    %cst_114 = arith.constant dense<0.000000e+00> : vector<64x128xf32>
    %327 = tpu.matmul %325, %326, %cst_114 {dimension_numbers = #tpu.dot_dimension_numbers<[1], [0], [0], [1], [0, 0, 1, 1], [], []>} : vector<64x128xbf16>, vector<128x128xbf16>, vector<64x128xf32> -> vector<64x128xf32>
    %c0_115 = arith.constant 0 : index
    %c0_116 = arith.constant 0 : index
    %328 = vector.load %arg7[%c0_115, %c0_116] : memref<1x128xf32, #tpu.memory_space<vmem>>, vector<1x128xf32>
    %329 = vector.broadcast %328 : vector<1x128xf32> to vector<64x128xf32>
    %330 = arith.addf %327, %329 : vector<64x128xf32>
    %cst_117 = arith.constant dense<0xFF800000> : vector<64xf32>
    %331 = vector.multi_reduction <maximumf>, %330, %cst_117 [1] : vector<64x128xf32> to vector<64xf32>
    %332 = vector.shape_cast %331 : vector<64xf32> to vector<64x1xf32>
    %333 = vector.broadcast %332 : vector<64x1xf32> to vector<64x128xf32>
    %334 = arith.subf %330, %333 : vector<64x128xf32>
    %335 = math.exp %334 : vector<64x128xf32>
    %cst_118 = arith.constant dense<0.000000e+00> : vector<64xf32>
    %336 = vector.multi_reduction <add>, %335, %cst_118 [1] : vector<64x128xf32> to vector<64xf32>
    %337 = vector.shape_cast %336 : vector<64xf32> to vector<64x1xf32>
    %338 = math.log %337 : vector<64x1xf32>
    %339 = vector.broadcast %338 : vector<64x1xf32> to vector<64x128xf32>
    %340 = arith.subf %334, %339 : vector<64x128xf32>
    %341 = vector.shape_cast %340 : vector<64x128xf32> to vector<8x8x128xf32>
    %c0_119 = arith.constant 0 : index
    %c0_120 = arith.constant 0 : index
    %c0_121 = arith.constant 0 : index
    %342 = vector.load %arg8[%c0_119, %c0_120, %c0_121] : memref<8x8x128xf32, #tpu.memory_space<vmem>>, vector<8x8x128xf32>
    tpu.vector_store %arg8[%c0_119, %c0_120, %c0_121], %341 {strides = array<i32>} : memref<8x8x128xf32, #tpu.memory_space<vmem>>, vector<8x8x128xf32>,
    return
  }
}

</mosaic_0001>

<bundles_post_ra>
// kernel: tpu_custom_call.1
= control target key start
LH: loop header
LB: loop body
LE: loop exit
PB: predicated region body
PF: predicated region fallthrough
CT: control target
= control target key end

     0   :  { %15 = vsyncpa [#allocation5], 0  ;;  %s4627_s0 = inlined_call_operand.hbm [shape: bf16[8,8,128], index: 0, kind: input, shape index: {}]   ;;  %s4628_s1 = inlined_call_operand.hbm [shape: f32[8,128], index: 1, kind: input, shape index: {}]   ;;  %s4629_s2 = inlined_call_operand.hbm [shape: bf16[128,384], index: 2, kind: input, shape index: {}]   ;;  %s4630_s3 = inlined_call_operand.hbm [shape: f32[1,384], index: 3, kind: input, shape index: {}]   ;;  %s4631_s4 = inlined_call_operand.hbm [shape: bf16[128,384], index: 4, kind: input, shape index: {}]   ;;  %s4632_s5 = inlined_call_operand.vmem [shape: f32[1,384], index: 5, kind: input, shape index: {}]   ;;  %s4633_s6 = inlined_call_operand.hbm [shape: bf16[128,128], index: 6, kind: input, shape index: {}]   ;;  %s4634_s7 = inlined_call_operand.vmem [shape: f32[1,128], index: 7, kind: input, shape index: {}]   ;;  %s4635_s8 = inlined_call_operand.hbm [shape: f32[8,8,128], index: 8, kind: output, shape index: {0}]   ;;  %s4636_s9 = inlined_call_operand.hbm [shape: f32[8,128], index: 9, kind: output, shape index: {1}]  }
   0x1   :  { %16 = vsyncpa [#allocation8], 0 }
   0x2   :  { %17 = vsyncpa [#allocation11], 0 }
   0x3   :  { %18 = vsyncpa [#allocation14], 0 }
   0x4   :  { %19 = vsyncpa [#allocation6], 0  ;;  %s39_s11 = sshll.u32 %s4628_s1, 4  ;;  %s40_s11 = int_to_ptr.hbm [resolvable:$true] %s39_s11 }
   0x5   :  { %20 = vsyncpa [#allocation17], 0  ;;  %s4252_s12 = smov [#allocation7]   ;;  %s63_s16 = sshll.u32 %s4630_s3, 4  ;;  %s64_s16 = int_to_ptr.hbm [resolvable:$true] %s63_s16 }
   0x6   :  { %s41_s13 = sshll.u32 %s4252_s12, 4  ;;  %s4253_s17 = smov [#allocation10]   ;;  %s42_s13 = int_to_ptr.vmem [resolvable:$true] %s41_s13 }
   0x7   :  { %44 = dma.hbm_to_vmem [thread:$0]  %s40_s11, 128, %s42_s13, [#allocation8]  }
   0x8   :  { %s65_s18 = sshll.u32 %s4253_s17, 4  ;;  %s25_s21 = sshll.u32 %s4627_s0, 4  ;;  %s66_s18 = int_to_ptr.vmem [resolvable:$true] %s65_s18  ;;  %s26_s21 = int_to_ptr.hbm [resolvable:$true] %s25_s21 }
   0x9   :  { %68 = dma.hbm_to_vmem [thread:$0]  %s64_s16, 48, %s66_s18, [#allocation11]  }
   0xa   :  { %s4254_s1 = smov [#allocation4]   ;;  %s49_s25 = sshll.u32 %s4629_s2, 4  ;;  %s50_s25 = int_to_ptr.hbm [resolvable:$true] %s49_s25 }
   0xb   :  { %s27_s22 = sshll.u32 %s4254_s1, 4  ;;  %s4255_s26 = smov 64   ;;  %s28_s22 = int_to_ptr.vmem [resolvable:$true] %s27_s22 }
   0xc   :  { %s4256_s3 = smov 4   ;;  %s4257_s27 = smov [#allocation9]  }
   0xd   :  { %33 = dma.hbm_to_vmem [thread:$0]  %s26_s21, 512, %s28_s22, [#allocation5], %s4255_s26, %s4255_s26, %s4256_s3  }
   0xe   :  { %s51_s28 = sshll.u32 %s4257_s27, 4  ;;  %s4258_s29 = smov 192   ;;  %s52_s28 = int_to_ptr.vmem [resolvable:$true] %s51_s28 }
   0xf   :  { %s4259_s30 = smov 12   ;;  %s73_s11 = sshll.u32 %s4631_s4, 4  ;;  %s74_s11 = int_to_ptr.hbm [resolvable:$true] %s73_s11 }
  0x10   :  { %57 = dma.hbm_to_vmem [thread:$0]  %s50_s25, 3072, %s52_s28, [#allocation8], %s4258_s29, %s4258_s29, %s4259_s30  }
  0x11   :  { %s4260_s12 = smov [#allocation12]   ;;  %s88_s15 = sshll.u32 %s4633_s6, 4  ;;  %s89_s15 = int_to_ptr.hbm [resolvable:$true] %s88_s15 }
  0x12   :  { %s75_s13 = sshll.u32 %s4260_s12, 4  ;;  %s4261_s16 = smov [#allocation13]   ;;  %s76_s13 = int_to_ptr.vmem [resolvable:$true] %s75_s13 }
  0x13   :  { %81 = dma.hbm_to_vmem [thread:$0]  %s74_s11, 3072, %s76_s13, [#allocation11], %s4258_s29, %s4258_s29, %s4259_s30  }
  0x14   :  { %s90_s17 = sshll.u32 %s4261_s16, 4  ;;  %s91_s17 = int_to_ptr.vmem [resolvable:$true] %s90_s17 }
  0x15   :  { %96 = dma.hbm_to_vmem [thread:$0]  %s89_s15, 1024, %s91_s17, [#allocation14], %s4255_s26, %s4255_s26, %s4256_s3  }
  0x16   :  { %4240 = dma.done.wait [#allocation5], 512  }
  0x17   :  { %4241 = vsyncadd [#allocation5], 4294966784 }
  0x18   :  { %4242 = dma.done.wait [#allocation8], 3200  }
  0x19   :  { %4243 = vsyncadd [#allocation8], 4294964096 }
  0x1a   :  { %4244 = dma.done.wait [#allocation11], 3120  }
  0x1b   :  { %4245 = vsyncadd [#allocation11], 4294964176 }
  0x1c   :  { %4246 = dma.done.wait [#allocation14], 1024  }
  0x1d   :  { %4247 = vsyncadd [#allocation14], 4294966272  ;;  %v2867_v0 = vld [vmem:[#allocation9 + $0xb0] sm:$0xf]  ;;  %v3712_v1 = vld [vmem:[#allocation9 + $0xb8] sm:$0xf0] }
  0x1e   :  { %v2859_v2 = vld [vmem:[#allocation9 + $0xa8] sm:$0xf]  ;;  %v2868_v3 = vor.u32 %v3712_v1, %v2867_v0  ;;  %v3711_v4 = vld [vmem:[#allocation9 + $0xb0] sm:$0xf0]  ;;  %v2855_v5 = vld [vmem:[#allocation9 + $0x98] sm:$0xf] }
  0x1f   :  { %v3709_v6 = vld [vmem:[#allocation9 + $0xa0] sm:$0xf0]  ;;  %v2860_v7 = vor.u32 %v3711_v4, %v2859_v2  ;;  %v2847_v8 = vld [vmem:[#allocation9 + $0x90] sm:$0xf]  ;;  %v3708_v9 = vld [vmem:[#allocation9 + $0x98] sm:$0xf0] }
  0x20   :  { %3913 = vmatpush.bf16.msra.mxu3 %v2868_v3  ;;  %v2856_v10 = vor.u32 %v3709_v6, %v2855_v5  ;;  %381 = vmatpush.bf16.msra.mxu2 %v2868_v3  ;;  %v2848_v11 = vor.u32 %v3708_v9, %v2847_v8  ;;  %v2843_v12 = vld [vmem:[#allocation9 + $0x80] sm:$0xf]  ;;  %v3706_v13 = vld [vmem:[#allocation9 + $0x88] sm:$0xf0]  ;;  %v2835_v14 = vld [vmem:[#allocation9 + $0x78] sm:$0xf] }
  0x21   :  { %323 = vmatpush.bf16.msra.mxu0 %v2860_v7  ;;  %v3705_v15 = vld [vmem:[#allocation9 + $0x80] sm:$0xf0]  ;;  %v2844_v16 = vor.u32 %v3706_v13, %v2843_v12  ;;  %v2831_v18 = vld [vmem:[#allocation9 + $0x68] sm:$0xf]  ;;  %v3703_v19 = vld [vmem:[#allocation9 + $0x70] sm:$0xf0] }
  0x22   :  { %v2836_v17 = vor.u32 %v3705_v15, %v2835_v14  ;;  %v2823_v20 = vld [vmem:[#allocation9 + $0x60] sm:$0xf]  ;;  %v3702_v21 = vld [vmem:[#allocation9 + $0x68] sm:$0xf0]  ;;  %v2832_v22 = vor.u32 %v3703_v19, %v2831_v18  ;;  %v2819_v24 = vld [vmem:[#allocation9 + $0x50] sm:$0xf] }
  0x23   :  { %v2824_v23 = vor.u32 %v3702_v21, %v2823_v20  ;;  %v3700_v25 = vld [vmem:[#allocation9 + $0x58] sm:$0xf0]  ;;  %v2811_v26 = vld [vmem:[#allocation9 + $0x48] sm:$0xf]  ;;  %v3699_v27 = vld [vmem:[#allocation9 + $0x50] sm:$0xf0] }
  0x24   :  { %3914 = vmatpush.bf16.msra.mxu3 %v2856_v10  ;;  %382 = vmatpush.bf16.msra.mxu2 %v2856_v10  ;;  %v2820_v28 = vor.u32 %v3700_v25, %v2819_v24  ;;  %v2812_v29 = vor.u32 %v3699_v27, %v2811_v26  ;;  %v2807_v30 = vld [vmem:[#allocation9 + $0x38] sm:$0xf]  ;;  %v3697_v31 = vld [vmem:[#allocation9 + $0x40] sm:$0xf0]  ;;  %v2799_v32 = vld [vmem:[#allocation9 + $0x30] sm:$0xf] }
  0x25   :  { %324 = vmatpush.bf16.msra.mxu0 %v2848_v11  ;;  %v3696_v33 = vld [vmem:[#allocation9 + $0x38] sm:$0xf0]  ;;  %v2808_v34 = vor.u32 %v3697_v31, %v2807_v30  ;;  %v2795_v36 = vld [vmem:[#allocation9 + $0x20] sm:$0xf]  ;;  %v3694_v37 = vld [vmem:[#allocation9 + $0x28] sm:$0xf0] }
  0x26   :  { %v2800_v35 = vor.u32 %v3696_v33, %v2799_v32  ;;  %v2787_v38 = vld [vmem:[#allocation9 + $0x18] sm:$0xf]  ;;  %v3693_v39 = vld [vmem:[#allocation9 + $0x20] sm:$0xf0]  ;;  %v2796_v40 = vor.u32 %v3694_v37, %v2795_v36  ;;  %v2783_v41 = vld [vmem:[#allocation9 + $0x8] sm:$0xf] }
  0x27   :  { %v3691_v42 = vld [vmem:[#allocation9 + $0x10] sm:$0xf0]  ;;  %v2788_v43 = vor.u32 %v3693_v39, %v2787_v38  ;;  %v2955_v44 = vld [vmem:[#allocation12 + $0xa8] sm:$0xf]  ;;  %v2861_v46 = vld [vmem:[#allocation9 + $0xb4] sm:$0xf0] }
  0x28   :  { %3915 = vmatpush.bf16.msra.mxu3 %v2844_v16  ;;  %383 = vmatpush.bf16.msra.mxu2 %v2844_v16  ;;  %v3710_v45 = vld [vmem:[#allocation9 + $0xac] sm:$0xf]  ;;  %v3735_v47 = vld [vmem:[#allocation12 + $0xb0] sm:$0xf0]  ;;  %v2775_v48 = vld [vmem:[#allocation9] sm:$0xf]  ;;  %v2784_v53 = vor.u32 %v3691_v42, %v2783_v41 }
  0x29   :  { %325 = vmatpush.bf16.msra.mxu0 %v2836_v17  ;;  %v3690_v49 = vld [vmem:[#allocation9 + $0x8] sm:$0xf0]  ;;  %v2864_v50 = vor.u32 %v3710_v45, %v2861_v46  ;;  %v2963_v51 = vld [vmem:[#allocation12 + $0xb0] sm:$0xf]  ;;  %v3736_v52 = vld [vmem:[#allocation12 + $0xb8] sm:$0xf0]  ;;  %v2956_v54 = vor.u32 %v3735_v47, %v2955_v44 }
  0x2a   :  { %v2776_v55 = vor.u32 %v3690_v49, %v2775_v48  ;;  %v3707_v56 = vld [vmem:[#allocation9 + $0x94] sm:$0xf]  ;;  %v2849_v57 = vld [vmem:[#allocation9 + $0x9c] sm:$0xf0]  ;;  %v2964_v60 = vor.u32 %v3736_v52, %v2963_v51  ;;  %v4334_v62 = vld [vmem:[#allocation4 + $0x10] sm:$0xff]  ;;  %s2739_s12 = sshll.u32 %s4636_s9, 4  ;;  %s2740_s12 = int_to_ptr.hbm [resolvable:$true] %s2739_s12 }
  0x2b   :  { %352 = vmatpush.bf16.msra.mxu1 %v2864_v50  ;;  %v2943_v58 = vld [vmem:[#allocation12 + $0x90] sm:$0xf]  ;;  %v3732_v59 = vld [vmem:[#allocation12 + $0x98] sm:$0xf0]  ;;  %v2852_v61 = vor.u32 %v3707_v56, %v2849_v57  ;;  %v2951_v63 = vld [vmem:[#allocation12 + $0x98] sm:$0xf] }
  0x2c   :  { %3916 = vmatpush.bf16.msra.mxu3 %v2832_v22  ;;  %384 = vmatpush.bf16.msra.mxu2 %v2832_v22  ;;  %v3733_v0 = vld [vmem:[#allocation12 + $0xa0] sm:$0xf0]  ;;  %v4336_v1 = vld [vmem:[#allocation4] sm:$0xff]  ;;  %v2944_v2 = vor.u32 %v3732_v59, %v2943_v58  ;;  %v2919_v10 = vld [vmem:[#allocation12 + $0x60] sm:$0xf]  ;;  %s4263_s9 = smov [#allocation15]  }
  0x2d   :  { %326 = vmatpush.bf16.msra.mxu0 %v2824_v23  ;;  %v3704_v3 = vld [vmem:[#allocation9 + $0x7c] sm:$0xf]  ;;  %v2837_v4 = vld [vmem:[#allocation9 + $0x84] sm:$0xf0]  ;;  %v2952_v7 = vor.u32 %v3733_v0, %v2951_v63  ;;  %v3701_v11 = vld [vmem:[#allocation9 + $0x64] sm:$0xf] }
  0x2e   :  { %v2931_v5 = vld [vmem:[#allocation12 + $0x78] sm:$0xf]  ;;  %v3729_v6 = vld [vmem:[#allocation12 + $0x80] sm:$0xf0]  ;;  %v2840_v8 = vor.u32 %v3704_v3, %v2837_v4  ;;  %v2825_v12 = vld [vmem:[#allocation9 + $0x6c] sm:$0xf0] }
  0x2f   :  { %353 = vmatpush.bf16.msra.mxu1 %v2852_v61  ;;  %v2932_v9 = vor.u32 %v3729_v6, %v2931_v5  ;;  %v3726_v13 = vld [vmem:[#allocation12 + $0x68] sm:$0xf0]  ;;  %v2828_v14 = vor.u32 %v3701_v11, %v2825_v12  ;;  %v2939_v15 = vld [vmem:[#allocation12 + $0x80] sm:$0xf]  ;;  %v3698_v19 = vld [vmem:[#allocation9 + $0x4c] sm:$0xf] }
  0x30   :  { %3917 = vmatpush.bf16.msra.mxu3 %v2820_v28  ;;  %385 = vmatpush.bf16.msra.mxu2 %v2820_v28  ;;  %v3730_v16 = vld [vmem:[#allocation12 + $0x88] sm:$0xf0]  ;;  %v2920_v18 = vor.u32 %v3726_v13, %v2919_v10  ;;  %v2813_v20 = vld [vmem:[#allocation9 + $0x54] sm:$0xf0]  ;;  %v2907_v21 = vld [vmem:[#allocation12 + $0x48] sm:$0xf] }
  0x31   :  { %327 = vmatpush.bf16.msra.mxu0 %v2812_v29  ;;  %v2940_v17 = vor.u32 %v3730_v16, %v2939_v15  ;;  %v3723_v22 = vld [vmem:[#allocation12 + $0x50] sm:$0xf0]  ;;  %v2816_v23 = vor.u32 %v3698_v19, %v2813_v20  ;;  %v2895_v25 = vld [vmem:[#allocation12 + $0x30] sm:$0xf]  ;;  %v2801_v27 = vld [vmem:[#allocation9 + $0x3c] sm:$0xf0] }
  0x32   :  { %v2908_v24 = vor.u32 %v3723_v22, %v2907_v21  ;;  %v3695_v26 = vld [vmem:[#allocation9 + $0x34] sm:$0xf]  ;;  %v3720_v28 = vld [vmem:[#allocation12 + $0x38] sm:$0xf0]  ;;  %v2927_v30 = vld [vmem:[#allocation12 + $0x68] sm:$0xf] }
  0x33   :  { %354 = vmatpush.bf16.msra.mxu1 %v2840_v8  ;;  %v2804_v29 = vor.u32 %v3695_v26, %v2801_v27  ;;  %v3727_v31 = vld [vmem:[#allocation12 + $0x70] sm:$0xf0]  ;;  %v4341_v32 = vld [vmem:[#allocation4 + $0x18] sm:$0xff]  ;;  %v3692_v36 = vld [vmem:[#allocation9 + $0x1c] sm:$0xf]  ;;  %s2723_s13 = sshll.u32 %s4263_s9, 4  ;;  %s2724_s13 = int_to_ptr.vmem [resolvable:$true] %s2723_s13 }
  0x34   :  { %3918 = vmatpush.bf16.msra.mxu3 %v2808_v34  ;;  %386 = vmatpush.bf16.msra.mxu2 %v2808_v34  ;;  %v2928_v33 = vor.u32 %v3727_v31, %v2927_v30  ;;  %v4343_v34 = vld [vmem:[#allocation4 + $0x8] sm:$0xff]  ;;  %v2789_v37 = vld [vmem:[#allocation9 + $0x24] sm:$0xf0]  ;;  %v2883_v38 = vld [vmem:[#allocation12 + $0x18] sm:$0xf]  ;;  %s2725_s15 = sshll.u32 %s4635_s8, 4  ;;  %s2726_s15 = int_to_ptr.hbm [resolvable:$true] %s2725_s15 }
  0x35   :  { %328 = vmatpush.bf16.msra.mxu0 %v2800_v35  ;;  %v2896_v35 = vor.u32 %v3720_v28, %v2895_v25  ;;  %v3717_v39 = vld [vmem:[#allocation12 + $0x20] sm:$0xf0]  ;;  %v3689_v42 = vld [vmem:[#allocation9 + $0x4] sm:$0xf]  ;;  %v2915_v44 = vld [vmem:[#allocation12 + $0x50] sm:$0xf] }
  0x36   :  { %v2884_v41 = vor.u32 %v3717_v39, %v2883_v38  ;;  %v2871_v45 = vld [vmem:[#allocation12] sm:$0xf]  ;;  %v3714_v46 = vld [vmem:[#allocation12 + $0x8] sm:$0xf0]  ;;  %v3724_v48 = vld [vmem:[#allocation12 + $0x58] sm:$0xf0] }
  0x37   :  { %355 = vmatpush.bf16.msra.mxu1 %v2828_v14  ;;  %v3734_v49 = vld [vmem:[#allocation12 + $0xac] sm:$0xf]  ;;  %v2957_v50 = vld [vmem:[#allocation12 + $0xb4] sm:$0xf0]  ;;  %v2916_v51 = vor.u32 %v3724_v48, %v2915_v44  ;;  %v2872_v52 = vor.u32 %v3714_v46, %v2871_v45  ;;  %v3731_v57 = vld [vmem:[#allocation12 + $0x94] sm:$0xf] }
  0x38   :  { %3919 = vmatpush.bf16.msra.mxu3 %v2796_v40  ;;  %387 = vmatpush.bf16.msra.mxu2 %v2796_v40  ;;  %v2792_v40 = vor.u32 %v3692_v36, %v2789_v37  ;;  %v2945_v58 = vld [vmem:[#allocation12 + $0x9c] sm:$0xf0]  ;;  %v4349_v59 = vld [vmem:[#allocation7] sm:$0xff]  ;;  %v3718_v61 = vld [vmem:[#allocation12 + $0x28] sm:$0xf0]  ;;  %s4264_s16 = smov 128  }
  0x39   :  { %329 = vmatpush.bf16.msra.mxu0 %v2788_v43  ;;  %v2777_v43 = vld [vmem:[#allocation9 + $0xc] sm:$0xf0]  ;;  %v2948_v63 = vor.u32 %v3731_v57, %v2945_v58  ;;  %v3715_v3 = vld [vmem:[#allocation12 + $0x10] sm:$0xf0]  ;;  %v438_v4 = vpack.c.bf16 %v4349_v59, %v4349_v59  ;;  %v3728_v5 = vld [vmem:[#allocation12 + $0x7c] sm:$0xf] }
  0x3a   :  { %v2780_v47 = vor.u32 %v3689_v42, %v2777_v43  ;;  %v2933_v6 = vld [vmem:[#allocation12 + $0x84] sm:$0xf0]  ;;  %v3725_v8 = vld [vmem:[#allocation12 + $0x64] sm:$0xf]  ;;  %v3722_v11 = vld [vmem:[#allocation12 + $0x4c] sm:$0xf] }
  0x3b   :  { %356 = vmatpush.bf16.msra.mxu1 %v2816_v23  ;;  %v2909_v12 = vld [vmem:[#allocation12 + $0x54] sm:$0xf0]  ;;  %v3719_v14 = vld [vmem:[#allocation12 + $0x34] sm:$0xf]  ;;  %v2897_v15 = vld [vmem:[#allocation12 + $0x3c] sm:$0xf0] }
  0x3c   :  { %3920 = vmatpush.bf16.msra.mxu3 %v2784_v53  ;;  %388 = vmatpush.bf16.msra.mxu2 %v2784_v53  ;;  %v2903_v53 = vld [vmem:[#allocation12 + $0x38] sm:$0xf]  ;;  %v2912_v13 = vor.u32 %v3722_v11, %v2909_v12  ;;  %v2900_v16 = vor.u32 %v3719_v14, %v2897_v15  ;;  %v3713_v20 = vld [vmem:[#allocation12 + $0x4] sm:$0xf]  ;;  %v2873_v21 = vld [vmem:[#allocation12 + $0xc] sm:$0xf0] }
  0x3d   :  { %330 = vmatpush.bf16.msra.mxu0 %v2776_v55  ;;  %v2960_v55 = vor.u32 %v3734_v49, %v2957_v50  ;;  %v2876_v22 = vor.u32 %v3713_v20, %v2873_v21  ;;  %v3756_v36 = vld [vmem:[#allocation12 + $0x98] sm:$0xf0]  ;;  %v4383_v44 = vld [vmem:[%s4632_s5] sm:$0x7]  ;;  %v3017_v15 = vld [vmem:[#allocation12 + $0x60] sm:$0xf] }
  0x3e   :  { %v3019_v20 = vld [vmem:[#allocation12 + $0x6c] sm:$0xf0]  ;;  %v3025_v21 = vld [vmem:[#allocation12 + $0x68] sm:$0xf]  ;;  %s4265_s17 = smov 8  }
  0x3f   :  { %399 = vmatmul.bf16.vlgmr.msra.gmra.mxu3 %v4334_v62  ;;  %389 = vmatmul.bf16.vlgmr.msra.gmra.mxu2 %v4336_v1 }
  0x40   :  { %607 = vmatpush.bf16.msrb.mxu3 %v2956_v54  ;;  %331 = vmatmul.bf16.vlgmr.msra.gmra.mxu0 %v4336_v1  ;;  %v3721_v54 = vld [vmem:[#allocation12 + $0x40] sm:$0xf0] }
  0x41   :  { %633 = vmatpush.bf16.msrb.mxu0 %v2964_v60  ;;  %357 = vmatpush.bf16.msra.mxu1 %v2804_v29  ;;  %v2904_v56 = vor.u32 %v3721_v54, %v2903_v53  ;;  %v2891_v60 = vld [vmem:[#allocation12 + $0x20] sm:$0xf]  ;;  %v3061_v53 = vld [vmem:[#allocation12 + $0xb0] sm:$0xf] }
  0x42   :  { %v2892_v0 = vor.u32 %v3718_v61, %v2891_v60 }
  0x44   :  { %608 = vmatpush.bf16.msrb.mxu3 %v2944_v2  ;;  %v2879_v2 = vld [vmem:[#allocation12 + $0x8] sm:$0xf] }
  0x45   :  { %634 = vmatpush.bf16.msrb.mxu0 %v2952_v7  ;;  %358 = vmatpush.bf16.msra.mxu1 %v2792_v40  ;;  %v2880_v7 = vor.u32 %v3715_v3, %v2879_v2  ;;  %v3029_v40 = vld [vmem:[#allocation12 + $0x78] sm:$0xf] }
  0x46   :  { %v3049_v3 = vld [vmem:[#allocation12 + $0x98] sm:$0xf] }
  0x48   :  { %609 = vmatpush.bf16.msrb.mxu3 %v2932_v9  ;;  %v2921_v9 = vld [vmem:[#allocation12 + $0x6c] sm:$0xf0] }
  0x49   :  { %635 = vmatpush.bf16.msrb.mxu0 %v2940_v17  ;;  %359 = vmatpush.bf16.msra.mxu1 %v2780_v47  ;;  %v2924_v10 = vor.u32 %v3725_v8, %v2921_v9  ;;  %v3716_v17 = vld [vmem:[#allocation12 + $0x1c] sm:$0xf]  ;;  %v473_v47 = vperm.slane %v4383_v44, 0  ;;  %v3037_v8 = vld [vmem:[#allocation12 + $0x80] sm:$0xf] }
  0x4c   :  { %610 = vmatpush.bf16.msrb.mxu3 %v2920_v18  ;;  %360 = vmatmul.bf16.vlgmr.msra.gmra.mxu1 %v4336_v1  ;;  %v2936_v1 = vor.u32 %v3728_v5, %v2933_v6  ;;  %v2885_v18 = vld [vmem:[#allocation12 + $0x24] sm:$0xf0] }
  0x4d   :  { %636 = vmatpush.bf16.msrb.mxu0 %v2928_v33  ;;  %v2888_v19 = vor.u32 %v3716_v17, %v2885_v18  ;;  %v3759_v33 = vld [vmem:[#allocation12 + $0xb0] sm:$0xf0]  ;;  %v3749_v17 = vld [vmem:[#allocation12 + $0x64] sm:$0xf] }
  0x4f   :  { %404 = vmatmul.bf16.gmra.mxu3 %v4341_v32  ;;  %394 = vmatmul.bf16.gmra.mxu2 %v4343_v34 }
  0x50   :  { %611 = vmatpush.bf16.msrb.mxu3 %v2908_v24  ;;  %336 = vmatmul.bf16.gmra.mxu0 %v4343_v34  ;;  %v4358_v24 = vld [vmem:[#allocation10] sm:$0x7] }
  0x51   :  { %637 = vmatpush.bf16.msrb.mxu0 %v2916_v51  ;;  %v4361_v25 = vperm.slane %v4358_v24, 0  ;;  %v3758_v51 = vld [vmem:[#allocation12 + $0xac] sm:$0xf] }
  0x54   :  { %612 = vmatpush.bf16.msrb.mxu3 %v2896_v35 }
  0x55   :  { %638 = vmatpush.bf16.msrb.mxu0 %v2904_v56 }
  0x58   :  { %613 = vmatpush.bf16.msrb.mxu3 %v2884_v41  ;;  %v3753_v41 = vld [vmem:[#allocation12 + $0x80] sm:$0xf0] }
  0x59   :  { %639 = vmatpush.bf16.msrb.mxu0 %v2892_v0  ;;  %v3030_v42 = vor.u32 %v3753_v41, %v3029_v40  ;;  %v3043_v0 = vld [vmem:[#allocation12 + $0x9c] sm:$0xf0]  ;;  %v3748_v40 = vld [vmem:[#allocation12 + $0x58] sm:$0xf0]  ;;  %v4400_v41 = vperm.slane %v4358_v24, 1 }
  0x5c   :  { %614 = vmatpush.bf16.msrb.mxu3 %v2872_v52  ;;  %365 = vmatmul.bf16.gmra.mxu1 %v4343_v34  ;;  %v3041_v34 = vld [vmem:[#allocation12 + $0x90] sm:$0xf]  ;;  %v3055_v52 = vld [vmem:[#allocation12 + $0xb4] sm:$0xf0] }
  0x5d   :  { %640 = vmatpush.bf16.msrb.mxu0 %v2880_v7  ;;  %v3042_v38 = vor.u32 %v3756_v36, %v3041_v34  ;;  %v3058_v54 = vor.u32 %v3758_v51, %v3055_v52  ;;  %v3752_v7 = vld [vmem:[#allocation12 + $0x7c] sm:$0xf]  ;;  %v3013_v36 = vld [vmem:[#allocation12 + $0x50] sm:$0xf]  ;;  %v2995_v52 = vld [vmem:[#allocation12 + $0x3c] sm:$0xf0] }
  0x5f   :  { %615 = vmatmul.bf16.vlgmr.msrb.gmra.mxu3 %v438_v4  ;;  %880 = vmatpush.bf16.msrb.mxu2 %v3058_v54  ;;  %v3745_v54 = vld [vmem:[#allocation12 + $0x40] sm:$0xf0] }
  0x60   :  { %620 = vmatpush.bf16.msra.mxu3 %v2960_v55  ;;  %341 = vmatmul.bf16.gmra.mxu0 %v4334_v62  ;;  %v3760_v55 = vld [vmem:[#allocation12 + $0xb8] sm:$0xf0] }
  0x61   :  { %v3062_v58 = vor.u32 %v3760_v55, %v3061_v53  ;;  %v3001_v53 = vld [vmem:[#allocation12 + $0x38] sm:$0xf]  ;;  %v474_v55 = vperm.slane %v4383_v44, 1 }
  0x64   :  { %621 = vmatpush.bf16.msra.mxu3 %v2948_v63  ;;  %v3755_v63 = vld [vmem:[#allocation12 + $0x94] sm:$0xf] }
  0x65   :  { %v3046_v2 = vor.u32 %v3755_v63, %v3043_v0  ;;  %v2981_v63 = vld [vmem:[#allocation12 + $0x18] sm:$0xf]  ;;  %v3741_v0 = vld [vmem:[#allocation12 + $0x20] sm:$0xf0] }
  0x67   :  { %881 = vmatpush.bf16.msrb.mxu2 %v3046_v2 }
  0x68   :  { %622 = vmatpush.bf16.msra.mxu3 %v2936_v1  ;;  %v3031_v1 = vld [vmem:[#allocation12 + $0x84] sm:$0xf0] }
  0x69   :  { %v3034_v9 = vor.u32 %v3752_v7, %v3031_v1 }
  0x6b   :  { %882 = vmatpush.bf16.msrb.mxu2 %v3034_v9  ;;  %v3742_v9 = vld [vmem:[#allocation12 + $0x28] sm:$0xf0] }
  0x6c   :  { %623 = vmatpush.bf16.msra.mxu3 %v2924_v10  ;;  %370 = vmatmul.bf16.gmra.mxu1 %v4334_v62  ;;  %v3754_v10 = vld [vmem:[#allocation12 + $0x88] sm:$0xf0] }
  0x6d   :  { %v3038_v12 = vor.u32 %v3754_v10, %v3037_v8 }
  0x70   :  { %624 = vmatpush.bf16.msra.mxu3 %v2912_v13  ;;  %346 = vmatmul.bf16.gmra.mxu0 %v4341_v32 }
  0x74   :  { %625 = vmatpush.bf16.msra.mxu3 %v2900_v16  ;;  %v3750_v16 = vld [vmem:[#allocation12 + $0x68] sm:$0xf0] }
  0x78   :  { %626 = vmatpush.bf16.msra.mxu3 %v2888_v19  ;;  %v3018_v19 = vor.u32 %v3750_v16, %v3017_v15  ;;  %v3738_v15 = vld [vmem:[#allocation12 + $0x8] sm:$0xf0]  ;;  %v3737_v16 = vld [vmem:[#allocation12 + $0x4] sm:$0xf] }
  0x7c   :  { %627 = vmatpush.bf16.msra.mxu3 %v2876_v22  ;;  %375 = vmatmul.bf16.gmra.mxu1 %v4341_v32  ;;  %v3053_v32 = vld [vmem:[#allocation12 + $0xa8] sm:$0xf]  ;;  %v3022_v22 = vor.u32 %v3749_v17, %v3019_v20 }
  0x7d   :  { %v3054_v35 = vor.u32 %v3759_v33, %v3053_v32  ;;  %v3746_v33 = vld [vmem:[#allocation12 + $0x4c] sm:$0xf]  ;;  %v2977_v20 = vld [vmem:[#allocation12 + $0x8] sm:$0xf] }
  0x7e   :  { %883 = vmatpush.bf16.msrb.mxu2 %v3022_v22 }
  0x7f   :  { %628 = vmatmul.bf16.vlgmr.msra.gmra.mxu3 %v438_v4  ;;  %867 = vmatpush.bf16.msrb.mxu1 %v3054_v35  ;;  %v3007_v35 = vld [vmem:[#allocation12 + $0x54] sm:$0xf0] }
  0x80   :  { %641 = vmatmul.bf16.vlgmr.msrb.gmra.mxu0 %v438_v4  ;;  %893 = vmatpush.bf16.msrb.mxu3 %v3062_v58  ;;  %v3757_v4 = vld [vmem:[#allocation12 + $0xa0] sm:$0xf0] }
  0x81   :  { %v3050_v5 = vor.u32 %v3757_v4, %v3049_v3  ;;  %v2982_v3 = vor.u32 %v3741_v0, %v2981_v63  ;;  %v3740_v4 = vld [vmem:[#allocation12 + $0x1c] sm:$0xf] }
  0x83   :  { %868 = vmatpush.bf16.msrb.mxu1 %v3042_v38  ;;  %v3010_v38 = vor.u32 %v3746_v33, %v3007_v35 }
  0x84   :  { %894 = vmatpush.bf16.msrb.mxu3 %v3050_v5  ;;  %v2983_v5 = vld [vmem:[#allocation12 + $0x24] sm:$0xf0] }
  0x85   :  { %884 = vmatpush.bf16.msrb.mxu2 %v3010_v38  ;;  %v2986_v8 = vor.u32 %v3740_v4, %v2983_v5 }
  0x87   :  { %869 = vmatpush.bf16.msrb.mxu1 %v3030_v42 }
  0x88   :  { %895 = vmatpush.bf16.msrb.mxu3 %v3038_v12 }
  0x8b   :  { %870 = vmatpush.bf16.msrb.mxu1 %v3018_v19  ;;  %v2971_v19 = vld [vmem:[#allocation12 + $0xc] sm:$0xf0] }
  0xbd   :  { %v332_v23 = vpop.f32.mrf.mxu0 }
  0xbe   :  { %v333_v49 = vadd.f32 %v332_v23, %v4361_v25  ;;  %v3751_v23 = vld [vmem:[#allocation12 + $0x70] sm:$0xf0] }
  0xbf   :  { %v3026_v32 = vor.u32 %v3751_v23, %v3025_v21  ;;  %v3739_v21 = vld [vmem:[#allocation12 + $0x10] sm:$0xf0]  ;;  %v2974_v23 = vor.u32 %v3737_v16, %v2971_v19  ;;  %v3159_v19 = vld [vmem:[#allocation12 + $0xb0] sm:$0xf] }
  0xc1   :  { %896 = vmatpush.bf16.msrb.mxu3 %v3026_v32 }
  0xc2   :  { %v4363_v26 = vpop.f32.mrf.mxu3 }
  0xc5   :  { %v334_v27 = vpop.f32.mrf.mxu0 }
  0xc6   :  { %v4366_v28 = vadd.f32 %v334_v27, %v4361_v25  ;;  %v3005_v27 = vld [vmem:[#allocation12 + $0x48] sm:$0xf] }
  0xc9   :  { %v361_v58 = vpop.f32.mrf.mxu1 }
  0xca   :  { %v4368_v29 = vpop.f32.mrf.mxu3 }
  0xcd   :  { %v337_v30 = vpop.f32.mrf.mxu0 }
  0xce   :  { %v4371_v62 = vadd.f32 %v337_v30, %v4361_v25  ;;  %v3747_v30 = vld [vmem:[#allocation12 + $0x50] sm:$0xf0] }
  0xcf   :  { %v3006_v34 = vor.u32 %v3747_v30, %v3005_v27  ;;  %v2978_v27 = vor.u32 %v3739_v21, %v2977_v20  ;;  %v3784_v20 = vld [vmem:[#allocation12 + $0xb8] sm:$0xf0] }
  0xd1   :  { %871 = vmatpush.bf16.msrb.mxu1 %v3006_v34 }
  0xd2   :  { %v4373_v31 = vpop.f32.mrf.mxu3 }
  0xd5   :  { %v339_v37 = vpop.f32.mrf.mxu0 }
  0xd6   :  { %v4376_v39 = vadd.f32 %v339_v37, %v4361_v25 }
  0xda   :  { %v4378_v43 = vpop.f32.mrf.mxu3 }
  0xdd   :  { %v342_v45 = vpop.f32.mrf.mxu0 }
  0xde   :  { %v4386_v46 = vadd.f32 %v342_v45, %v4361_v25  ;;  %v3014_v45 = vor.u32 %v3748_v40, %v3013_v36  ;;  %v475_v36 = vperm.slane %v4383_v44, 2 }
  0xe0   :  { %897 = vmatpush.bf16.msrb.mxu3 %v3014_v45 }
  0xe2   :  { %v616_v48 = vpop.f32.mrf.mxu3 }
  0xe3   :  { %v617_v50 = vadd.f32 %v616_v48, %v473_v47  ;;  %v2993_v47 = vld [vmem:[#allocation12 + $0x30] sm:$0xf]  ;;  %v3744_v48 = vld [vmem:[#allocation12 + $0x38] sm:$0xf0] }
  0xe4   :  { %v2994_v51 = vor.u32 %v3744_v48, %v2993_v47 }
  0xe5   :  { %v646_v56 = vadd.f32 %v617_v50, %v333_v49  ;;  %v344_v57 = vpop.f32.mrf.mxu0  ;;  %v3743_v49 = vld [vmem:[#allocation12 + $0x34] sm:$0xf] }
  0xe6   :  { %v4391_v60 = vadd.f32 %v344_v57, %v4361_v25  ;;  %v3002_v57 = vor.u32 %v3745_v54, %v3001_v53  ;;  %872 = vmatpush.bf16.msrb.mxu1 %v2994_v51  ;;  %v390_v51 = vpop.f32.mrf.mxu2 }
  0xe7   :  { %v2965_v61 = vmul.f32 -1.442695, %v646_v56  ;;  %v2998_v56 = vor.u32 %v3743_v49, %v2995_v52  ;;  %v4420_v52 = vperm.slane %v4358_v24, 2 }
  0xe8   :  { %898 = vmatpush.bf16.msrb.mxu3 %v3002_v57 }
  0xe9   :  { %3936 = vpow2.f32 %v2965_v61  ;;  %v362_v61 = vadd.f32 %v361_v58, %v4400_v41  ;;  %885 = vmatpush.bf16.msrb.mxu2 %v2998_v56  ;;  %v391_v44 = vadd.f32 %v390_v51, %v4420_v52 }
  0xea   :  { %v618_v6 = vpop.f32.mrf.mxu3  ;;  %873 = vmatpush.bf16.msrb.mxu1 %v2982_v3 }
  0xeb   :  { %v2989_v6 = vld [vmem:[#allocation12 + $0x20] sm:$0xf] }
  0xed   :  { %v347_v11 = vpop.f32.mrf.mxu0  ;;  %886 = vmatpush.bf16.msrb.mxu2 %v2986_v8 }
  0xee   :  { %v4394_v13 = vadd.f32 %v347_v11, %v4361_v25  ;;  %v2990_v11 = vor.u32 %v3742_v9, %v2989_v6 }
  0xef   :  { %v3937_v14 = vpop.eup %3936 }
  0xf0   :  { %v4396_v18 = vadd.f32 1.0, %v3937_v14  ;;  %v2969_v14 = vld [vmem:[#allocation12] sm:$0xf]  ;;  %899 = vmatpush.bf16.msrb.mxu3 %v2990_v11  ;;  %v4438_v11 = vpop.f32.mrf.mxu2 }
  0xf1   :  { %v2970_v17 = vor.u32 %v3738_v15, %v2969_v14  ;;  %887 = vmatpush.bf16.msrb.mxu2 %v2974_v23  ;;  %v3783_v14 = vld [vmem:[#allocation12 + $0xb0] sm:$0xf0]  ;;  %v3782_v15 = vld [vmem:[#allocation12 + $0xac] sm:$0xf] }
  0xf2   :  { %3938 = vrcp.f32 %v4396_v18  ;;  %v662_v35 = vand.u32 2147483648, %v4396_v18  ;;  %vm656_vm1 = vweird.f32 %v4396_v18 }
  0xf3   :  { %874 = vmatpush.bf16.msrb.mxu1 %v2970_v17  ;;  %v3153_v17 = vld [vmem:[#allocation12 + $0xb4] sm:$0xf0] }
  0xf4   :  { %900 = vmatpush.bf16.msrb.mxu3 %v2978_v27  ;;  %v663_v47 = vor.u32 1.1754944e-38, %v662_v35  ;;  %v3156_v21 = vor.u32 %v3782_v15, %v3153_v17  ;;  %v3139_v27 = vld [vmem:[#allocation12 + $0x90] sm:$0xf]  ;;  %v3147_v35 = vld [vmem:[#allocation12 + $0x98] sm:$0xf] }
  0xf5   :  { %v349_v37 = vpop.f32.mrf.mxu0  ;;  %v3770_v15 = vld [vmem:[#allocation12 + $0x4c] sm:$0xf]  ;;  %v3105_v17 = vld [vmem:[#allocation12 + $0x54] sm:$0xf0] }
  0xf6   :  { %v4403_v42 = vadd.f32 %v349_v37, %v4361_v25  ;;  %v660_v37 = vand.u32 2147483647, %v4396_v18 }
  0xf7   :  { %1141 = vmatpush.bf16.msra.mxu1 %v3156_v21 }
  0xf8   :  { %v4405_v50 = vpop.eup %3938  ;;  %vm661_vm3 = vcmp.eq.f32.partialorder %v660_v37, 8.507059e+37  ;;  %v4442_v23 = vpop.f32.mrf.mxu2 }
  0xf9   :  { %v652_v25 = vmul.f32 %v4405_v50, %v4396_v18  ;;  %vm657_vm0 = vweird.f32 %v4405_v50 }
  0xfa   :  { %vm658_vm2 = vmor %vm656_vm1, %vm657_vm0 }
  0xfb   :  { %v653_v10 = vsub.f32 1.0, %v652_v25 }
  0xfd   :  { %v642_v1 = vpop.f32.mrf.mxu0  ;;  %v654_v30 = vmul.f32 %v4405_v50, %v653_v10 }
  0xfe   :  { %v643_v48 = vadd.f32 %v642_v1, %v475_v36  ;;  %v3781_v36 = vld [vmem:[#allocation12 + $0xa0] sm:$0xf0] }
  0xff   :  { %v655_v34 = vadd.f32 %v4405_v50, %v654_v30  ;;  %v3780_v30 = vld [vmem:[#allocation12 + $0x98] sm:$0xf0] }
 0x101   :  { %v659_v45 = vsel %vm658_vm2, %v4405_v50, %v655_v34  ;;  %v3141_v34 = vld [vmem:[#allocation12 + $0x9c] sm:$0xf0] }
 0x102   :  { %v629_v2 = vpop.f32.mrf.mxu3  ;;  %v664_v49 = vsel %vm661_vm3, %v663_v47, %v659_v45  ;;  %v4449_v45 = vld [vmem:[%s4632_s5] sm:$0x7]  ;;  %v3127_v47 = vld [vmem:[#allocation12 + $0x78] sm:$0xf] }
 0x103   :  { %v630_v7 = vadd.f32 %v629_v2, %v474_v55  ;;  %v686_v53 = vmul.f32 %v664_v49, %v643_v48  ;;  %v3777_v48 = vld [vmem:[#allocation12 + $0x80] sm:$0xf0]  ;;  %v3776_v49 = vld [vmem:[#allocation12 + $0x7c] sm:$0xf] }
 0x104   :  { %v3128_v51 = vor.u32 %v3777_v48, %v3127_v47  ;;  %v3099_v47 = vld [vmem:[#allocation12 + $0x38] sm:$0xf] }
 0x105   :  { %v666_v12 = vadd.f32 %v630_v7, %v362_v61  ;;  %v644_v33 = vpop.f32.mrf.mxu0  ;;  %v687_v18 = vadd.f32 %v686_v53, %v391_v44  ;;  %v4428_v7 = vpop.f32.mrf.mxu1  ;;  %v3129_v53 = vld [vmem:[#allocation12 + $0x84] sm:$0xf0]  ;;  %v3135_v44 = vld [vmem:[#allocation12 + $0x80] sm:$0xf] }
 0x106   :  { %v3140_v33 = vor.u32 %v3780_v30, %v3139_v27  ;;  %v3108_v27 = vor.u32 %v3770_v15, %v3105_v17  ;;  %v364_v48 = vadd.f32 %v4428_v7, %v4400_v41  ;;  %v3075_v15 = vld [vmem:[#allocation12 + $0x8] sm:$0xf] }
 0x107   :  { %v2966_v22 = vmul.f32 -1.442695, %v666_v12  ;;  %v3151_v12 = vld [vmem:[#allocation12 + $0xa8] sm:$0xf] }
 0x108   :  { %v3152_v16 = vor.u32 %v3783_v14, %v3151_v12  ;;  %v3103_v12 = vld [vmem:[#allocation12 + $0x48] sm:$0xf]  ;;  %v3771_v14 = vld [vmem:[#allocation12 + $0x50] sm:$0xf0] }
 0x109   :  { %3940 = vpow2.f32 %v2966_v22  ;;  %v3160_v22 = vor.u32 %v3784_v20, %v3159_v19  ;;  %v3111_v19 = vld [vmem:[#allocation12 + $0x50] sm:$0xf]  ;;  %v3772_v20 = vld [vmem:[#allocation12 + $0x58] sm:$0xf0] }
 0x10a   :  { %v631_v32 = vpop.f32.mrf.mxu3  ;;  %1128 = vmatpush.bf16.msra.mxu0 %v3152_v16  ;;  %v3104_v16 = vor.u32 %v3771_v14, %v3103_v12  ;;  %v3112_v30 = vor.u32 %v3772_v20, %v3111_v19  ;;  %v3069_v14 = vld [vmem:[#allocation12 + $0xc] sm:$0xf0] }
 0x10b   :  { %1154 = vmatpush.bf16.msra.mxu2 %v3160_v22  ;;  %v3779_v32 = vld [vmem:[#allocation12 + $0x94] sm:$0xf]  ;;  %v734_v22 = vperm.slane %v4449_v45, 1 }
 0x10c   :  { %v3144_v37 = vor.u32 %v3779_v32, %v3141_v34  ;;  %v3768_v34 = vld [vmem:[#allocation12 + $0x38] sm:$0xf0] }
 0x10d   :  { %v4430_v1 = vpop.f32.mrf.mxu1 }
 0x10e   :  { %1129 = vmatpush.bf16.msra.mxu0 %v3140_v33  ;;  %1142 = vmatpush.bf16.msra.mxu1 %v3144_v37  ;;  %v3091_v33 = vld [vmem:[#allocation12 + $0x30] sm:$0xf]  ;;  %v3767_v37 = vld [vmem:[#allocation12 + $0x34] sm:$0xf] }
 0x10f   :  { %v3941_v38 = vpop.eup %3940 }
 0x110   :  { %v670_v40 = vadd.f32 1.0, %v3941_v38  ;;  %v3148_v38 = vor.u32 %v3781_v36, %v3147_v35  ;;  %v3092_v36 = vor.u32 %v3768_v34, %v3091_v33 }
 0x112   :  { %3942 = vrcp.f32 %v670_v40  ;;  %v682_v57 = vand.u32 2147483648, %v670_v40  ;;  %v680_v50 = vand.u32 2147483647, %v670_v40  ;;  %vm676_vm5 = vweird.f32 %v670_v40  ;;  %1155 = vmatpush.bf16.msra.mxu2 %v3148_v38  ;;  %1130 = vmatpush.bf16.msra.mxu0 %v3128_v51  ;;  %v3093_v38 = vld [vmem:[#allocation12 + $0x3c] sm:$0xf0] }
 0x113   :  { %3944 = vtanh.f32 %v687_v18  ;;  %v3096_v51 = vor.u32 %v3767_v37, %v3093_v38 }
 0x114   :  { %v683_v61 = vor.u32 1.1754944e-38, %v682_v57  ;;  %vm681_vm7 = vcmp.eq.f32.partialorder %v680_v50, 8.507059e+37  ;;  %v3115_v57 = vld [vmem:[#allocation12 + $0x60] sm:$0xf]  ;;  %v3773_v50 = vld [vmem:[#allocation12 + $0x64] sm:$0xf] }
 0x115   :  { %v4432_v8 = vpop.f32.mrf.mxu1 }
 0x118   :  { %v3943_v54 = vpop.eup %3942 }
 0x119   :  { %v672_v55 = vmul.f32 %v3943_v54, %v670_v40  ;;  %vm677_vm4 = vweird.f32 %v3943_v54  ;;  %v3945_v2 = vpop.eup %3944 }
 0x11a   :  { %vm678_vm6 = vmor %vm676_vm5, %vm677_vm4 }
 0x11b   :  { %v673_v56 = vsub.f32 1.0, %v672_v55  ;;  %v3132_v55 = vor.u32 %v3776_v49, %v3129_v53  ;;  %v3769_v53 = vld [vmem:[#allocation12 + $0x40] sm:$0xf0] }
 0x11d   :  { %v674_v58 = vmul.f32 %v3943_v54, %v673_v56  ;;  %v4434_v9 = vpop.f32.mrf.mxu1  ;;  %v733_v56 = vperm.slane %v4449_v45, 0  ;;  %1143 = vmatpush.bf16.msra.mxu1 %v3132_v55 }
 0x11f   :  { %v675_v25 = vadd.f32 %v3943_v54, %v674_v58  ;;  %v3774_v58 = vld [vmem:[#allocation12 + $0x68] sm:$0xf0] }
 0x121   :  { %v679_v63 = vsel %vm678_vm6, %v3943_v54, %v675_v25  ;;  %v3778_v54 = vld [vmem:[#allocation12 + $0x88] sm:$0xf0]  ;;  %v4452_v25 = vpop.f32.mrf.mxu2 }
 0x122   :  { %v684_v24 = vsel %vm681_vm7, %v683_v61, %v679_v63  ;;  %v3136_v18 = vor.u32 %v3778_v54, %v3135_v44  ;;  %v3116_v61 = vor.u32 %v3774_v58, %v3115_v57  ;;  %v3117_v63 = vld [vmem:[#allocation12 + $0x6c] sm:$0xf0]  ;;  %v3100_v54 = vor.u32 %v3769_v53, %v3099_v47  ;;  %v3764_v57 = vld [vmem:[#allocation12 + $0x1c] sm:$0xf] }
 0x123   :  { %v689_v0 = vsub.f32 1.0, %v684_v24  ;;  %v691_v4 = vmul.f32 %v684_v24, %v4349_v59  ;;  %v3123_v24 = vld [vmem:[#allocation12 + $0x68] sm:$0xf] }
 0x124   :  { %1156 = vmatpush.bf16.msra.mxu2 %v3136_v18  ;;  %1131 = vmatpush.bf16.msra.mxu0 %v3116_v61  ;;  %v3079_v18 = vld [vmem:[#allocation12 + $0x18] sm:$0xf]  ;;  %v3087_v61 = vld [vmem:[#allocation12 + $0x20] sm:$0xf] }
 0x125   :  { %v690_v3 = vmul.f32 %v3945_v2, %v689_v0  ;;  %v4436_v10 = vpop.f32.mrf.mxu1  ;;  %v3775_v0 = vld [vmem:[#allocation12 + $0x70] sm:$0xf0]  ;;  %v3120_v2 = vor.u32 %v3773_v50, %v3117_v63  ;;  %v3081_v50 = vld [vmem:[#allocation12 + $0x24] sm:$0xf0]  ;;  %v3766_v63 = vld [vmem:[#allocation12 + $0x28] sm:$0xf0] }
 0x126   :  { %v3084_v7 = vor.u32 %v3764_v57, %v3081_v50 }
 0x127   :  { %v4424_v5 = vadd.f32 %v691_v4, %v690_v3  ;;  %v3124_v3 = vor.u32 %v3775_v0, %v3123_v24  ;;  %1144 = vmatpush.bf16.msra.mxu1 %v3120_v2  ;;  %v3088_v0 = vor.u32 %v3766_v63, %v3087_v61  ;;  %v3067_v2 = vld [vmem:[#allocation12] sm:$0xf] }
 0x128   :  { %1132 = vmatpush.bf16.msra.mxu0 %v3104_v16  ;;  %v3763_v16 = vld [vmem:[#allocation12 + $0x10] sm:$0xf0] }
 0x129   :  { %v698_v6 = vpack.c.bf16 %v4424_v5, %v4424_v5  ;;  %1157 = vmatpush.bf16.msra.mxu2 %v3124_v3  ;;  %v3762_v3 = vld [vmem:[#allocation12 + $0x8] sm:$0xf0] }
 0x12a   :  { %v3068_v12 = vor.u32 %v3762_v3, %v3067_v2 }
 0x12b   :  { %875 = vmatmul.bf16.vlgmr.msrb.gmra.mxu1 %v698_v6  ;;  %888 = vmatmul.bf16.vlgmr.msrb.gmra.mxu2 %v698_v6 }
 0x12c   :  { %901 = vmatmul.bf16.vlgmr.msrb.gmra.mxu3 %v698_v6  ;;  %1145 = vmatpush.bf16.msra.mxu1 %v3108_v27 }
 0x12d   :  { %v4440_v59 = vpop.f32.mrf.mxu1  ;;  %1158 = vmatpush.bf16.msra.mxu2 %v3112_v30  ;;  %1133 = vmatpush.bf16.msra.mxu0 %v3092_v36  ;;  %v735_v36 = vperm.slane %v4449_v45, 2 }
 0x130   :  { %1146 = vmatpush.bf16.msra.mxu1 %v3096_v51 }
 0x131   :  { %1159 = vmatpush.bf16.msra.mxu2 %v3100_v54 }
 0x134   :  { %1147 = vmatpush.bf16.msra.mxu1 %v3084_v7 }
 0x135   :  { %v4444_v40 = vpop.f32.mrf.mxu1  ;;  %1160 = vmatpush.bf16.msra.mxu2 %v3088_v0 }
 0x1a8   :  { %v876_v4 = vpop.f32.mrf.mxu1 }
 0x1a9   :  { %v877_v6 = vadd.f32 %v876_v4, %v733_v56  ;;  %v3765_v56 = vld [vmem:[#allocation12 + $0x20] sm:$0xf0] }
 0x1aa   :  { %v3080_v58 = vor.u32 %v3765_v56, %v3079_v18  ;;  %v3761_v4 = vld [vmem:[#allocation12 + $0x4] sm:$0xf] }
 0x1ab   :  { %v906_v21 = vadd.f32 %v877_v6, %v4366_v28  ;;  %v3072_v20 = vor.u32 %v3761_v4, %v3069_v14  ;;  %v3806_v14 = vld [vmem:[#allocation12 + $0xac] sm:$0xf] }
 0x1ac   :  { %1134 = vmatpush.bf16.msra.mxu0 %v3080_v58 }
 0x1ad   :  { %v3063_v32 = vmul.f32 -1.442695, %v906_v21  ;;  %v3076_v21 = vor.u32 %v3763_v16, %v3075_v15  ;;  %1148 = vmatpush.bf16.msra.mxu1 %v3072_v20  ;;  %v3251_v16 = vld [vmem:[#allocation12 + $0xb4] sm:$0xf0] }
 0x1ae   :  { %v889_v35 = vpop.f32.mrf.mxu2  ;;  %v3254_v20 = vor.u32 %v3806_v14, %v3251_v16  ;;  %v3201_v14 = vld [vmem:[#allocation12 + $0x48] sm:$0xf]  ;;  %v3794_v16 = vld [vmem:[#allocation12 + $0x4c] sm:$0xf] }
 0x1af   :  { %3946 = vpow2.f32 %v3063_v32  ;;  %v890_v28 = vadd.f32 %v889_v35, %v734_v22  ;;  %v902_v49 = vpop.f32.mrf.mxu3  ;;  %1161 = vmatpush.bf16.msra.mxu2 %v3076_v21 }
 0x1b0   :  { %v878_v44 = vpop.f32.mrf.mxu1  ;;  %1135 = vmatpush.bf16.msra.mxu0 %v3068_v12  ;;  %v3807_v12 = vld [vmem:[#allocation12 + $0xb0] sm:$0xf0] }
 0x1b1   :  { %v926_v55 = vadd.f32 %v890_v28, %v364_v48  ;;  %v903_v44 = vadd.f32 %v902_v49, %v735_v36 }
 0x1b3   :  { %v3064_v24 = vmul.f32 -1.442695, %v926_v55  ;;  %v393_v55 = vadd.f32 %v4438_v11, %v4420_v52 }
 0x1b4   :  { %1402 = vmatpush.bf16.msrb.mxu0 %v3254_v20  ;;  %v3209_v20 = vld [vmem:[#allocation12 + $0x50] sm:$0xf] }
 0x1b5   :  { %v3947_v6 = vpop.eup %3946  ;;  %3948 = vpow2.f32 %v3064_v24 }
 0x1b6   :  { %v910_v17 = vadd.f32 1.0, %v3947_v6  ;;  %v891_v19 = vpop.f32.mrf.mxu2  ;;  %v3249_v6 = vld [vmem:[#allocation12 + $0xa8] sm:$0xf] }
 0x1b7   :  { %v904_v22 = vpop.f32.mrf.mxu3  ;;  %v3250_v15 = vor.u32 %v3807_v12, %v3249_v6  ;;  %v3808_v19 = vld [vmem:[#allocation12 + $0xb8] sm:$0xf0] }
 0x1b8   :  { %3950 = vrcp.f32 %v910_v17  ;;  %v922_v35 = vand.u32 2147483648, %v910_v17  ;;  %v920_v38 = vand.u32 2147483647, %v910_v17  ;;  %vm916_vm9 = vweird.f32 %v910_v17  ;;  %v3237_v22 = vld [vmem:[#allocation12 + $0x90] sm:$0xf] }
 0x1b9   :  { %1389 = vmatpush.bf16.msra.mxu3 %v3250_v15  ;;  %v3795_v15 = vld [vmem:[#allocation12 + $0x50] sm:$0xf0] }
 0x1ba   :  { %v923_v51 = vor.u32 1.1754944e-38, %v922_v35  ;;  %vm921_vm11 = vcmp.eq.f32.partialorder %v920_v38, 8.507059e+37  ;;  %v3805_v35 = vld [vmem:[#allocation12 + $0xa0] sm:$0xf0]  ;;  %v4469_v38 = vld [vmem:[%s4632_s5] sm:$0x7] }
 0x1bb   :  { %v3949_v27 = vpop.eup %3948 }
 0x1bc   :  { %v930_v30 = vadd.f32 1.0, %v3949_v27  ;;  %v3804_v27 = vld [vmem:[#allocation12 + $0x98] sm:$0xf0] }
 0x1be   :  { %v3951_v32 = vpop.eup %3950  ;;  %3952 = vrcp.f32 %v930_v30  ;;  %v942_v45 = vand.u32 2147483648, %v930_v30  ;;  %v940_v58 = vand.u32 2147483647, %v930_v30  ;;  %vm936_vm13 = vweird.f32 %v930_v30 }
 0x1bf   :  { %v912_v33 = vmul.f32 %v3951_v32, %v910_v17  ;;  %vm917_vm8 = vweird.f32 %v3951_v32  ;;  %v3257_v17 = vld [vmem:[#allocation12 + $0xb0] sm:$0xf] }
 0x1c0   :  { %vm918_vm10 = vmor %vm916_vm9, %vm917_vm8  ;;  %v943_v63 = vor.u32 1.1754944e-38, %v942_v45  ;;  %vm941_vm15 = vcmp.eq.f32.partialorder %v940_v58, 8.507059e+37  ;;  %v3258_v21 = vor.u32 %v3808_v19, %v3257_v17  ;;  %v995_v45 = vperm.slane %v4469_v38, 1  ;;  %v3798_v58 = vld [vmem:[#allocation12 + $0x68] sm:$0xf0] }
 0x1c1   :  { %v913_v34 = vsub.f32 1.0, %v912_v33  ;;  %v3239_v33 = vld [vmem:[#allocation12 + $0x9c] sm:$0xf0]  ;;  %v3202_v17 = vor.u32 %v3795_v15, %v3201_v14  ;;  %v3203_v19 = vld [vmem:[#allocation12 + $0x54] sm:$0xf0] }
 0x1c2   :  { %1415 = vmatpush.bf16.msrb.mxu1 %v3258_v21  ;;  %v3796_v21 = vld [vmem:[#allocation12 + $0x58] sm:$0xf0] }
 0x1c3   :  { %v914_v37 = vmul.f32 %v3951_v32, %v913_v34  ;;  %v3245_v34 = vld [vmem:[#allocation12 + $0x98] sm:$0xf] }
 0x1c4   :  { %v3953_v47 = vpop.eup %3952 }
 0x1c5   :  { %v932_v48 = vmul.f32 %v3953_v47, %v930_v30  ;;  %v915_v28 = vadd.f32 %v3951_v32, %v914_v37  ;;  %vm937_vm12 = vweird.f32 %v3953_v47  ;;  %v3803_v30 = vld [vmem:[#allocation12 + $0x94] sm:$0xf]  ;;  %v3246_v37 = vor.u32 %v3805_v35, %v3245_v34  ;;  %v3792_v35 = vld [vmem:[#allocation12 + $0x38] sm:$0xf0] }
 0x1c6   :  { %vm938_vm14 = vmor %vm936_vm13, %vm937_vm12  ;;  %v3242_v36 = vor.u32 %v3803_v30, %v3239_v33  ;;  %v3206_v30 = vor.u32 %v3794_v16, %v3203_v19 }
 0x1c7   :  { %v933_v53 = vsub.f32 1.0, %v932_v48  ;;  %v919_v54 = vsel %vm918_vm10, %v3951_v32, %v915_v28  ;;  %v3238_v32 = vor.u32 %v3804_v27, %v3237_v22  ;;  %1416 = vmatpush.bf16.msrb.mxu1 %v3246_v37  ;;  %v3801_v48 = vld [vmem:[#allocation12 + $0x80] sm:$0xf0]  ;;  %v3800_v28 = vld [vmem:[#allocation12 + $0x7c] sm:$0xf] }
 0x1c8   :  { %v924_v18 = vsel %vm921_vm11, %v923_v51, %v919_v54  ;;  %1403 = vmatpush.bf16.msrb.mxu0 %v3242_v36  ;;  %v3802_v54 = vld [vmem:[#allocation12 + $0x88] sm:$0xf0]  ;;  %v3791_v36 = vld [vmem:[#allocation12 + $0x34] sm:$0xf]  ;;  %v3191_v37 = vld [vmem:[#allocation12 + $0x3c] sm:$0xf0] }
 0x1c9   :  { %v934_v56 = vmul.f32 %v3953_v47, %v933_v53  ;;  %v946_v57 = vmul.f32 %v924_v18, %v903_v44  ;;  %1390 = vmatpush.bf16.msra.mxu3 %v3238_v32  ;;  %v3227_v53 = vld [vmem:[#allocation12 + $0x84] sm:$0xf0]  ;;  %v3233_v44 = vld [vmem:[#allocation12 + $0x80] sm:$0xf]  ;;  %v3210_v32 = vor.u32 %v3796_v21, %v3209_v20 }
 0x1ca   :  { %v3234_v18 = vor.u32 %v3802_v54, %v3233_v44 }
 0x1cb   :  { %v935_v50 = vadd.f32 %v3953_v47, %v934_v56  ;;  %v947_v61 = vadd.f32 %v946_v57, %v393_v55  ;;  %v3230_v55 = vor.u32 %v3800_v28, %v3227_v53  ;;  %v994_v56 = vperm.slane %v4469_v38, 0  ;;  %v3213_v57 = vld [vmem:[#allocation12 + $0x60] sm:$0xf]  ;;  %v3793_v53 = vld [vmem:[#allocation12 + $0x40] sm:$0xf0] }
 0x1cc   :  { %1417 = vmatpush.bf16.msrb.mxu1 %v3234_v18  ;;  %v3194_v28 = vor.u32 %v3791_v36, %v3191_v37  ;;  %v3789_v18 = vld [vmem:[#allocation12 + $0x20] sm:$0xf0] }
 0x1cd   :  { %v939_v24 = vsel %vm938_vm14, %v3953_v47, %v935_v50  ;;  %3954 = vtanh.f32 %v947_v61  ;;  %v3225_v47 = vld [vmem:[#allocation12 + $0x78] sm:$0xf]  ;;  %1404 = vmatpush.bf16.msrb.mxu0 %v3230_v55  ;;  %v3797_v50 = vld [vmem:[#allocation12 + $0x64] sm:$0xf]  ;;  %v3214_v61 = vor.u32 %v3798_v58, %v3213_v57  ;;  %v3179_v57 = vld [vmem:[#allocation12 + $0x24] sm:$0xf0] }
 0x1ce   :  { %v944_v49 = vsel %vm941_vm15, %v943_v63, %v939_v24  ;;  %v3226_v51 = vor.u32 %v3801_v48, %v3225_v47  ;;  %v3215_v63 = vld [vmem:[#allocation12 + $0x6c] sm:$0xf0]  ;;  %v3221_v24 = vld [vmem:[#allocation12 + $0x68] sm:$0xf]  ;;  %v3177_v55 = vld [vmem:[#allocation12 + $0x18] sm:$0xf] }
 0x1cf   :  { %v949_v7 = vsub.f32 1.0, %v944_v49  ;;  %v951_v11 = vmul.f32 %v944_v49, %v4424_v5  ;;  %v3799_v49 = vld [vmem:[#allocation12 + $0x70] sm:$0xf0]  ;;  %v3185_v58 = vld [vmem:[#allocation12 + $0x20] sm:$0xf] }
 0x1d0   :  { %1391 = vmatpush.bf16.msra.mxu3 %v3226_v51  ;;  %v3197_v51 = vld [vmem:[#allocation12 + $0x38] sm:$0xf] }
 0x1d1   :  { %v3198_v54 = vor.u32 %v3793_v53, %v3197_v51 }
 0x1d3   :  { %v3955_v0 = vpop.eup %3954 }
 0x1d4   :  { %v950_v2 = vmul.f32 %v3955_v0, %v949_v7  ;;  %v3218_v7 = vor.u32 %v3797_v50, %v3215_v63  ;;  %v3222_v0 = vor.u32 %v3799_v49, %v3221_v24  ;;  %1392 = vmatpush.bf16.msra.mxu3 %v3214_v61  ;;  %v3790_v50 = vld [vmem:[#allocation12 + $0x28] sm:$0xf0]  ;;  %v3165_v24 = vld [vmem:[#allocation12] sm:$0xf] }
 0x1d5   :  { %v3186_v63 = vor.u32 %v3790_v50, %v3185_v58  ;;  %v3786_v49 = vld [vmem:[#allocation12 + $0x8] sm:$0xf0] }
 0x1d6   :  { %v4462_v3 = vadd.f32 %v951_v11, %v950_v2  ;;  %1405 = vmatpush.bf16.msrb.mxu0 %v3218_v7  ;;  %1418 = vmatpush.bf16.msrb.mxu1 %v3222_v0  ;;  %v3785_v7 = vld [vmem:[#allocation12 + $0x4] sm:$0xf] }
 0x1d8   :  { %v959_v4 = vpack.c.bf16 %v4462_v3, %v4462_v3  ;;  %1393 = vmatpush.bf16.msra.mxu3 %v3202_v17 }
 0x1da   :  { %1136 = vmatmul.bf16.vlgmr.msra.gmra.mxu0 %v959_v4  ;;  %1149 = vmatmul.bf16.vlgmr.msra.gmra.mxu1 %v959_v4 }
 0x1db   :  { %1162 = vmatmul.bf16.vlgmr.msra.gmra.mxu2 %v959_v4  ;;  %v367_v4 = vadd.f32 %v4430_v1, %v4400_v41  ;;  %1406 = vmatpush.bf16.msrb.mxu0 %v3206_v30  ;;  %v3189_v1 = vld [vmem:[#allocation12 + $0x30] sm:$0xf] }
 0x1dc   :  { %1419 = vmatpush.bf16.msrb.mxu1 %v3210_v32  ;;  %v3190_v48 = vor.u32 %v3792_v35, %v3189_v1 }
 0x1de   :  { %1394 = vmatpush.bf16.msra.mxu3 %v3190_v48 }
 0x1df   :  { %1407 = vmatpush.bf16.msrb.mxu0 %v3194_v28 }
 0x1e0   :  { %1420 = vmatpush.bf16.msrb.mxu1 %v3198_v54 }
 0x1e4   :  { %1421 = vmatpush.bf16.msrb.mxu1 %v3186_v63 }
 0x257   :  { %v1137_v2 = vpop.f32.mrf.mxu0  ;;  %v1150_v11 = vpop.f32.mrf.mxu1 }
 0x258   :  { %v1138_v6 = vadd.f32 %v1137_v2, %v994_v56  ;;  %v1151_v12 = vadd.f32 %v1150_v11, %v995_v45  ;;  %v3788_v56 = vld [vmem:[#allocation12 + $0x1c] sm:$0xf]  ;;  %v3178_v45 = vor.u32 %v3789_v18, %v3177_v55  ;;  %v3166_v2 = vor.u32 %v3786_v49, %v3165_v24  ;;  %v3167_v11 = vld [vmem:[#allocation12 + $0xc] sm:$0xf0]  ;;  %v3347_v24 = vld [vmem:[#allocation12 + $0xa8] sm:$0xf] }
 0x259   :  { %v3182_v61 = vor.u32 %v3788_v56, %v3179_v57  ;;  %v3170_v15 = vor.u32 %v3785_v7, %v3167_v11  ;;  %v3831_v49 = vld [vmem:[#allocation12 + $0xb0] sm:$0xf0]  ;;  %v3830_v7 = vld [vmem:[#allocation12 + $0xac] sm:$0xf]  ;;  %v3355_v11 = vld [vmem:[#allocation12 + $0xb0] sm:$0xf] }
 0x25a   :  { %v1167_v22 = vadd.f32 %v1138_v6, %v4371_v62  ;;  %v1187_v27 = vadd.f32 %v1151_v12, %v367_v4  ;;  %1395 = vmatpush.bf16.msra.mxu3 %v3178_v45  ;;  %v3173_v4 = vld [vmem:[#allocation12 + $0x8] sm:$0xf]  ;;  %v3787_v6 = vld [vmem:[#allocation12 + $0x10] sm:$0xf0] }
 0x25b   :  { %1408 = vmatpush.bf16.msrb.mxu0 %v3182_v61  ;;  %v3174_v16 = vor.u32 %v3787_v6, %v3173_v4  ;;  %v3832_v4 = vld [vmem:[#allocation12 + $0xb8] sm:$0xf0] }
 0x25c   :  { %v3161_v33 = vmul.f32 -1.442695, %v1167_v22  ;;  %v3162_v34 = vmul.f32 -1.442695, %v1187_v27 }
 0x25d   :  { %1422 = vmatpush.bf16.msrb.mxu1 %v3174_v16  ;;  %v3828_v16 = vld [vmem:[#allocation12 + $0x98] sm:$0xf0] }
 0x25e   :  { %3956 = vpow2.f32 %v3161_v33  ;;  %v1163_v47 = vpop.f32.mrf.mxu2  ;;  %1396 = vmatpush.bf16.msra.mxu3 %v3166_v2  ;;  %v3349_v2 = vld [vmem:[#allocation12 + $0xb4] sm:$0xf0] }
 0x25f   :  { %3958 = vpow2.f32 %v3162_v34  ;;  %v1139_v62 = vpop.f32.mrf.mxu0  ;;  %v1152_v44 = vpop.f32.mrf.mxu1  ;;  %1409 = vmatpush.bf16.msrb.mxu0 %v3170_v15  ;;  %v996_v34 = vperm.slane %v4469_v38, 2  ;;  %v3352_v6 = vor.u32 %v3830_v7, %v3349_v2  ;;  %v3335_v15 = vld [vmem:[#allocation12 + $0x90] sm:$0xf]  ;;  %v3299_v7 = vld [vmem:[#allocation12 + $0x48] sm:$0xf] }
 0x260   :  { %v396_v44 = vadd.f32 %v4442_v23, %v4420_v52  ;;  %v3818_v2 = vld [vmem:[#allocation12 + $0x4c] sm:$0xf] }
 0x261   :  { %v1164_v28 = vadd.f32 %v1163_v47, %v996_v34  ;;  %v3825_v34 = vld [vmem:[#allocation12 + $0x80] sm:$0xf0] }
 0x262   :  { %1663 = vmatpush.bf16.msrb.mxu3 %v3352_v6  ;;  %v3301_v6 = vld [vmem:[#allocation12 + $0x54] sm:$0xf0] }
 0x264   :  { %v3957_v0 = vpop.eup %3956 }
 0x265   :  { %v3959_v12 = vpop.eup %3958  ;;  %v1171_v14 = vadd.f32 1.0, %v3957_v0  ;;  %v3348_v0 = vor.u32 %v3831_v49, %v3347_v24 }
 0x266   :  { %v1191_v17 = vadd.f32 1.0, %v3959_v12  ;;  %v1165_v19 = vpop.f32.mrf.mxu2  ;;  %v3356_v12 = vor.u32 %v3832_v4, %v3355_v11 }
 0x267   :  { %3960 = vrcp.f32 %v1171_v14  ;;  %v1183_v33 = vand.u32 2147483648, %v1171_v14  ;;  %v1181_v35 = vand.u32 2147483647, %v1171_v14  ;;  %vm1177_vm1 = vweird.f32 %v1171_v14  ;;  %1650 = vmatpush.bf16.msrb.mxu2 %v3348_v0  ;;  %v3819_v0 = vld [vmem:[#allocation12 + $0x50] sm:$0xf0] }
 0x268   :  { %3962 = vrcp.f32 %v1191_v17  ;;  %v1203_v54 = vand.u32 2147483648, %v1191_v17  ;;  %vm1197_vm5 = vweird.f32 %v1191_v17  ;;  %v1201_v38 = vand.u32 2147483647, %v1191_v17  ;;  %1676 = vmatpush.bf16.msra.mxu0 %v3356_v12  ;;  %v3307_v12 = vld [vmem:[#allocation12 + $0x50] sm:$0xf] }
 0x269   :  { %v1184_v48 = vor.u32 1.1754944e-38, %v1183_v33  ;;  %vm1182_vm3 = vcmp.eq.f32.partialorder %v1181_v35, 8.507059e+37  ;;  %v3336_v19 = vor.u32 %v3828_v16, %v3335_v15  ;;  %v3323_v33 = vld [vmem:[#allocation12 + $0x78] sm:$0xf]  ;;  %v3300_v4 = vor.u32 %v3819_v0, %v3299_v7  ;;  %v3820_v15 = vld [vmem:[#allocation12 + $0x58] sm:$0xf0] }
 0x26a   :  { %v1204_v45 = vor.u32 1.1754944e-38, %v1203_v54  ;;  %vm1202_vm7 = vcmp.eq.f32.partialorder %v1201_v38, 8.507059e+37 }
 0x26b   :  { %1651 = vmatpush.bf16.msrb.mxu2 %v3336_v19  ;;  %v3304_v19 = vor.u32 %v3818_v2, %v3301_v6 }
 0x26d   :  { %v3961_v20 = vpop.eup %3960 }
 0x26e   :  { %v3963_v21 = vpop.eup %3962  ;;  %v1173_v22 = vmul.f32 %v3961_v20, %v1171_v14  ;;  %vm1178_vm0 = vweird.f32 %v3961_v20  ;;  %v4487_v14 = vld [vmem:[%s4632_s5] sm:$0x7] }
 0x26f   :  { %v1193_v27 = vmul.f32 %v3963_v21, %v1191_v17  ;;  %vm1179_vm2 = vmor %vm1177_vm1, %vm1178_vm0  ;;  %vm1198_vm4 = vweird.f32 %v3963_v21  ;;  %v3827_v17 = vld [vmem:[#allocation12 + $0x94] sm:$0xf] }
 0x270   :  { %v1174_v30 = vsub.f32 1.0, %v1173_v22  ;;  %vm1199_vm6 = vmor %vm1197_vm5, %vm1198_vm4  ;;  %v3829_v22 = vld [vmem:[#allocation12 + $0xa0] sm:$0xf0] }
 0x271   :  { %v1194_v32 = vsub.f32 1.0, %v1193_v27  ;;  %v1256_v27 = vperm.slane %v4487_v14, 1 }
 0x272   :  { %v1175_v1 = vmul.f32 %v3961_v20, %v1174_v30 }
 0x273   :  { %v1195_v36 = vmul.f32 %v3963_v21, %v1194_v32 }
 0x274   :  { %v1176_v37 = vadd.f32 %v3961_v20, %v1175_v1  ;;  %v3824_v1 = vld [vmem:[#allocation12 + $0x7c] sm:$0xf] }
 0x275   :  { %v1196_v62 = vadd.f32 %v3963_v21, %v1195_v36  ;;  %v3324_v36 = vor.u32 %v3825_v34, %v3323_v33  ;;  %v3295_v33 = vld [vmem:[#allocation12 + $0x38] sm:$0xf]  ;;  %v3817_v34 = vld [vmem:[#allocation12 + $0x40] sm:$0xf0] }
 0x276   :  { %v1180_v51 = vsel %vm1179_vm2, %v3961_v20, %v1176_v37  ;;  %v3337_v20 = vld [vmem:[#allocation12 + $0x9c] sm:$0xf0]  ;;  %v3325_v37 = vld [vmem:[#allocation12 + $0x84] sm:$0xf0] }
 0x277   :  { %v1185_v53 = vsel %vm1182_vm3, %v1184_v48, %v1180_v51  ;;  %v1200_v56 = vsel %vm1199_vm6, %v3963_v21, %v1196_v62  ;;  %v3343_v21 = vld [vmem:[#allocation12 + $0x98] sm:$0xf]  ;;  %v3340_v30 = vor.u32 %v3827_v17, %v3337_v20  ;;  %v3331_v48 = vld [vmem:[#allocation12 + $0x80] sm:$0xf]  ;;  %v369_v51 = vadd.f32 %v4432_v8, %v4400_v41  ;;  %1652 = vmatpush.bf16.msrb.mxu2 %v3324_v36 }
 0x278   :  { %v1207_v55 = vmul.f32 %v1185_v53, %v1164_v28  ;;  %v1205_v57 = vsel %vm1202_vm7, %v1204_v45, %v1200_v56  ;;  %v3344_v32 = vor.u32 %v3829_v22, %v3343_v21  ;;  %v3826_v28 = vld [vmem:[#allocation12 + $0x88] sm:$0xf0]  ;;  %v3821_v45 = vld [vmem:[#allocation12 + $0x64] sm:$0xf]  ;;  %v3308_v20 = vor.u32 %v3820_v15, %v3307_v12  ;;  %v3287_v21 = vld [vmem:[#allocation12 + $0x30] sm:$0xf] }
 0x279   :  { %v1210_v47 = vsub.f32 1.0, %v1205_v57  ;;  %v1212_v61 = vmul.f32 %v1205_v57, %v4462_v3  ;;  %1664 = vmatpush.bf16.msrb.mxu3 %v3340_v30  ;;  %v3332_v54 = vor.u32 %v3826_v28, %v3331_v48  ;;  %v3822_v56 = vld [vmem:[#allocation12 + $0x68] sm:$0xf0]  ;;  %v3816_v22 = vld [vmem:[#allocation12 + $0x38] sm:$0xf0]  ;;  %v3296_v36 = vor.u32 %v3817_v34, %v3295_v33 }
 0x27a   :  { %v1208_v18 = vadd.f32 %v1207_v55, %v396_v44  ;;  %1677 = vmatpush.bf16.msra.mxu0 %v3344_v32  ;;  %v3328_v44 = vor.u32 %v3824_v1, %v3325_v37  ;;  %v1255_v55 = vperm.slane %v4487_v14, 0  ;;  %v3288_v30 = vor.u32 %v3816_v22, %v3287_v21  ;;  %v3289_v32 = vld [vmem:[#allocation12 + $0x3c] sm:$0xf0]  ;;  %v3275_v37 = vld [vmem:[#allocation12 + $0x18] sm:$0xf] }
 0x27b   :  { %v3813_v48 = vld [vmem:[#allocation12 + $0x20] sm:$0xf0]  ;;  %v3812_v28 = vld [vmem:[#allocation12 + $0x1c] sm:$0xf]  ;;  %v398_v34 = vadd.f32 %v4452_v25, %v4420_v52 }
 0x27c   :  { %3964 = vtanh.f32 %v1208_v18  ;;  %v3311_v18 = vld [vmem:[#allocation12 + $0x60] sm:$0xf] }
 0x27d   :  { %1665 = vmatpush.bf16.msrb.mxu3 %v3328_v44  ;;  %v3312_v57 = vor.u32 %v3822_v56, %v3311_v18  ;;  %v3814_v44 = vld [vmem:[#allocation12 + $0x28] sm:$0xf0] }
 0x27e   :  { %1678 = vmatpush.bf16.msra.mxu0 %v3332_v54 }
 0x27f   :  { %1653 = vmatpush.bf16.msrb.mxu2 %v3312_v57  ;;  %v3810_v57 = vld [vmem:[#allocation12 + $0x8] sm:$0xf0] }
 0x282   :  { %v3965_v58 = vpop.eup %3964 }
 0x283   :  { %v1211_v50 = vmul.f32 %v3965_v58, %v1210_v47  ;;  %v3313_v47 = vld [vmem:[#allocation12 + $0x6c] sm:$0xf0]  ;;  %v3319_v58 = vld [vmem:[#allocation12 + $0x68] sm:$0xf]  ;;  %1654 = vmatpush.bf16.msrb.mxu2 %v3300_v4 }
 0x284   :  { %v3316_v8 = vor.u32 %v3821_v45, %v3313_v47  ;;  %v3263_v45 = vld [vmem:[#allocation12] sm:$0xf]  ;;  %v3809_v47 = vld [vmem:[#allocation12 + $0x4] sm:$0xf] }
 0x285   :  { %v4480_v63 = vadd.f32 %v1212_v61, %v1211_v50  ;;  %v3823_v50 = vld [vmem:[#allocation12 + $0x70] sm:$0xf0] }
 0x286   :  { %1666 = vmatpush.bf16.msrb.mxu3 %v3316_v8  ;;  %v3264_v8 = vor.u32 %v3810_v57, %v3263_v45  ;;  %v3453_v45 = vld [vmem:[#allocation12 + $0xb0] sm:$0xf]  ;;  %v3856_v57 = vld [vmem:[#allocation12 + $0xb8] sm:$0xf0] }
 0x287   :  { %v1220_v23 = vpack.c.bf16 %v4480_v63, %v4480_v63  ;;  %1655 = vmatpush.bf16.msrb.mxu2 %v3288_v30 }
 0x289   :  { %1397 = vmatmul.bf16.vlgmr.msra.gmra.mxu3 %v1220_v23  ;;  %1410 = vmatmul.bf16.vlgmr.msrb.gmra.mxu0 %v1220_v23 }
 0x28a   :  { %1423 = vmatmul.bf16.vlgmr.msrb.gmra.mxu1 %v1220_v23  ;;  %v3320_v23 = vor.u32 %v3823_v50, %v3319_v58  ;;  %1667 = vmatpush.bf16.msrb.mxu3 %v3304_v19  ;;  %v3265_v58 = vld [vmem:[#allocation12 + $0xc] sm:$0xf0]  ;;  %v3271_v50 = vld [vmem:[#allocation12 + $0x8] sm:$0xf] }
 0x28c   :  { %1679 = vmatpush.bf16.msra.mxu0 %v3320_v23 }
 0x290   :  { %1680 = vmatpush.bf16.msra.mxu0 %v3308_v20 }
 0x294   :  { %1681 = vmatpush.bf16.msra.mxu0 %v3296_v36 }
 0x306   :  { %v1411_v35 = vpop.f32.mrf.mxu0 }
 0x307   :  { %v1412_v53 = vadd.f32 %v1411_v35, %v1256_v27  ;;  %v4492_v62 = vpop.f32.mrf.mxu1  ;;  %v3815_v27 = vld [vmem:[#allocation12 + $0x34] sm:$0xf] }
 0x308   :  { %v3292_v35 = vor.u32 %v3815_v27, %v3289_v32 }
 0x309   :  { %v1448_v38 = vadd.f32 %v1412_v53, %v369_v51  ;;  %v3283_v51 = vld [vmem:[#allocation12 + $0x20] sm:$0xf] }
 0x30a   :  { %1668 = vmatpush.bf16.msrb.mxu3 %v3292_v35  ;;  %v3284_v56 = vor.u32 %v3814_v44, %v3283_v51 }
 0x30b   :  { %v3260_v61 = vmul.f32 -1.442695, %v1448_v38  ;;  %v3276_v38 = vor.u32 %v3813_v48, %v3275_v37 }
 0x30c   :  { %v1398_v24 = vpop.f32.mrf.mxu3  ;;  %1682 = vmatpush.bf16.msra.mxu0 %v3284_v56  ;;  %v3447_v56 = vld [vmem:[#allocation12 + $0xb4] sm:$0xf0] }
 0x30d   :  { %3966 = vpow2.f32 %v3260_v61  ;;  %v1399_v49 = vadd.f32 %v1398_v24, %v1255_v55  ;;  %v3811_v61 = vld [vmem:[#allocation12 + $0x10] sm:$0xf0]  ;;  %1656 = vmatpush.bf16.msrb.mxu2 %v3276_v38  ;;  %v3268_v24 = vor.u32 %v3809_v47, %v3265_v58  ;;  %v3854_v38 = vld [vmem:[#allocation12 + $0xac] sm:$0xf]  ;;  %v3454_v58 = vor.u32 %v3856_v57, %v3453_v45  ;;  %v3844_v45 = vld [vmem:[#allocation12 + $0x58] sm:$0xf0] }
 0x30e   :  { %v1413_v11 = vpop.f32.mrf.mxu0  ;;  %v3450_v47 = vor.u32 %v3854_v38, %v3447_v56  ;;  %v3405_v56 = vld [vmem:[#allocation12 + $0x50] sm:$0xf] }
 0x30f   :  { %v1428_v16 = vadd.f32 %v1399_v49, %v4376_v39  ;;  %v1426_v17 = vpop.f32.mrf.mxu1  ;;  %v3277_v39 = vld [vmem:[#allocation12 + $0x24] sm:$0xf0]  ;;  %v3272_v49 = vor.u32 %v3811_v61, %v3271_v50  ;;  %v3433_v50 = vld [vmem:[#allocation12 + $0x90] sm:$0xf]  ;;  %v3852_v61 = vld [vmem:[#allocation12 + $0x98] sm:$0xf0] }
 0x310   :  { %v3280_v18 = vor.u32 %v3812_v28, %v3277_v39 }
 0x311   :  { %v3259_v1 = vmul.f32 -1.442695, %v1428_v16  ;;  %1657 = vmatpush.bf16.msrb.mxu2 %v3264_v8  ;;  %1683 = vmatpush.bf16.msra.mxu0 %v3272_v49  ;;  %v1257_v16 = vperm.slane %v4487_v14, 2  ;;  %v3851_v8 = vld [vmem:[#allocation12 + $0x94] sm:$0xf] }
 0x312   :  { %1669 = vmatpush.bf16.msrb.mxu3 %v3280_v18  ;;  %v3441_v49 = vld [vmem:[#allocation12 + $0x98] sm:$0xf] }
 0x313   :  { %v3967_v53 = vpop.eup %3966  ;;  %3968 = vpow2.f32 %v3259_v1  ;;  %v1425_v27 = vadd.f32 %v4492_v62, %v1257_v16  ;;  %v3429_v16 = vld [vmem:[#allocation12 + $0x80] sm:$0xf] }
 0x314   :  { %v1452_v54 = vadd.f32 1.0, %v3967_v53  ;;  %v1400_v55 = vpop.f32.mrf.mxu3 }
 0x315   :  { %v3855_v55 = vld [vmem:[#allocation12 + $0xb0] sm:$0xf0]  ;;  %1924 = vmatpush.bf16.msra.mxu2 %v3450_v47 }
 0x316   :  { %3970 = vrcp.f32 %v1452_v54  ;;  %1670 = vmatpush.bf16.msrb.mxu3 %v3268_v24  ;;  %v1464_v1 = vand.u32 2147483648, %v1452_v54  ;;  %vm1458_vm13 = vweird.f32 %v1452_v54  ;;  %v1462_v35 = vand.u32 2147483647, %v1452_v54  ;;  %v3435_v24 = vld [vmem:[#allocation12 + $0x9c] sm:$0xf0] }
 0x318   :  { %v1465_v48 = vor.u32 1.1754944e-38, %v1464_v1  ;;  %vm1463_vm15 = vcmp.eq.f32.partialorder %v1462_v35, 8.507059e+37  ;;  %v3417_v35 = vld [vmem:[#allocation12 + $0x68] sm:$0xf] }
 0x319   :  { %v3969_v23 = vpop.eup %3968 }
 0x31a   :  { %v1432_v7 = vadd.f32 1.0, %v3969_v23  ;;  %1937 = vmatpush.bf16.msra.mxu3 %v3454_v58  ;;  %v3434_v23 = vor.u32 %v3852_v61, %v3433_v50  ;;  %v3406_v61 = vor.u32 %v3844_v45, %v3405_v56 }
 0x31c   :  { %3972 = vrcp.f32 %v1432_v7  ;;  %v3971_v0 = vpop.eup %3970  ;;  %v1444_v15 = vand.u32 2147483648, %v1432_v7  ;;  %v1442_v19 = vand.u32 2147483647, %v1432_v7  ;;  %vm1438_vm9 = vweird.f32 %v1432_v7 }
 0x31d   :  { %v1454_v2 = vmul.f32 %v3971_v0, %v1452_v54  ;;  %vm1459_vm12 = vweird.f32 %v3971_v0  ;;  %v3445_v54 = vld [vmem:[#allocation12 + $0xa8] sm:$0xf] }
 0x31e   :  { %v1445_v22 = vor.u32 1.1754944e-38, %v1444_v15  ;;  %vm1443_vm11 = vcmp.eq.f32.partialorder %v1442_v19, 8.507059e+37  ;;  %vm1460_vm14 = vmor %vm1458_vm13, %vm1459_vm12  ;;  %v3446_v18 = vor.u32 %v3855_v55, %v3445_v54  ;;  %v3423_v15 = vld [vmem:[#allocation12 + $0x84] sm:$0xf0]  ;;  %v4508_v19 = vld [vmem:[%s4632_s5] sm:$0x7] }
 0x31f   :  { %v1455_v6 = vsub.f32 1.0, %v1454_v2  ;;  %v3843_v54 = vld [vmem:[#allocation12 + $0x50] sm:$0xf0]  ;;  %v3842_v55 = vld [vmem:[#allocation12 + $0x4c] sm:$0xf] }
 0x320   :  { %1911 = vmatpush.bf16.msra.mxu1 %v3446_v18  ;;  %v3399_v18 = vld [vmem:[#allocation12 + $0x54] sm:$0xf0] }
 0x321   :  { %v1456_v20 = vmul.f32 %v3971_v0, %v1455_v6  ;;  %v3848_v6 = vld [vmem:[#allocation12 + $0x7c] sm:$0xf]  ;;  %v3402_v50 = vor.u32 %v3842_v55, %v3399_v18 }
 0x322   :  { %v3973_v11 = vpop.eup %3972 }
 0x323   :  { %v1434_v4 = vmul.f32 %v3973_v11, %v1432_v7  ;;  %vm1439_vm8 = vweird.f32 %v3973_v11  ;;  %v1457_v33 = vadd.f32 %v3971_v0, %v1456_v20  ;;  %v3853_v7 = vld [vmem:[#allocation12 + $0xa0] sm:$0xf0] }
 0x324   :  { %vm1440_vm10 = vmor %vm1438_vm9, %vm1439_vm8  ;;  %v3442_v2 = vor.u32 %v3853_v7, %v3441_v49  ;;  %1912 = vmatpush.bf16.msra.mxu1 %v3434_v23  ;;  %v3840_v23 = vld [vmem:[#allocation12 + $0x38] sm:$0xf0]  ;;  %v3387_v49 = vld [vmem:[#allocation12 + $0x3c] sm:$0xf0] }
 0x325   :  { %v1435_v12 = vsub.f32 1.0, %v1434_v4  ;;  %v1461_v37 = vsel %vm1460_vm14, %v3971_v0, %v1457_v33  ;;  %v3438_v0 = vor.u32 %v3851_v8, %v3435_v24  ;;  %v3849_v4 = vld [vmem:[#allocation12 + $0x80] sm:$0xf0]  ;;  %v3846_v33 = vld [vmem:[#allocation12 + $0x68] sm:$0xf0] }
 0x326   :  { %v1466_v28 = vsel %vm1463_vm15, %v1465_v48, %v1461_v37  ;;  %1938 = vmatpush.bf16.msra.mxu3 %v3442_v2  ;;  %v3385_v8 = vld [vmem:[#allocation12 + $0x30] sm:$0xf]  ;;  %v3393_v7 = vld [vmem:[#allocation12 + $0x38] sm:$0xf] }
 0x327   :  { %v1436_v17 = vmul.f32 %v3973_v11, %v1435_v12  ;;  %v1471_v62 = vsub.f32 1.0, %v1466_v28  ;;  %v1473_v53 = vmul.f32 %v1466_v28, %v4480_v63  ;;  %1925 = vmatpush.bf16.msra.mxu2 %v3438_v0  ;;  %v3386_v24 = vor.u32 %v3840_v23, %v3385_v8  ;;  %v3841_v0 = vld [vmem:[#allocation12 + $0x40] sm:$0xf0] }
 0x329   :  { %v1437_v21 = vadd.f32 %v3973_v11, %v1436_v17  ;;  %v3850_v17 = vld [vmem:[#allocation12 + $0x88] sm:$0xf0] }
 0x32b   :  { %v1441_v30 = vsel %vm1440_vm10, %v3973_v11, %v1437_v21  ;;  %v3421_v11 = vld [vmem:[#allocation12 + $0x78] sm:$0xf]  ;;  %v3426_v21 = vor.u32 %v3848_v6, %v3423_v15  ;;  %v3394_v6 = vor.u32 %v3841_v0, %v3393_v7  ;;  %v3836_v15 = vld [vmem:[#allocation12 + $0x1c] sm:$0xf]  ;;  %v401_v0 = vadd.f32 %v4363_v26, %v4420_v52 }
 0x32c   :  { %v1446_v32 = vsel %vm1443_vm11, %v1445_v22, %v1441_v30  ;;  %v3422_v12 = vor.u32 %v3849_v4, %v3421_v11  ;;  %v3430_v22 = vor.u32 %v3850_v17, %v3429_v16  ;;  %v1517_v30 = vperm.slane %v4508_v19, 1  ;;  %v3375_v16 = vld [vmem:[#allocation12 + $0x24] sm:$0xf0]  ;;  %v3381_v17 = vld [vmem:[#allocation12 + $0x20] sm:$0xf] }
 0x32d   :  { %v1468_v14 = vmul.f32 %v1446_v32, %v1425_v27  ;;  %v1516_v27 = vperm.slane %v4508_v19, 0  ;;  %1926 = vmatpush.bf16.msra.mxu2 %v3426_v21  ;;  %v3409_v32 = vld [vmem:[#allocation12 + $0x60] sm:$0xf]  ;;  %v3838_v21 = vld [vmem:[#allocation12 + $0x28] sm:$0xf0] }
 0x32e   :  { %1913 = vmatpush.bf16.msra.mxu1 %v3422_v12  ;;  %1939 = vmatpush.bf16.msra.mxu3 %v3430_v22  ;;  %v3410_v1 = vor.u32 %v3846_v33, %v3409_v32  ;;  %v3373_v12 = vld [vmem:[#allocation12 + $0x18] sm:$0xf]  ;;  %v3378_v32 = vor.u32 %v3836_v15, %v3375_v16  ;;  %v3382_v33 = vor.u32 %v3838_v21, %v3381_v17 }
 0x32f   :  { %v1469_v36 = vadd.f32 %v1468_v14, %v398_v34  ;;  %v3845_v34 = vld [vmem:[#allocation12 + $0x64] sm:$0xf]  ;;  %v3411_v14 = vld [vmem:[#allocation12 + $0x6c] sm:$0xf0] }
 0x330   :  { %v3414_v37 = vor.u32 %v3845_v34, %v3411_v14  ;;  %v3361_v34 = vld [vmem:[#allocation12] sm:$0xf]  ;;  %v3833_v14 = vld [vmem:[#allocation12 + $0x4] sm:$0xf] }
 0x331   :  { %3974 = vtanh.f32 %v1469_v36  ;;  %v3847_v36 = vld [vmem:[#allocation12 + $0x70] sm:$0xf0] }
 0x332   :  { %v3418_v48 = vor.u32 %v3847_v36, %v3417_v35  ;;  %1914 = vmatpush.bf16.msra.mxu1 %v3410_v1  ;;  %1927 = vmatpush.bf16.msra.mxu2 %v3414_v37  ;;  %v3834_v1 = vld [vmem:[#allocation12 + $0x8] sm:$0xf0]  ;;  %v3363_v35 = vld [vmem:[#allocation12 + $0xc] sm:$0xf0]  ;;  %v3369_v36 = vld [vmem:[#allocation12 + $0x8] sm:$0xf] }
 0x333   :  { %v3835_v37 = vld [vmem:[#allocation12 + $0x10] sm:$0xf0] }
 0x334   :  { %1940 = vmatpush.bf16.msra.mxu3 %v3418_v48  ;;  %v3362_v48 = vor.u32 %v3834_v1, %v3361_v34  ;;  %v3527_v1 = vld [vmem:[#allocation12 + $0x80] sm:$0xf] }
 0x336   :  { %1928 = vmatpush.bf16.msra.mxu2 %v3402_v50 }
 0x337   :  { %v3975_v39 = vpop.eup %3974 }
 0x338   :  { %v1472_v51 = vmul.f32 %v3975_v39, %v1471_v62  ;;  %v372_v39 = vadd.f32 %v4434_v9, %v4400_v41  ;;  %v3839_v9 = vld [vmem:[#allocation12 + $0x34] sm:$0xf]  ;;  %1941 = vmatpush.bf16.msra.mxu3 %v3406_v61 }
 0x339   :  { %v3390_v4 = vor.u32 %v3839_v9, %v3387_v49 }
 0x33a   :  { %v4501_v44 = vadd.f32 %v1473_v53, %v1472_v51 }
 0x33b   :  { %1929 = vmatpush.bf16.msra.mxu2 %v3390_v4 }
 0x33c   :  { %v1481_v25 = vpack.c.bf16 %v4501_v44, %v4501_v44  ;;  %1942 = vmatpush.bf16.msra.mxu3 %v3394_v6 }
 0x33e   :  { %1658 = vmatmul.bf16.vlgmr.msrb.gmra.mxu2 %v1481_v25  ;;  %1671 = vmatmul.bf16.vlgmr.msrb.gmra.mxu3 %v1481_v25 }
 0x33f   :  { %1684 = vmatmul.bf16.vlgmr.msra.gmra.mxu0 %v1481_v25  ;;  %v3397_v25 = vld [vmem:[#allocation12 + $0x48] sm:$0xf]  ;;  %1930 = vmatpush.bf16.msra.mxu2 %v3378_v32  ;;  %v3539_v32 = vld [vmem:[#allocation12 + $0x98] sm:$0xf] }
 0x340   :  { %v3398_v38 = vor.u32 %v3843_v54, %v3397_v25  ;;  %1943 = vmatpush.bf16.msra.mxu3 %v3382_v33  ;;  %v3877_v33 = vld [vmem:[#allocation12 + $0xa0] sm:$0xf0] }
 0x341   :  { %v3540_v34 = vor.u32 %v3877_v33, %v3539_v32  ;;  %v3495_v33 = vld [vmem:[#allocation12 + $0x48] sm:$0xf] }
 0x342   :  { %1915 = vmatpush.bf16.msra.mxu1 %v3398_v38 }
 0x346   :  { %1916 = vmatpush.bf16.msra.mxu1 %v3386_v24 }
 0x3bc   :  { %v4510_v20 = vpop.f32.mrf.mxu0 }
 0x3c1   :  { %v1659_v28 = vpop.f32.mrf.mxu2  ;;  %v1672_v62 = vpop.f32.mrf.mxu3 }
 0x3c2   :  { %v1660_v51 = vadd.f32 %v1659_v28, %v1516_v27  ;;  %v1673_v53 = vadd.f32 %v1672_v62, %v1517_v30  ;;  %v3366_v62 = vor.u32 %v3833_v14, %v3363_v35  ;;  %v3874_v14 = vld [vmem:[#allocation12 + $0x88] sm:$0xf0] }
 0x3c3   :  { %v3528_v35 = vor.u32 %v3874_v14, %v3527_v1  ;;  %v3866_v1 = vld [vmem:[#allocation12 + $0x4c] sm:$0xf] }
 0x3c4   :  { %v1689_v57 = vadd.f32 %v1660_v51, %v4386_v46  ;;  %v1709_v47 = vadd.f32 %v1673_v53, %v372_v39  ;;  %v1687_v58 = vpop.f32.mrf.mxu0  ;;  %v3837_v46 = vld [vmem:[#allocation12 + $0x20] sm:$0xf0]  ;;  %v3370_v39 = vor.u32 %v3835_v37, %v3369_v36  ;;  %1931 = vmatpush.bf16.msra.mxu2 %v3366_v62  ;;  %v3515_v36 = vld [vmem:[#allocation12 + $0x68] sm:$0xf]  ;;  %v3871_v37 = vld [vmem:[#allocation12 + $0x70] sm:$0xf0] }
 0x3c5   :  { %v3374_v30 = vor.u32 %v3837_v46, %v3373_v12  ;;  %v3879_v62 = vld [vmem:[#allocation12 + $0xb0] sm:$0xf0] }
 0x3c6   :  { %v3357_v2 = vmul.f32 -1.442695, %v1689_v57  ;;  %v3358_v11 = vmul.f32 -1.442695, %v1709_v47  ;;  %1944 = vmatpush.bf16.msra.mxu3 %v3370_v39  ;;  %v1518_v47 = vperm.slane %v4508_v19, 2 }
 0x3c7   :  { %1917 = vmatpush.bf16.msra.mxu1 %v3374_v30  ;;  %v3878_v39 = vld [vmem:[#allocation12 + $0xac] sm:$0xf] }
 0x3c8   :  { %3976 = vpow2.f32 %v3357_v2  ;;  %v1686_v9 = vadd.f32 %v4510_v20, %v1518_v47  ;;  %v3533_v47 = vld [vmem:[#allocation12 + $0x9c] sm:$0xf0] }
 0x3c9   :  { %3978 = vpow2.f32 %v3358_v11  ;;  %v1661_v22 = vpop.f32.mrf.mxu2  ;;  %v1674_v27 = vpop.f32.mrf.mxu3 }
 0x3ca   :  { %v3551_v22 = vld [vmem:[#allocation12 + $0xb0] sm:$0xf]  ;;  %v3880_v27 = vld [vmem:[#allocation12 + $0xb8] sm:$0xf0] }
 0x3cb   :  { %1918 = vmatpush.bf16.msra.mxu1 %v3362_v48  ;;  %v3552_v30 = vor.u32 %v3880_v27, %v3551_v22  ;;  %v3516_v48 = vor.u32 %v3871_v37, %v3515_v36  ;;  %v3467_v22 = vld [vmem:[#allocation12 + $0x8] sm:$0xf]  ;;  %v3859_v27 = vld [vmem:[#allocation12 + $0x10] sm:$0xf0]  ;;  %v3912_v36 = vld [vmem:[#allocation13 + $0x38] sm:$0xff] }
 0x3cc   :  { %v3468_v32 = vor.u32 %v3859_v27, %v3467_v22  ;;  %v3907_v22 = vld [vmem:[#allocation13 + $0x10] sm:$0xff] }
 0x3cd   :  { %2198 = vmatpush.bf16.msrb.mxu2 %v3552_v30 }
 0x3ce   :  { %v3977_v28 = vpop.eup %3976 }
 0x3cf   :  { %v3979_v51 = vpop.eup %3978  ;;  %v1693_v53 = vadd.f32 1.0, %v3977_v28  ;;  %v3543_v28 = vld [vmem:[#allocation12 + $0xa8] sm:$0xf] }
 0x3d0   :  { %v1713_v25 = vadd.f32 1.0, %v3979_v51  ;;  %v3544_v51 = vor.u32 %v3879_v62, %v3543_v28 }
 0x3d1   :  { %3980 = vrcp.f32 %v1693_v53  ;;  %v1705_v45 = vand.u32 2147483648, %v1693_v53  ;;  %v1703_v50 = vand.u32 2147483647, %v1693_v53  ;;  %vm1699_vm1 = vweird.f32 %v1693_v53  ;;  %2199 = vmatpush.bf16.msrb.mxu2 %v3540_v34  ;;  %v3867_v34 = vld [vmem:[#allocation12 + $0x50] sm:$0xf0] }
 0x3d2   :  { %3982 = vrcp.f32 %v1713_v25  ;;  %v1725_v19 = vand.u32 2147483648, %v1713_v25  ;;  %vm1719_vm5 = vweird.f32 %v1713_v25  ;;  %v1723_v11 = vand.u32 2147483647, %v1713_v25  ;;  %2172 = vmatpush.bf16.msrb.mxu0 %v3544_v51  ;;  %v3864_v51 = vld [vmem:[#allocation12 + $0x38] sm:$0xf0] }
 0x3d3   :  { %v1706_v23 = vor.u32 1.1754944e-38, %v1705_v45  ;;  %vm1704_vm3 = vcmp.eq.f32.partialorder %v1703_v50, 8.507059e+37  ;;  %v3875_v45 = vld [vmem:[#allocation12 + $0x94] sm:$0xf]  ;;  %v3496_v14 = vor.u32 %v3867_v34, %v3495_v33 }
 0x3d4   :  { %v1726_v12 = vor.u32 1.1754944e-38, %v1725_v19  ;;  %vm1724_vm7 = vcmp.eq.f32.partialorder %v1723_v11, 8.507059e+37  ;;  %v4529_v50 = vld [vmem:[%s4632_s5] sm:$0x7]  ;;  %v3479_v11 = vld [vmem:[#allocation12 + $0x20] sm:$0xf] }
 0x3d5   :  { %2200 = vmatpush.bf16.msrb.mxu2 %v3528_v35  ;;  %v1777_v19 = vperm.slane %v4529_v50, 0  ;;  %v3497_v35 = vld [vmem:[#allocation12 + $0x54] sm:$0xf0] }
 0x3d6   :  { %v3500_v28 = vor.u32 %v3866_v1, %v3497_v35  ;;  %v1779_v1 = vperm.slane %v4529_v50, 2 }
 0x3d7   :  { %v3981_v54 = vpop.eup %3980 }
 0x3d8   :  { %v3983_v55 = vpop.eup %3982  ;;  %v1695_v38 = vmul.f32 %v3981_v54, %v1693_v53  ;;  %vm1700_vm0 = vweird.f32 %v3981_v54  ;;  %v3545_v53 = vld [vmem:[#allocation12 + $0xb4] sm:$0xf0] }
 0x3d9   :  { %v1715_v18 = vmul.f32 %v3983_v55, %v1713_v25  ;;  %vm1701_vm2 = vmor %vm1699_vm1, %vm1700_vm0  ;;  %vm1720_vm4 = vweird.f32 %v3983_v55  ;;  %2201 = vmatpush.bf16.msrb.mxu2 %v3516_v48  ;;  %v3548_v25 = vor.u32 %v3878_v39, %v3545_v53  ;;  %v1778_v48 = vperm.slane %v4529_v50, 1  ;;  %v3483_v39 = vld [vmem:[#allocation12 + $0x30] sm:$0xf] }
 0x3da   :  { %v1696_v56 = vsub.f32 1.0, %v1695_v38  ;;  %vm1721_vm6 = vmor %vm1719_vm5, %vm1720_vm4 }
 0x3db   :  { %v1716_v57 = vsub.f32 1.0, %v1715_v18  ;;  %2185 = vmatpush.bf16.msrb.mxu1 %v3548_v25  ;;  %v3531_v18 = vld [vmem:[#allocation12 + $0x90] sm:$0xf]  ;;  %v3484_v25 = vor.u32 %v3864_v51, %v3483_v39 }
 0x3dc   :  { %v1697_v58 = vmul.f32 %v3981_v54, %v1696_v56  ;;  %v3876_v56 = vld [vmem:[#allocation12 + $0x98] sm:$0xf0] }
 0x3dd   :  { %v1717_v61 = vmul.f32 %v3983_v55, %v1716_v57  ;;  %v3532_v57 = vor.u32 %v3876_v56, %v3531_v18  ;;  %v374_v18 = vadd.f32 %v4436_v10, %v4400_v41  ;;  %v3459_v10 = vld [vmem:[#allocation12] sm:$0xf] }
 0x3de   :  { %v1698_v8 = vadd.f32 %v3981_v54, %v1697_v58  ;;  %v3536_v58 = vor.u32 %v3875_v45, %v3533_v47 }
 0x3df   :  { %v1718_v7 = vadd.f32 %v3983_v55, %v1717_v61  ;;  %2173 = vmatpush.bf16.msrb.mxu0 %v3532_v57  ;;  %v3491_v61 = vld [vmem:[#allocation12 + $0x38] sm:$0xf] }
 0x3e0   :  { %v1702_v24 = vsel %vm1701_vm2, %v3981_v54, %v1698_v8  ;;  %v3503_v54 = vld [vmem:[#allocation12 + $0x50] sm:$0xf]  ;;  %v3865_v8 = vld [vmem:[#allocation12 + $0x40] sm:$0xf0]  ;;  %2186 = vmatpush.bf16.msrb.mxu1 %v3536_v58  ;;  %v3471_v58 = vld [vmem:[#allocation12 + $0x18] sm:$0xf] }
 0x3e1   :  { %v1707_v49 = vsel %vm1704_vm3, %v1706_v23, %v1702_v24  ;;  %v1722_v6 = vsel %vm1721_vm6, %v3983_v55, %v1718_v7  ;;  %v3868_v55 = vld [vmem:[#allocation12 + $0x58] sm:$0xf0]  ;;  %v3492_v23 = vor.u32 %v3865_v8, %v3491_v61  ;;  %v3873_v24 = vld [vmem:[#allocation12 + $0x80] sm:$0xf0] }
 0x3e2   :  { %v1729_v2 = vmul.f32 %v1707_v49, %v1686_v9  ;;  %v1727_v46 = vsel %vm1724_vm7, %v1726_v12, %v1722_v6  ;;  %v3504_v38 = vor.u32 %v3868_v55, %v3503_v54  ;;  %v3519_v9 = vld [vmem:[#allocation12 + $0x78] sm:$0xf]  ;;  %v3872_v49 = vld [vmem:[#allocation12 + $0x7c] sm:$0xf]  ;;  %v3507_v12 = vld [vmem:[#allocation12 + $0x60] sm:$0xf] }
 0x3e3   :  { %v1732_v20 = vsub.f32 1.0, %v1727_v46  ;;  %v1734_v17 = vmul.f32 %v1727_v46, %v4501_v44  ;;  %v3520_v7 = vor.u32 %v3873_v24, %v3519_v9  ;;  %v3870_v46 = vld [vmem:[#allocation12 + $0x68] sm:$0xf0]  ;;  %v3863_v54 = vld [vmem:[#allocation12 + $0x34] sm:$0xf] }
 0x3e4   :  { %v1730_v4 = vadd.f32 %v1729_v2, %v401_v0  ;;  %2202 = vmatpush.bf16.msrb.mxu2 %v3504_v38  ;;  %v3521_v0 = vld [vmem:[#allocation12 + $0x84] sm:$0xf0]  ;;  %v3485_v55 = vld [vmem:[#allocation12 + $0x3c] sm:$0xf0]  ;;  %v3911_v38 = vld [vmem:[#allocation13 + $0x30] sm:$0xff] }
 0x3e5   :  { %v3524_v2 = vor.u32 %v3872_v49, %v3521_v0  ;;  %2174 = vmatpush.bf16.msrb.mxu0 %v3520_v7  ;;  %v3488_v45 = vor.u32 %v3863_v54, %v3485_v55  ;;  %v3861_v61 = vld [vmem:[#allocation12 + $0x20] sm:$0xf0]  ;;  %v3860_v8 = vld [vmem:[#allocation12 + $0x1c] sm:$0xf]  ;;  %v3473_v9 = vld [vmem:[#allocation12 + $0x24] sm:$0xf0] }
 0x3e6   :  { %3984 = vtanh.f32 %v1730_v4  ;;  %v3862_v4 = vld [vmem:[#allocation12 + $0x28] sm:$0xf0]  ;;  %v3476_v7 = vor.u32 %v3860_v8, %v3473_v9 }
 0x3e7   :  { %2187 = vmatpush.bf16.msrb.mxu1 %v3524_v2  ;;  %v3480_v6 = vor.u32 %v3862_v4, %v3479_v11  ;;  %v3910_v24 = vld [vmem:[#allocation13 + $0x28] sm:$0xff]  ;;  %v3857_v2 = vld [vmem:[#allocation12 + $0x4] sm:$0xf]  ;;  %v3461_v4 = vld [vmem:[#allocation12 + $0xc] sm:$0xf0] }
 0x3e8   :  { %2203 = vmatpush.bf16.msrb.mxu2 %v3492_v23  ;;  %v3472_v23 = vor.u32 %v3861_v61, %v3471_v58  ;;  %v3858_v0 = vld [vmem:[#allocation12 + $0x8] sm:$0xf0] }
 0x3e9   :  { %v3460_v11 = vor.u32 %v3858_v0, %v3459_v10  ;;  %v3641_v10 = vld [vmem:[#allocation12 + $0xa8] sm:$0xf]  ;;  %v3903_v0 = vld [vmem:[#allocation12 + $0xb0] sm:$0xf0] }
 0x3ec   :  { %v3985_v15 = vpop.eup %3984  ;;  %2204 = vmatpush.bf16.msrb.mxu2 %v3480_v6  ;;  %v3909_v6 = vld [vmem:[#allocation13 + $0x20] sm:$0xff] }
 0x3ed   :  { %v1733_v16 = vmul.f32 %v3985_v15, %v1732_v20  ;;  %v3869_v20 = vld [vmem:[#allocation12 + $0x64] sm:$0xf]  ;;  %v3508_v15 = vor.u32 %v3870_v46, %v3507_v12 }
 0x3ef   :  { %v4522_v21 = vadd.f32 %v1734_v17, %v1733_v16  ;;  %v3509_v16 = vld [vmem:[#allocation12 + $0x6c] sm:$0xf0]  ;;  %2175 = vmatpush.bf16.msrb.mxu0 %v3508_v15 }
 0x3f0   :  { %v3512_v17 = vor.u32 %v3869_v20, %v3509_v16  ;;  %2205 = vmatpush.bf16.msrb.mxu2 %v3468_v32  ;;  %v3464_v20 = vor.u32 %v3857_v2, %v3461_v4  ;;  %v3908_v16 = vld [vmem:[#allocation13 + $0x18] sm:$0xff]  ;;  %v3906_v32 = vld [vmem:[#allocation13 + $0x8] sm:$0xff]  ;;  %v3649_v4 = vld [vmem:[#allocation12 + $0xb0] sm:$0xf] }
 0x3f1   :  { %v1742_v26 = vpack.c.bf16 %v4522_v21, %v4522_v21  ;;  %v3902_v2 = vld [vmem:[#allocation12 + $0xac] sm:$0xf] }
 0x3f2   :  { %2188 = vmatpush.bf16.msrb.mxu1 %v3512_v17 }
 0x3f3   :  { %1919 = vmatmul.bf16.vlgmr.msra.gmra.mxu1 %v1742_v26  ;;  %1932 = vmatmul.bf16.vlgmr.msra.gmra.mxu2 %v1742_v26 }
 0x3f4   :  { %1945 = vmatmul.bf16.vlgmr.msra.gmra.mxu3 %v1742_v26  ;;  %2176 = vmatpush.bf16.msrb.mxu0 %v3496_v14 }
 0x3f5   :  { %2602 = vmatpush.bf16.msra.mxu2 %v3912_v36 }
 0x3f6   :  { %2189 = vmatpush.bf16.msrb.mxu1 %v3500_v28 }
 0x3f8   :  { %2177 = vmatpush.bf16.msrb.mxu0 %v3484_v25  ;;  %v403_v25 = vadd.f32 %v4368_v29, %v4420_v52 }
 0x3f9   :  { %2603 = vmatpush.bf16.msra.mxu2 %v3911_v38 }
 0x3fa   :  { %2190 = vmatpush.bf16.msrb.mxu1 %v3488_v45 }
 0x3fc   :  { %2178 = vmatpush.bf16.msrb.mxu0 %v3472_v23 }
 0x3fd   :  { %2604 = vmatpush.bf16.msra.mxu2 %v3910_v24  ;;  %v2530_v24 = vpack.c.bf16 %v4462_v3, %v4424_v5  ;;  %v3629_v5 = vld [vmem:[#allocation12 + $0x90] sm:$0xf]  ;;  %v3900_v3 = vld [vmem:[#allocation12 + $0x98] sm:$0xf0] }
 0x3fe   :  { %2191 = vmatpush.bf16.msrb.mxu1 %v3476_v7 }
 0x400   :  { %2179 = vmatpush.bf16.msrb.mxu0 %v3460_v11  ;;  %v3643_v11 = vld [vmem:[#allocation12 + $0xb4] sm:$0xf0] }
 0x401   :  { %2605 = vmatpush.bf16.msra.mxu2 %v3909_v6  ;;  %v3904_v6 = vld [vmem:[#allocation12 + $0xb8] sm:$0xf0] }
 0x402   :  { %2192 = vmatpush.bf16.msrb.mxu1 %v3464_v20  ;;  %v3631_v20 = vld [vmem:[#allocation12 + $0x9c] sm:$0xf0] }
 0x405   :  { %2606 = vmatpush.bf16.msra.mxu2 %v3908_v16  ;;  %v3901_v16 = vld [vmem:[#allocation12 + $0xa0] sm:$0xf0] }
 0x409   :  { %2607 = vmatpush.bf16.msra.mxu2 %v3907_v22  ;;  %v3617_v22 = vld [vmem:[#allocation12 + $0x78] sm:$0xf] }
 0x40d   :  { %2608 = vmatpush.bf16.msra.mxu2 %v3906_v32 }
 0x470   :  { %v1920_v26 = vpop.f32.mrf.mxu1 }
 0x471   :  { %v1921_v30 = vadd.f32 %v1920_v26, %v1777_v19 }
 0x473   :  { %v1950_v37 = vadd.f32 %v1921_v30, %v4391_v60 }
 0x475   :  { %v3455_v62 = vmul.f32 -1.442695, %v1950_v37  ;;  %v3905_v37 = vld [vmem:[#allocation13] sm:$0xff] }
 0x476   :  { %v1933_v53 = vpop.f32.mrf.mxu2  ;;  %2609 = vmatpush.bf16.msra.mxu2 %v3905_v37 }
 0x477   :  { %3986 = vpow2.f32 %v3455_v62  ;;  %v1934_v60 = vadd.f32 %v1933_v53, %v1778_v48  ;;  %v1946_v56 = vpop.f32.mrf.mxu3 }
 0x478   :  { %v1922_v57 = vpop.f32.mrf.mxu1  ;;  %v1947_v51 = vadd.f32 %v1946_v56, %v1779_v1  ;;  %v3898_v1 = vld [vmem:[#allocation12 + $0x88] sm:$0xf0] }
 0x479   :  { %v1970_v47 = vadd.f32 %v1934_v60, %v374_v18 }
 0x47b   :  { %v3456_v49 = vmul.f32 -1.442695, %v1970_v47 }
 0x47d   :  { %v3987_v19 = vpop.eup %3986  ;;  %3988 = vpow2.f32 %v3456_v49  ;;  %v2531_v49 = vpack.c.bf16 %v4501_v44, %v4480_v63  ;;  %v3899_v63 = vld [vmem:[#allocation12 + $0x94] sm:$0xf]  ;;  %v3630_v44 = vor.u32 %v3900_v3, %v3629_v5  ;;  %v3889_v5 = vld [vmem:[#allocation12 + $0x40] sm:$0xf0] }
 0x47e   :  { %v1954_v12 = vadd.f32 1.0, %v3987_v19  ;;  %v1935_v46 = vpop.f32.mrf.mxu2  ;;  %v3642_v19 = vor.u32 %v3903_v0, %v3641_v10 }
 0x47f   :  { %v1948_v15 = vpop.f32.mrf.mxu3  ;;  %v3650_v46 = vor.u32 %v3904_v6, %v3649_v4 }
 0x480   :  { %3990 = vrcp.f32 %v1954_v12  ;;  %v1966_v34 = vand.u32 2147483648, %v1954_v12  ;;  %v1964_v35 = vand.u32 2147483647, %v1954_v12  ;;  %vm1960_vm9 = vweird.f32 %v1954_v12  ;;  %2433 = vmatpush.bf16.msrb.mxu3 %v3642_v19  ;;  %v3637_v15 = vld [vmem:[#allocation12 + $0x98] sm:$0xf] }
 0x481   :  { %2459 = vmatpush.bf16.msra.mxu1 %v3650_v46  ;;  %v3887_v19 = vld [vmem:[#allocation12 + $0x34] sm:$0xf]  ;;  %v3589_v46 = vld [vmem:[#allocation12 + $0x38] sm:$0xf] }
 0x482   :  { %v1967_v62 = vor.u32 1.1754944e-38, %v1966_v34  ;;  %vm1965_vm11 = vcmp.eq.f32.partialorder %v1964_v35, 8.507059e+37  ;;  %v3625_v34 = vld [vmem:[#allocation12 + $0x80] sm:$0xf] }
 0x483   :  { %v3989_v17 = vpop.eup %3988  ;;  %v3626_v35 = vor.u32 %v3898_v1, %v3625_v34  ;;  %v3882_v34 = vld [vmem:[#allocation12 + $0x8] sm:$0xf0]  ;;  %v3881_v1 = vld [vmem:[#allocation12 + $0x4] sm:$0xf] }
 0x484   :  { %v1974_v26 = vadd.f32 1.0, %v3989_v17  ;;  %v4553_v17 = vld [vmem:[%s4632_s5] sm:$0x7]  ;;  %2434 = vmatpush.bf16.msrb.mxu3 %v3630_v44  ;;  %v3569_v44 = vld [vmem:[#allocation12 + $0x18] sm:$0xf] }
 0x485   :  { %v2039_v37 = vperm.slane %v4553_v17, 1 }
 0x486   :  { %v3991_v27 = vpop.eup %3990  ;;  %3992 = vrcp.f32 %v1974_v26  ;;  %v1986_v55 = vand.u32 2147483648, %v1974_v26  ;;  %v1984_v18 = vand.u32 2147483647, %v1974_v26  ;;  %vm1980_vm13 = vweird.f32 %v1974_v26 }
 0x487   :  { %v1956_v30 = vmul.f32 %v3991_v27, %v1954_v12  ;;  %vm1961_vm8 = vweird.f32 %v3991_v27  ;;  %v3646_v12 = vor.u32 %v3902_v2, %v3643_v11  ;;  %v3888_v2 = vld [vmem:[#allocation12 + $0x38] sm:$0xf0]  ;;  %v3583_v11 = vld [vmem:[#allocation12 + $0x3c] sm:$0xf0] }
 0x488   :  { %vm1962_vm10 = vmor %vm1960_vm9, %vm1961_vm8  ;;  %v1987_v57 = vor.u32 1.1754944e-38, %v1986_v55  ;;  %vm1985_vm15 = vcmp.eq.f32.partialorder %v1984_v18, 8.507059e+37  ;;  %v377_v18 = vadd.f32 %v4440_v59, %v4400_v41  ;;  %v3581_v59 = vld [vmem:[#allocation12 + $0x30] sm:$0xf] }
 0x489   :  { %v1957_v33 = vsub.f32 1.0, %v1956_v30  ;;  %2446 = vmatpush.bf16.msra.mxu0 %v3646_v12  ;;  %v3896_v30 = vld [vmem:[#allocation12 + $0x7c] sm:$0xf]  ;;  %v3582_v6 = vor.u32 %v3888_v2, %v3581_v59  ;;  %v3586_v12 = vor.u32 %v3887_v19, %v3583_v11 }
 0x48b   :  { %v1958_v14 = vmul.f32 %v3991_v27, %v1957_v33  ;;  %v3619_v33 = vld [vmem:[#allocation12 + $0x84] sm:$0xf0] }
 0x48c   :  { %v3993_v36 = vpop.eup %3992 }
 0x48d   :  { %v1976_v48 = vmul.f32 %v3993_v36, %v1974_v26  ;;  %v1959_v28 = vadd.f32 %v3991_v27, %v1958_v14  ;;  %vm1981_vm12 = vweird.f32 %v3993_v36  ;;  %v3638_v26 = vor.u32 %v3901_v16, %v3637_v15  ;;  %v3884_v15 = vld [vmem:[#allocation12 + $0x1c] sm:$0xf]  ;;  %v3571_v16 = vld [vmem:[#allocation12 + $0x24] sm:$0xf0] }
 0x48e   :  { %vm1982_vm14 = vmor %vm1980_vm13, %vm1981_vm12  ;;  %v3622_v14 = vor.u32 %v3896_v30, %v3619_v33  ;;  %v3557_v33 = vld [vmem:[#allocation12] sm:$0xf] }
 0x48f   :  { %v1977_v39 = vsub.f32 1.0, %v1976_v48  ;;  %v1963_v53 = vsel %vm1962_vm10, %v3991_v27, %v1959_v28  ;;  %v3897_v27 = vld [vmem:[#allocation12 + $0x80] sm:$0xf0]  ;;  %2460 = vmatpush.bf16.msra.mxu1 %v3638_v26  ;;  %v3605_v48 = vld [vmem:[#allocation12 + $0x60] sm:$0xf] }
 0x490   :  { %v1968_v54 = vsel %vm1965_vm11, %v1967_v62, %v1963_v53  ;;  %v3618_v32 = vor.u32 %v3897_v27, %v3617_v22  ;;  %v3894_v28 = vld [vmem:[#allocation12 + $0x68] sm:$0xf0]  ;;  %v3893_v62 = vld [vmem:[#allocation12 + $0x64] sm:$0xf]  ;;  %v3613_v53 = vld [vmem:[#allocation12 + $0x68] sm:$0xf]  ;;  %v3574_v27 = vor.u32 %v3884_v15, %v3571_v16 }
 0x491   :  { %v1978_v50 = vmul.f32 %v3993_v36, %v1977_v39  ;;  %v1990_v38 = vmul.f32 %v1968_v54, %v1947_v51  ;;  %v3606_v39 = vor.u32 %v3894_v28, %v3605_v48  ;;  %v3607_v51 = vld [vmem:[#allocation12 + $0x6c] sm:$0xf0]  ;;  %v3577_v26 = vld [vmem:[#allocation12 + $0x20] sm:$0xf]  ;;  %v3886_v22 = vld [vmem:[#allocation12 + $0x28] sm:$0xf0] }
 0x492   :  { %2435 = vmatpush.bf16.msrb.mxu3 %v3618_v32  ;;  %v3610_v54 = vor.u32 %v3893_v62, %v3607_v51  ;;  %v3578_v30 = vor.u32 %v3886_v22, %v3577_v26  ;;  %v3883_v51 = vld [vmem:[#allocation12 + $0x10] sm:$0xf0] }
 0x493   :  { %v1979_v60 = vadd.f32 %v3993_v36, %v1978_v50  ;;  %v1991_v45 = vadd.f32 %v1990_v38, %v403_v25  ;;  %2461 = vmatpush.bf16.msra.mxu1 %v3626_v35  ;;  %v3895_v25 = vld [vmem:[#allocation12 + $0x70] sm:$0xf0] }
 0x494   :  { %v3614_v50 = vor.u32 %v3895_v25, %v3613_v53  ;;  %v4565_v25 = vld [vmem:[%s4634_s7] ss:$0 sm:$0xff] }
 0x495   :  { %v1983_v47 = vsel %vm1982_vm14, %v3993_v36, %v1979_v60  ;;  %3994 = vtanh.f32 %v1991_v45  ;;  %v2038_v36 = vperm.slane %v4553_v17, 0 }
 0x496   :  { %v1988_v56 = vsel %vm1985_vm15, %v1987_v57, %v1983_v47  ;;  %2436 = vmatpush.bf16.msrb.mxu3 %v3606_v39  ;;  %v3593_v57 = vld [vmem:[#allocation12 + $0x48] sm:$0xf]  ;;  %v3891_v47 = vld [vmem:[#allocation12 + $0x50] sm:$0xf0] }
 0x497   :  { %v1993_v58 = vsub.f32 1.0, %v1988_v56  ;;  %v1995_v29 = vmul.f32 %v1988_v56, %v4522_v21  ;;  %v3890_v56 = vld [vmem:[#allocation12 + $0x4c] sm:$0xf]  ;;  %2462 = vmatpush.bf16.msra.mxu1 %v3614_v50  ;;  %v3565_v39 = vld [vmem:[#allocation12 + $0x8] sm:$0xf] }
 0x498   :  { %v3566_v53 = vor.u32 %v3883_v51, %v3565_v39  ;;  %v379_v51 = vadd.f32 %v4444_v40, %v4400_v41 }
 0x49b   :  { %v3995_v61 = vpop.eup %3994 }
 0x49c   :  { %v1994_v8 = vmul.f32 %v3995_v61, %v1993_v58  ;;  %v3594_v58 = vor.u32 %v3891_v47, %v3593_v57  ;;  %v3595_v61 = vld [vmem:[#allocation12 + $0x54] sm:$0xf0] }
 0x49e   :  { %v4540_v23 = vadd.f32 %v1995_v29, %v1994_v8  ;;  %v3601_v8 = vld [vmem:[#allocation12 + $0x50] sm:$0xf]  ;;  %v3892_v29 = vld [vmem:[#allocation12 + $0x58] sm:$0xf0]  ;;  %2437 = vmatpush.bf16.msrb.mxu3 %v3594_v58 }
 0x4a0   :  { %v2003_v9 = vpack.c.bf16 %v4540_v23, %v4540_v23  ;;  %v2532_v7 = vpack.c.bf16 %v4540_v23, %v4522_v21  ;;  %v3634_v21 = vor.u32 %v3899_v63, %v3631_v20  ;;  %v3590_v63 = vor.u32 %v3889_v5, %v3589_v46  ;;  %v3885_v20 = vld [vmem:[#allocation12 + $0x20] sm:$0xf0] }
 0x4a2   :  { %2180 = vmatmul.bf16.vlgmr.msrb.gmra.mxu0 %v2003_v9  ;;  %2193 = vmatmul.bf16.vlgmr.msrb.gmra.mxu1 %v2003_v9 }
 0x4a3   :  { %2206 = vmatmul.bf16.vlgmr.msrb.gmra.mxu2 %v2003_v9  ;;  %2447 = vmatpush.bf16.msra.mxu0 %v3634_v21  ;;  %v3570_v21 = vor.u32 %v3885_v20, %v3569_v44 }
 0x4a4   :  { %2438 = vmatpush.bf16.msrb.mxu3 %v3582_v6 }
 0x4a7   :  { %2448 = vmatpush.bf16.msra.mxu0 %v3622_v14 }
 0x4a8   :  { %2439 = vmatpush.bf16.msrb.mxu3 %v3570_v21 }
 0x4ab   :  { %2449 = vmatpush.bf16.msra.mxu0 %v3610_v54 }
 0x4b3   :  { %2610 = vmatmul.bf16.vlgmr.msra.gmra.mxu2 %v2530_v24 }
 0x4c3   :  { %2615 = vmatmul.bf16.gmra.mxu2 %v2531_v49  ;;  %v3598_v49 = vor.u32 %v3890_v56, %v3595_v61  ;;  %v2040_v56 = vperm.slane %v4553_v17, 2  ;;  %v406_v17 = vadd.f32 %v4373_v31, %v4420_v52 }
 0x4c5   :  { %2450 = vmatpush.bf16.msra.mxu0 %v3598_v49 }
 0x4c9   :  { %2451 = vmatpush.bf16.msra.mxu0 %v3586_v12 }
 0x4cd   :  { %2452 = vmatpush.bf16.msra.mxu0 %v3574_v27 }
 0x4d3   :  { %2620 = vmatmul.bf16.gmra.mxu2 %v2532_v7  ;;  %v3602_v7 = vor.u32 %v3892_v29, %v3601_v8 }
 0x4d5   :  { %2463 = vmatpush.bf16.msra.mxu1 %v3602_v7 }
 0x4d9   :  { %2464 = vmatpush.bf16.msra.mxu1 %v3590_v63 }
 0x4dd   :  { %2465 = vmatpush.bf16.msra.mxu1 %v3578_v30 }
 0x4e1   :  { %2466 = vmatpush.bf16.msra.mxu1 %v3566_v53 }
 0x51f   :  { %v2181_v55 = vpop.f32.mrf.mxu0  ;;  %v2194_v38 = vpop.f32.mrf.mxu1 }
 0x520   :  { %v2182_v60 = vadd.f32 %v2181_v55, %v2038_v36  ;;  %v2195_v45 = vadd.f32 %v2194_v38, %v2039_v37  ;;  %v3558_v36 = vor.u32 %v3882_v34, %v3557_v33  ;;  %v3559_v37 = vld [vmem:[#allocation12 + $0xc] sm:$0xf0] }
 0x521   :  { %v3562_v62 = vor.u32 %v3881_v1, %v3559_v37  ;;  %v2297_v37 = vld [vmem:[%s4632_s5] sm:$0x7]  ;;  %s4262_s5 = smov [#allocation16]  }
 0x522   :  { %v2211_v9 = vadd.f32 %v2182_v60, %v4394_v13  ;;  %v2231_v24 = vadd.f32 %v2195_v45, %v377_v18  ;;  %2440 = vmatpush.bf16.msrb.mxu3 %v3558_v36  ;;  %s2737_s0 = sshll.u32 %s4262_s5, 4  ;;  %s2738_s0 = int_to_ptr.vmem [resolvable:$true] %s2737_s0 }
 0x523   :  { %2453 = vmatpush.bf16.msra.mxu0 %v3562_v62 }
 0x524   :  { %v3553_v10 = vmul.f32 -1.442695, %v2211_v9  ;;  %v3554_v0 = vmul.f32 -1.442695, %v2231_v24 }
 0x526   :  { %3996 = vpow2.f32 %v3553_v10  ;;  %v4560_v4 = vpop.f32.mrf.mxu2 }
 0x527   :  { %3998 = vpow2.f32 %v3554_v0  ;;  %v2183_v13 = vpop.f32.mrf.mxu0  ;;  %v2196_v3 = vpop.f32.mrf.mxu1  ;;  %v2208_v24 = vadd.f32 %v4560_v4, %v2040_v56 }
 0x52c   :  { %v3997_v32 = vpop.eup %3996 }
 0x52d   :  { %v3999_v14 = vpop.eup %3998  ;;  %v2215_v35 = vadd.f32 1.0, %v3997_v32 }
 0x52e   :  { %v2235_v48 = vadd.f32 1.0, %v3999_v14  ;;  %v2209_v28 = vpop.f32.mrf.mxu2 }
 0x52f   :  { %4000 = vrcp.f32 %v2215_v35  ;;  %v2227_v47 = vand.u32 2147483648, %v2215_v35  ;;  %v2225_v61 = vand.u32 2147483647, %v2215_v35  ;;  %vm2221_vm1 = vweird.f32 %v2215_v35 }
 0x530   :  { %4002 = vrcp.f32 %v2235_v48  ;;  %v2247_v2 = vand.u32 2147483648, %v2235_v48  ;;  %vm2241_vm5 = vweird.f32 %v2235_v48  ;;  %v2245_v11 = vand.u32 2147483647, %v2235_v48 }
 0x531   :  { %v2228_v9 = vor.u32 1.1754944e-38, %v2227_v47  ;;  %vm2226_vm3 = vcmp.eq.f32.partialorder %v2225_v61, 8.507059e+37 }
 0x532   :  { %v2248_v12 = vor.u32 1.1754944e-38, %v2247_v2  ;;  %vm2246_vm7 = vcmp.eq.f32.partialorder %v2245_v11, 8.507059e+37 }
 0x535   :  { %v4001_v54 = vpop.eup %4000 }
 0x536   :  { %v4003_v50 = vpop.eup %4002  ;;  %v2217_v55 = vmul.f32 %v4001_v54, %v2215_v35  ;;  %v2611_v38 = vpop.f32.mrf.mxu2  ;;  %vm2222_vm0 = vweird.f32 %v4001_v54 }
 0x537   :  { %v2237_v18 = vmul.f32 %v4003_v50, %v2235_v48  ;;  %v2612_v60 = vadd.f32 %v4565_v25, %v2611_v38  ;;  %vm2223_vm2 = vmor %vm2221_vm1, %vm2222_vm0  ;;  %vm2242_vm4 = vweird.f32 %v4003_v50  ;;  %v2300_v48 = vperm.slane %v2297_v37, 1 }
 0x538   :  { %v2218_v45 = vsub.f32 1.0, %v2217_v55  ;;  %vm2243_vm6 = vmor %vm2241_vm5, %vm2242_vm4 }
 0x539   :  { %v2238_v57 = vsub.f32 1.0, %v2237_v18  ;;  %2631 = vmax.xlane.f32.xlu0 %v2612_v60 }
 0x53a   :  { %v2219_v58 = vmul.f32 %v4001_v54, %v2218_v45 }
 0x53b   :  { %v2239_v8 = vmul.f32 %v4003_v50, %v2238_v57 }
 0x53c   :  { %v2220_v29 = vadd.f32 %v4001_v54, %v2219_v58 }
 0x53d   :  { %v2240_v0 = vadd.f32 %v4003_v50, %v2239_v8 }
 0x53e   :  { %v2224_v49 = vsel %vm2223_vm2, %v4001_v54, %v2220_v29  ;;  %v2613_v7 = vpop.f32.mrf.mxu2  ;;  %v2299_v54 = vperm.slane %v2297_v37, 0 }
 0x53f   :  { %v2229_v10 = vsel %vm2226_vm3, %v2228_v9, %v2224_v49  ;;  %v4571_v59 = vadd.f32 %v4565_v25, %v2613_v7  ;;  %v2244_v6 = vsel %vm2243_vm6, %v4003_v50, %v2240_v0  ;;  %v2301_v0 = vperm.slane %v2297_v37, 2 }
 0x540   :  { %v2251_v19 = vmul.f32 %v2229_v10, %v2208_v24  ;;  %v2249_v46 = vsel %vm2246_vm7, %v2248_v12, %v2244_v6 }
 0x541   :  { %2633 = vmax.xlane.f32.xlu0 %v4571_v59  ;;  %v2254_v3 = vsub.f32 1.0, %v2249_v46  ;;  %v2256_v44 = vmul.f32 %v2249_v46, %v4540_v23 }
 0x542   :  { %v2252_v4 = vadd.f32 %v2251_v19, %v406_v17 }
 0x544   :  { %4004 = vtanh.f32 %v2252_v4 }
 0x546   :  { %v2616_v5 = vpop.f32.mrf.mxu2 }
 0x547   :  { %v4577_v13 = vadd.f32 %v4565_v25, %v2616_v5  ;;  %v408_v5 = vadd.f32 %v4378_v43, %v4420_v52 }
 0x549   :  { %2635 = vmax.xlane.f32.xlu1 %v4577_v13 }
 0x54a   :  { %v4005_v31 = vpop.eup %4004 }
 0x54b   :  { %v2255_v63 = vmul.f32 %v4005_v31, %v2254_v3 }
 0x54d   :  { %v4581_v20 = vadd.f32 %v2256_v44, %v2255_v63 }
 0x54e   :  { %v2618_v15 = vpop.f32.mrf.mxu2 }
 0x54f   :  { %v2619_v21 = vadd.f32 %v4565_v25, %v2618_v15  ;;  %v2264_v16 = vpack.c.bf16 %v4581_v20, %v4581_v20 }
 0x551   :  { %2637 = vmax.xlane.f32.xlu1 %v2619_v21  ;;  %2441 = vmatmul.bf16.vlgmr.msrb.gmra.mxu3 %v2264_v16 }
 0x552   :  { %2454 = vmatmul.bf16.vlgmr.msra.gmra.mxu0 %v2264_v16  ;;  %2467 = vmatmul.bf16.vlgmr.msra.gmra.mxu1 %v2264_v16 }
 0x556   :  { %v2621_v26 = vpop.f32.mrf.mxu2 }
 0x557   :  { %v4587_v22 = vadd.f32 %v4565_v25, %v2621_v26 }
 0x559   :  { %2639 = vmax.xlane.f32.xlu2 %v4587_v22 }
 0x55e   :  { %v2623_v27 = vpop.f32.mrf.mxu2 }
 0x55f   :  { %v4591_v23 = vadd.f32 %v4565_v25, %v2623_v27 }
 0x561   :  { %2641 = vmax.xlane.f32.xlu2 %v4591_v23 }
 0x5ac   :  { %v2632_v30 = vpop.xlane.xlu0 %2631 }
 0x5ad   :  { %v4594_v32 = vsub.f32 %v2612_v60, %v2632_v30 }
 0x5af   :  { %v2655_v33 = vmul.f32 1.442695, %v4594_v32 }
 0x5b1   :  { %4006 = vpow2.f32 %v2655_v33 }
 0x5b7   :  { %v4007_v34 = vpop.eup %4006 }
 0x5b8   :  { %2671 = vadd.xlane.f32.xlu2 %v4007_v34 }
 0x5bc   :  { %v4597_v1 = vpop.xlane.xlu1 %2635 }
 0x5c4   :  { %v2638_v14 = vpop.xlane.xlu1 %2637 }
 0x5c5   :  { %v4599_v35 = vsub.f32 %v2619_v21, %v2638_v14 }
 0x5c7   :  { %v2661_v36 = vmul.f32 1.442695, %v4599_v35 }
 0x5c9   :  { %4008 = vpow2.f32 %v2661_v36 }
 0x5cc   :  { %v2640_v43 = vpop.xlane.xlu2 %2639 }
 0x5cf   :  { %v4009_v28 = vpop.eup %4008  ;;  %v2455_v62 = vpop.f32.mrf.mxu0 }
 0x5d0   :  { %v2468_v39 = vpop.f32.mrf.mxu1  ;;  %v2456_v53 = vadd.f32 %v2455_v62, %v2300_v48  ;;  %2677 = vadd.xlane.f32.xlu2 %v4009_v28 }
 0x5d1   :  { %v2469_v4 = vadd.f32 %v2468_v39, %v2301_v0 }
 0x5d2   :  { %v2492_v50 = vadd.f32 %v2456_v53, %v379_v51 }
 0x5d4   :  { %v3652_v55 = vmul.f32 -1.442695, %v2492_v50  ;;  %v2442_v38 = vpop.f32.mrf.mxu3  ;;  %v2642_v52 = vpop.xlane.xlu2 %2641 }
 0x5d5   :  { %v2443_v18 = vadd.f32 %v2442_v38, %v2299_v54  ;;  %v2634_v54 = vpop.xlane.xlu0 %2633 }
 0x5d6   :  { %4010 = vpow2.f32 %v3652_v55 }
 0x5d7   :  { %v2472_v60 = vadd.f32 %v2443_v18, %v4403_v42  ;;  %v2457_v45 = vpop.f32.mrf.mxu0  ;;  %v2649_v18 = vsub.f32 %v4577_v13, %v4597_v1 }
 0x5d8   :  { %v2470_v57 = vpop.f32.mrf.mxu1 }
 0x5d9   :  { %v3651_v47 = vmul.f32 -1.442695, %v2472_v60  ;;  %v2659_v60 = vmul.f32 1.442695, %v2649_v18 }
 0x5db   :  { %4012 = vpow2.f32 %v3651_v47 }
 0x5dc   :  { %v4011_v56 = vpop.eup %4010  ;;  %v2444_v58 = vpop.f32.mrf.mxu3 }
 0x5dd   :  { %v2496_v61 = vadd.f32 1.0, %v4011_v56 }
 0x5df   :  { %4014 = vrcp.f32 %v2496_v61  ;;  %v2508_v3 = vand.u32 2147483648, %v2496_v61  ;;  %vm2502_vm13 = vweird.f32 %v2496_v61  ;;  %v2506_v63 = vand.u32 2147483647, %v2496_v61 }
 0x5e1   :  { %v4013_v8 = vpop.eup %4012  ;;  %v2509_v21 = vor.u32 1.1754944e-38, %v2508_v3  ;;  %vm2507_vm15 = vcmp.eq.f32.partialorder %v2506_v63, 8.507059e+37 }
 0x5e2   :  { %v2476_v41 = vadd.f32 1.0, %v4013_v8 }
 0x5e4   :  { %4016 = vrcp.f32 %v2476_v41  ;;  %v2488_v10 = vand.u32 2147483648, %v2476_v41  ;;  %v2486_v17 = vand.u32 2147483647, %v2476_v41  ;;  %vm2482_vm9 = vweird.f32 %v2476_v41 }
 0x5e5   :  { %v4015_v40 = vpop.eup %4014 }
 0x5e6   :  { %v2498_v29 = vmul.f32 %v4015_v40, %v2496_v61  ;;  %v2489_v11 = vor.u32 1.1754944e-38, %v2488_v10  ;;  %vm2487_vm11 = vcmp.eq.f32.partialorder %v2486_v17, 8.507059e+37  ;;  %vm2503_vm12 = vweird.f32 %v4015_v40 }
 0x5e7   :  { %vm2504_vm14 = vmor %vm2502_vm13, %vm2503_vm12 }
 0x5e8   :  { %v2499_v49 = vsub.f32 1.0, %v2498_v29 }
 0x5ea   :  { %v4017_v9 = vpop.eup %4016  ;;  %v2500_v2 = vmul.f32 %v4015_v40, %v2499_v49 }
 0x5eb   :  { %v2478_v24 = vmul.f32 %v4017_v9, %v2476_v41  ;;  %vm2483_vm8 = vweird.f32 %v4017_v9 }
 0x5ec   :  { %vm2484_vm10 = vmor %vm2482_vm9, %vm2483_vm8  ;;  %v2501_v46 = vadd.f32 %v4015_v40, %v2500_v2 }
 0x5ed   :  { %v2479_v7 = vsub.f32 1.0, %v2478_v24 }
 0x5ee   :  { %v2505_v15 = vsel %vm2504_vm14, %v4015_v40, %v2501_v46 }
 0x5ef   :  { %v2480_v42 = vmul.f32 %v4017_v9, %v2479_v7  ;;  %v2510_v16 = vsel %vm2507_vm15, %v2509_v21, %v2505_v15 }
 0x5f0   :  { %v2515_v26 = vsub.f32 1.0, %v2510_v16  ;;  %v2517_v33 = vmul.f32 %v2510_v16, %v4581_v20 }
 0x5f1   :  { %v2481_v19 = vadd.f32 %v4017_v9, %v2480_v42 }
 0x5f3   :  { %v2485_v6 = vsel %vm2484_vm10, %v4017_v9, %v2481_v19 }
 0x5f4   :  { %v2490_v12 = vsel %vm2487_vm11, %v2489_v11, %v2485_v6 }
 0x5f5   :  { %v2512_v31 = vmul.f32 %v2490_v12, %v2469_v4 }
 0x5f7   :  { %v2513_v44 = vadd.f32 %v2512_v31, %v408_v5 }
 0x5f9   :  { %4018 = vtanh.f32 %v2513_v44 }
 0x5ff   :  { %v4019_v27 = vpop.eup %4018 }
 0x600   :  { %v2516_v30 = vmul.f32 %v4019_v27, %v2515_v26 }
 0x602   :  { %v2518_v34 = vadd.f32 %v2517_v33, %v2516_v30 }
 0x604   :  { %v2533_v14 = vpack.c.bf16 %v2518_v34, %v4581_v20  ;;  %2521 = vst [vmem:[#allocation16] sm:$0xff] %v2518_v34  ;;  %v2648_v20 = vsub.f32 %v4571_v59, %v2634_v54  ;;  %v2652_v59 = vsub.f32 %v4591_v23, %v2642_v52 }
 0x605   :  { %2742 = dma.vmem_to_hbm [thread:$0]  %s2738_s0, 128, %s2740_s12, [#allocation17]  }
 0x606   :  { %2625 = vmatmul.bf16.gmra.mxu2 %v2533_v14  ;;  %v2657_v50 = vmul.f32 1.442695, %v2648_v20  ;;  %v2665_v56 = vmul.f32 1.442695, %v2652_v59 }
 0x62b   :  { %v2672_v36 = vpop.xlane.xlu2 %2671 }
 0x62c   :  { %4020 = vlog2.f32 %v2672_v36 }
 0x632   :  { %v4021_v37 = vpop.eup %4020 }
 0x633   :  { %v2688_v48 = vmul.f32 0.6931472, %v4021_v37 }
 0x635   :  { %v2703_v28 = vsub.f32 %v4594_v32, %v2688_v48  ;;  %v2651_v32 = vsub.f32 %v4587_v22, %v2640_v43 }
 0x637   :  { %2711 = vst [vmem:[#allocation15] sm:$0xff] %v2703_v28  ;;  %v2663_v45 = vmul.f32 1.442695, %v2651_v32 }
 0x643   :  { %v2678_v62 = vpop.xlane.xlu2 %2677 }
 0x644   :  { %4022 = vlog2.f32 %v2678_v62 }
 0x645   :  { %4024 = vpow2.f32 %v2657_v50 }
 0x646   :  { %4026 = vpow2.f32 %v2659_v60 }
 0x647   :  { %4028 = vpow2.f32 %v2663_v45 }
 0x648   :  { %4030 = vpow2.f32 %v2665_v56 }
 0x64a   :  { %v4023_v39 = vpop.eup %4022 }
 0x64b   :  { %v2694_v51 = vmul.f32 0.6931472, %v4023_v39  ;;  %v4025_v47 = vpop.eup %4024 }
 0x64c   :  { %v4027_v58 = vpop.eup %4026 }
 0x64d   :  { %v2706_v53 = vsub.f32 %v4599_v35, %v2694_v51  ;;  %v4029_v61 = vpop.eup %4028 }
 0x64e   :  { %v4031_v13 = vpop.eup %4030 }
 0x64f   :  { %2714 = vst [vmem:[#allocation15 + $0x18] sm:$0xff] %v2706_v53 }
 0x689   :  { %v2626_v55 = vpop.f32.mrf.mxu2 }
 0x68a   :  { %v2627_v38 = vadd.f32 %v4565_v25, %v2626_v55 }
 0x68c   :  { %2643 = vmax.xlane.f32.xlu0 %v2627_v38 }
 0x691   :  { %v2628_v57 = vpop.f32.mrf.mxu2 }
 0x692   :  { %v2629_v35 = vadd.f32 %v4565_v25, %v2628_v57 }
 0x694   :  { %2645 = vmax.xlane.f32.xlu1 %v2629_v35  ;;  %2673 = vadd.xlane.f32.xlu0 %v4025_v47 }
 0x69c   :  { %2675 = vadd.xlane.f32.xlu1 %v4027_v58  ;;  %2679 = vadd.xlane.f32.xlu0 %v4029_v61 }
 0x6a4   :  { %2681 = vadd.xlane.f32.xlu1 %v4031_v13 }
 0x6ff   :  { %v2644_v22 = vpop.xlane.xlu0 %2643 }
 0x700   :  { %v2653_v1 = vsub.f32 %v2627_v38, %v2644_v22 }
 0x702   :  { %v2667_v8 = vmul.f32 1.442695, %v2653_v1 }
 0x704   :  { %4032 = vpow2.f32 %v2667_v8 }
 0x707   :  { %v2646_v25 = vpop.xlane.xlu1 %2645  ;;  %v2674_v41 = vpop.xlane.xlu0 %2673 }
 0x708   :  { %v2654_v40 = vsub.f32 %v2629_v35, %v2646_v25  ;;  %4034 = vlog2.f32 %v2674_v41 }
 0x70a   :  { %v4033_v29 = vpop.eup %4032  ;;  %v2669_v9 = vmul.f32 1.442695, %v2654_v40 }
 0x70b   :  { %2683 = vadd.xlane.f32.xlu2 %v4033_v29 }
 0x70c   :  { %4036 = vpow2.f32 %v2669_v9 }
 0x70e   :  { %v4035_v23 = vpop.eup %4034 }
 0x70f   :  { %v2690_v24 = vmul.f32 0.6931472, %v4035_v23  ;;  %v2676_v49 = vpop.xlane.xlu1 %2675  ;;  %v2680_v7 = vpop.xlane.xlu0 %2679 }
 0x710   :  { %4038 = vlog2.f32 %v2676_v49 }
 0x711   :  { %v2704_v10 = vsub.f32 %v2648_v20, %v2690_v24  ;;  %4040 = vlog2.f32 %v2680_v7 }
 0x712   :  { %v4037_v0 = vpop.eup %4036 }
 0x713   :  { %2712 = vst [vmem:[#allocation15 + $0x8] sm:$0xff] %v2704_v10  ;;  %2685 = vadd.xlane.f32.xlu0 %v4037_v0 }
 0x716   :  { %v4039_v42 = vpop.eup %4038 }
 0x717   :  { %v4041_v17 = vpop.eup %4040  ;;  %v2692_v2 = vmul.f32 0.6931472, %v4039_v42  ;;  %v2682_v19 = vpop.xlane.xlu1 %2681 }
 0x718   :  { %v2696_v11 = vmul.f32 0.6931472, %v4041_v17  ;;  %4042 = vlog2.f32 %v2682_v19 }
 0x719   :  { %v2705_v4 = vsub.f32 %v2649_v18, %v2692_v2 }
 0x71a   :  { %v2707_v6 = vsub.f32 %v2651_v32, %v2696_v11 }
 0x71b   :  { %2713 = vst [vmem:[#allocation15 + $0x10] sm:$0xff] %v2705_v4 }
 0x71c   :  { %2715 = vst [vmem:[#allocation15 + $0x20] sm:$0xff] %v2707_v6 }
 0x71e   :  { %v4043_v12 = vpop.eup %4042 }
 0x71f   :  { %v2698_v46 = vmul.f32 0.6931472, %v4043_v12 }
 0x721   :  { %v2708_v5 = vsub.f32 %v2652_v59, %v2698_v46 }
 0x723   :  { %2716 = vst [vmem:[#allocation15 + $0x28] sm:$0xff] %v2708_v5 }
 0x77e   :  { %v2684_v3 = vpop.xlane.xlu2 %2683 }
 0x77f   :  { %4044 = vlog2.f32 %v2684_v3 }
 0x785   :  { %v4045_v31 = vpop.eup %4044 }
 0x786   :  { %v2700_v63 = vmul.f32 0.6931472, %v4045_v31  ;;  %v2686_v44 = vpop.xlane.xlu0 %2685 }
 0x787   :  { %4046 = vlog2.f32 %v2686_v44 }
 0x788   :  { %v2709_v15 = vsub.f32 %v2653_v1, %v2700_v63 }
 0x78a   :  { %2717 = vst [vmem:[#allocation15 + $0x30] sm:$0xff] %v2709_v15 }
 0x78d   :  { %v4047_v21 = vpop.eup %4046 }
 0x78e   :  { %v2702_v16 = vmul.f32 0.6931472, %v4047_v21 }
 0x790   :  { %v2710_v26 = vsub.f32 %v2654_v40, %v2702_v16 }
 0x792   :  { %2718 = vst [vmem:[#allocation15 + $0x38] sm:$0xff] %v2710_v26 }
 0x793   :  { %2731 = dma.vmem_to_hbm [thread:$0]  %s2724_s13, 1024, %s2726_s15, [#allocation6], %s4264_s16, %s4264_s16, %s4265_s17  }
 0x794   :  { %4248 = dma.done.wait [#allocation6], 1024  }
 0x795   :  { %4249 = vsyncadd [#allocation6], 4294966272 }
 0x796   :  { %4250 = dma.done.wait [#allocation17], 128  }
 0x797   :  { %4251 = vsyncadd [#allocation17], 4294967168 }
 0x798   :  { %2751 = vsyncpa [#allocation5], 1 }
 0x799   :  { %2752 = vsyncpa [#allocation8], 1 }
 0x79a   :  { %2753 = vsyncpa [#allocation11], 1 }
 0x79b   :  { %2754 = vsyncpa [#allocation14], 1 }
 0x79c   :  { %2755 = vsyncpa [#allocation6], 1 }
 0x79d   :  { %2756 = vsyncpa [#allocation17], 1 }

</bundles_post_ra>
